<compile_context>
chip_gen: v7x
topology: tpu7x:2x2x1
jax: 0.10.0
libtpu: 0.0.40
codegen_flags: <defaults>
</compile_context>

<pallas_src>
import jax
import jax.numpy as jnp
from jax import lax
from jax.experimental import pallas as pl
from jax.experimental.pallas import tpu as pltpu

F_IN = 4      # num_features
H1 = 8        # conv1 out
H2 = 16       # conv2 out (== Set2Set in_channels)
STEPS = 4     # Set2Set processing_steps
OUT = 2       # fc out

B_PAD = 8     # graphs-per-instance padded to one sublane group
OUT_PAD = 128 # fc output padded to one full lane group (unmasked store)

# ---- packed f32 weight-slab layout (all blocks start on 8-row boundaries) ----
R_WL1 = 0                     # (F_IN, H1) in an (8, 16) block
R_WR1 = 8
R_B1 = 16                     # bias row
R_WL2 = 24                    # (H1, H2) stored in a (16, 16) block (rows H1.. zero)
R_WR2 = 40
R_B2 = 56
R_LSTM = 64                   # 4 gates: fused (2*H2, H2) weight + bias row
GATE_STRIDE = 2 * H2 + 8      # 40 = 32 weight rows + 8-row bias block
R16_TOTAL = R_LSTM + 4 * GATE_STRIDE      # 224 rows x 16 lanes

RF_W = 0                      # fc slab (width OUT_PAD): [wfc_q; wfc_r] then bias
RF_B = 2 * H2                 # 32
RF_TOTAL = 40


def set2setnet_kernel(x_ref, A_ref, S_ref, w16_ref, wfc_ref, out_ref):
    bf16 = jnp.bfloat16
    f32 = jnp.float32

    x = x_ref[...]                       # (KN, F_IN) f32
    A = A_ref[...]                       # (KN, KN)   bf16 block-diagonal 0/1
    S = S_ref[...]                       # (KB, KN)   f32 one-hot (pad rows = 0)

    # mean-aggregation normalization (block-diagonal A -> per-instance degrees)
    deg = jnp.sum(A.astype(f32), axis=1, keepdims=True)               # (KN, 1)
    inv_deg = pl.reciprocal(jnp.maximum(deg, 1.0))                     # exact

    # ---- SAGEConv1 + ReLU (outputs padded to 16 lanes; cols H1.. stay 0) ----
    wl1 = w16_ref[R_WL1:R_WL1 + F_IN, :].astype(bf16)
    wr1 = w16_ref[R_WR1:R_WR1 + F_IN, :].astype(bf16)
    b1 = w16_ref[R_B1:R_B1 + 1, :]
    xb = x.astype(bf16)
    agg1 = jnp.dot(A, xb, preferred_element_type=f32) * inv_deg       # (KN, F_IN)
    h1 = jnp.maximum(
        jnp.dot(agg1.astype(bf16), wl1, preferred_element_type=f32)
        + jnp.dot(xb, wr1, preferred_element_type=f32) + b1, 0.0)     # (KN, 16)

    # ---- SAGEConv2 + ReLU ----
    wl2 = w16_ref[R_WL2:R_WL2 + H2, :].astype(bf16)
    wr2 = w16_ref[R_WR2:R_WR2 + H2, :].astype(bf16)
    b2 = w16_ref[R_B2:R_B2 + 1, :]
    h1b = h1.astype(bf16)
    agg2 = jnp.dot(A, h1b, preferred_element_type=f32) * inv_deg      # (KN, 16)
    h2 = jnp.maximum(
        jnp.dot(agg2.astype(bf16), wl2, preferred_element_type=f32)
        + jnp.dot(h1b, wr2, preferred_element_type=f32) + b2, 0.0)    # (KN, 16)

    h2b = h2.astype(bf16)

    # ---- Set2Set: q == h_state, so gates are a single [h, r] @ fused-W matmul ----
    gate_w = []
    for k in range(4):                               # PyTorch gate order i,f,g,o
        base = R_LSTM + k * GATE_STRIDE
        gate_w.append((w16_ref[base:base + 2 * H2, :].astype(bf16),    # (32, 16)
                       w16_ref[base + 2 * H2:base + 2 * H2 + 1, :]))   # bias (f32)

    mask = S > 0.0
    neg_big = jnp.float32(-1e30)
    KB = S.shape[0]
    h_state = jnp.zeros((KB, H2), f32)
    c_state = jnp.zeros((KB, H2), f32)
    r = jnp.zeros((KB, H2), f32)

    for _ in range(STEPS):
        hr = jnp.concatenate([h_state, r], axis=1).astype(bf16)       # (KB, 32)
        acts = [jnp.dot(hr, wg, preferred_element_type=f32) + bg
                for wg, bg in gate_w]                                  # 4 matmuls
        i_g = jax.nn.sigmoid(acts[0])
        f_g = jax.nn.sigmoid(acts[1])
        g_g = jnp.tanh(acts[2])
        o_g = jax.nn.sigmoid(acts[3])
        c_state = f_g * c_state + i_g * g_g
        h_state = o_g * jnp.tanh(c_state)                              # == q

        # attention e[b, n] = <q_b, h2_n>; per-graph masked softmax.
        e_mat = lax.dot_general(h_state.astype(bf16), h2b,
                                (((1,), (1,)), ((), ())),
                                preferred_element_type=f32)            # (KB, KN)
        e_mat = jnp.where(mask, e_mat, neg_big)
        m = jnp.max(e_mat, axis=1, keepdims=True)
        # Masked entries underflow to exactly 0 for rows with >= 1 real node.
        # Fully-masked pad rows get a uniform (garbage) attention; they never
        # mix with real rows and are sliced off in the wrapper.
        p = jnp.exp(e_mat - m)
        denom = jnp.maximum(jnp.sum(p, axis=1, keepdims=True), 1e-30)
        a_mat = p * pl.reciprocal(denom, approx=True)
        r = jnp.dot(a_mat.astype(bf16), h2b, preferred_element_type=f32)  # (KB, 16)

    # ---- fc on [q, r]; lane-dense 128-wide store ----
    hr = jnp.concatenate([h_state, r], axis=1).astype(bf16)           # (KB, 32)
    wfc = wfc_ref[RF_W:RF_W + 2 * H2, :].astype(bf16)
    bfc = wfc_ref[RF_B:RF_B + 1, :]
    out_ref[...] = jnp.dot(hr, wfc, preferred_element_type=f32) + bfc


def pack_params(p):
    """Pack weights/biases into two 8-row-aligned f32 slabs (bf16-cast in-kernel)."""
    w16 = jnp.zeros((R16_TOTAL, H2), jnp.float32)
    w16 = w16.at[R_WL1:R_WL1 + F_IN, :H1].set(p["wl1"])
    w16 = w16.at[R_WR1:R_WR1 + F_IN, :H1].set(p["wr1"])
    w16 = w16.at[R_B1, :H1].set(p["b1"][0])
    w16 = w16.at[R_WL2:R_WL2 + H1, :].set(p["wl2"])
    w16 = w16.at[R_WR2:R_WR2 + H1, :].set(p["wr2"])
    w16 = w16.at[R_B2, :].set(p["b2"][0])
    b_gates = p["bih"] + p["bhh"]                        # (1, 4*H2)
    for k in range(4):                                   # PyTorch gate order i,f,g,o
        base = R_LSTM + k * GATE_STRIDE
        cols = slice(k * H2, (k + 1) * H2)
        # q == h_state at every Set2Set step -> fold w_ih(q half) + w_hh (bit-exact)
        w16 = w16.at[base:base + H2, :].set(p["wih"][:H2, cols] + p["whh"][:, cols])
        w16 = w16.at[base + H2:base + 2 * H2, :].set(p["wih"][H2:, cols])
        w16 = w16.at[base + 2 * H2, :].set(b_gates[0, cols])
    wfc = jnp.zeros((RF_TOTAL, OUT_PAD), jnp.float32)
    wfc = wfc.at[RF_W:RF_W + 2 * H2, :OUT].set(p["wfc"])
    wfc = wfc.at[RF_B, :OUT].set(p["bfc"][0])
    return w16, wfc


def set2setnet_forward(x, A, S, params, *, instances_per_block=8):
    """x: (G, N, F_IN), A: (G, N, N) 0/1, S: (G, B, N) one-hot -> (G, B, OUT).

    instances_per_block = K packs K independent instances into one
    block-diagonal super-block per grid step (K=8 fills the 128-wide v5e MXU;
    use K=16 on v6e/v7x for their 256-wide MXU).
    """
    G, N, _ = x.shape
    B = S.shape[1]
    assert B <= B_PAD
    K = instances_per_block
    assert G % K == 0, "pad instance count to a multiple of instances_per_block"
    GS = G // K
    KN = K * N
    KB = K * B_PAD

    # ---- block-diagonal super-block packing ----
    x_sb = x.astype(jnp.float32).reshape(GS, KN, F_IN)
    A_r = A.astype(jnp.bfloat16).reshape(GS, K, N, N)    # exact for 0/1; halves DMA
    S_r = S.astype(jnp.float32).reshape(GS, K, B, N)
    A_sb = jnp.zeros((GS, KN, KN), jnp.bfloat16)
    S_sb = jnp.zeros((GS, KB, KN), jnp.float32)
    for k in range(K):
        ns = k * N
        A_sb = A_sb.at[:, ns:ns + N, ns:ns + N].set(A_r[:, k])
        S_sb = S_sb.at[:, k * B_PAD:k * B_PAD + B, ns:ns + N].set(S_r[:, k])

    w16, wfc = pack_params(params)

    out = pl.pallas_call(
        set2setnet_kernel,
        out_shape=jax.ShapeDtypeStruct((GS, KB, OUT_PAD), jnp.float32),
        grid=(GS,),
        in_specs=[
            pl.BlockSpec((None, KN, F_IN), lambda g: (g, 0, 0)),
            pl.BlockSpec((None, KN, KN), lambda g: (g, 0, 0)),
            pl.BlockSpec((None, KB, KN), lambda g: (g, 0, 0)),
            pl.BlockSpec((R16_TOTAL, H2), lambda g: (0, 0)),       # grid-invariant
            pl.BlockSpec((RF_TOTAL, OUT_PAD), lambda g: (0, 0)),   # grid-invariant
        ],
        out_specs=pl.BlockSpec((None, KB, OUT_PAD), lambda g: (g, 0, 0)),
        compiler_params=pltpu.CompilerParams(
            dimension_semantics=("parallel",),
            vmem_limit_bytes=32 * 1024 * 1024),
    )(x_sb, A_sb, S_sb, w16, wfc)

    out = out.reshape(GS, K, B_PAD, OUT_PAD)[:, :, :B, :OUT]
    return out.reshape(G, B, OUT)


def reference_forward(x, A, S, p):
    # plain-JAX reference of the module math for a single instance
    deg = jnp.maximum(A.sum(1, keepdims=True), 1.0)
    h1 = jnp.maximum((A @ x) / deg @ p["wl1"] + p["b1"] + x @ p["wr1"], 0.0)
    h2 = jnp.maximum((A @ h1) / deg @ p["wl2"] + p["b2"] + h1 @ p["wr2"], 0.0)
    B = S.shape[0]
    q_star = jnp.zeros((B, 2 * H2))
    h = jnp.zeros((B, H2))
    c = jnp.zeros((B, H2))
    for _ in range(STEPS):
        g = q_star @ p["wih"] + h @ p["whh"] + p["bih"] + p["bhh"]
        i_g = jax.nn.sigmoid(g[:, :H2]); f_g = jax.nn.sigmoid(g[:, H2:2 * H2])
        g_g = jnp.tanh(g[:, 2 * H2:3 * H2]); o_g = jax.nn.sigmoid(g[:, 3 * H2:])
        c = f_g * c + i_g * g_g
        h = o_g * jnp.tanh(c)
        E = h @ h2.T
        e_mat = jnp.where(S > 0, E, -1e30)
        m = e_mat.max(1, keepdims=True)
        pmat = jnp.where(S > 0, jnp.exp(e_mat - m), 0.0)
        a = pmat / pmat.sum(1, keepdims=True)
        r = a @ h2
        q_star = jnp.concatenate([h, r], axis=-1)
    return q_star @ p["wfc"] + p["bfc"]


def make_params(key):
    ks = jax.random.split(key, 12)
    s = 0.1
    f32 = jnp.float32
    return {
        # SAGEConv1: lin_l (bias), lin_r (no bias) -- stored transposed for x @ W
        "wl1": (jax.random.normal(ks[0], (F_IN, H1)) * s).astype(f32),
        "wr1": (jax.random.normal(ks[1], (F_IN, H1)) * s).astype(f32),
        "b1":  (jax.random.normal(ks[2], (1, H1)) * s).astype(f32),
        # SAGEConv2
        "wl2": (jax.random.normal(ks[3], (H1, H2)) * s).astype(f32),
        "wr2": (jax.random.normal(ks[4], (H1, H2)) * s).astype(f32),
        "b2":  (jax.random.normal(ks[5], (1, H2)) * s).astype(f32),
        # Set2Set LSTM (input 2*H2, hidden H2), PyTorch gate order i,f,g,o
        "wih": (jax.random.normal(ks[6], (2 * H2, 4 * H2)) * s).astype(f32),
        "whh": (jax.random.normal(ks[7], (H2, 4 * H2)) * s).astype(f32),
        "bih": (jax.random.normal(ks[8], (1, 4 * H2)) * s).astype(f32),
        "bhh": (jax.random.normal(ks[9], (1, 4 * H2)) * s).astype(f32),
        # fc: Linear(2*16, 2)
        "wfc": (jax.random.normal(ks[10], (2 * H2, OUT)) * s).astype(f32),
        "bfc": (jax.random.normal(ks[11], (1, OUT)) * s).astype(f32),
    }


if __name__ == "__main__":
    key = jax.random.PRNGKey(0)
    k_x, k_p = jax.random.split(key)

    # 16 independent graph-batch instances; 8 packed per super-block -> grid=(2,)
    # (keeps both v7x TensorCores busy; raise instances_per_block to 16 on
    #  v6e/v7x to fill the 256-wide MXU).
    G, N, B = 16, 16, 2
    batch = jnp.array([0] * 8 + [1] * 8, dtype=jnp.int32)             # (16,)
    src, dst = [], []
    for gph in range(B):
        base = gph * 8
        for n in range(8):
            a, b = base + n, base + (n + 1) % 8
            src += [a, b]
            dst += [b, a]
    edge_index = jnp.array([src, dst], dtype=jnp.int32)               # (2, 32)

    x = jax.random.normal(k_x, (G, N, F_IN), dtype=jnp.float32)       # data.x per instance

    # glue: dense adjacency (dst, src) and one-hot batch assignment
    A1 = jnp.zeros((N, N), jnp.float32).at[edge_index[1], edge_index[0]].set(1.0)
    S1 = (batch[None, :] == jnp.arange(B)[:, None]).astype(jnp.float32)   # (B, N)
    A = jnp.broadcast_to(A1, (G, N, N))
    S = jnp.broadcast_to(S1, (G, B, N))

    params = make_params(k_p)

    out = jax.block_until_ready(
        set2setnet_forward(x, A, S, params, instances_per_block=8))

    with jax.default_matmul_precision("highest"):
        ref = jnp.stack([reference_forward(x[g], A1, S1, params) for g in range(G)])
        ref = jax.block_until_ready(ref)

    assert out.shape == (G, B, OUT)
    assert jnp.all(jnp.isfinite(out))
    # tolerance accounts for bf16 MXU operands + approx softmax reciprocal
    assert jnp.allclose(out, ref, atol=1e-2, rtol=1e-2)
    print("KERNEL_OK")
</pallas_src>

<mosaic_0001>
module attributes {stable_mosaic.version = 11 : i64} {
  func.func @set2setnet_kernel(%arg0: i32, %arg1: memref<1x128x4xf32, #tpu.memory_space<vmem>>, %arg2: memref<1x128x128xbf16, #tpu.memory_space<vmem>>, %arg3: memref<1x64x128xf32, #tpu.memory_space<vmem>>, %arg4: memref<224x16xf32, #tpu.memory_space<vmem>>, %arg5: memref<40x128xf32, #tpu.memory_space<vmem>>, %arg6: memref<1x64x128xf32, #tpu.memory_space<vmem>>) attributes {dimension_semantics = [#tpu.dimension_semantics<parallel>], iteration_bounds = array<i64: 2>, scalar_prefetch = 0 : i64, scratch_operands = 0 : i64, tpu.core_type = #tpu.core_type<tc>, window_params = [{transform_indices = @transform_0, window_bounds = array<i64: 1, 128, 4>}, {transform_indices = @transform_1, window_bounds = array<i64: 1, 128, 128>}, {transform_indices = @transform_2, window_bounds = array<i64: 1, 64, 128>}, {pipeline_mode = #tpu.pipeline_mode<synchronous>, transform_indices = @transform_3, window_bounds = array<i64: 224, 16>}, {pipeline_mode = #tpu.pipeline_mode<synchronous>, transform_indices = @transform_4, window_bounds = array<i64: 40, 128>}, {transform_indices = @transform_5, window_bounds = array<i64: 1, 64, 128>}]} {
    %c0 = arith.constant 0 : index
    %c0_0 = arith.constant 0 : index
    %c0_1 = arith.constant 0 : index
    %0 = vector.load %arg1[%c0, %c0_0, %c0_1] : memref<1x128x4xf32, #tpu.memory_space<vmem>>, vector<1x128x4xf32>
    %1 = vector.shape_cast %0 : vector<1x128x4xf32> to vector<128x4xf32>
    %c0_2 = arith.constant 0 : index
    %c0_3 = arith.constant 0 : index
    %c0_4 = arith.constant 0 : index
    %2 = vector.load %arg2[%c0_2, %c0_3, %c0_4] : memref<1x128x128xbf16, #tpu.memory_space<vmem>>, vector<1x128x128xbf16>
    %3 = vector.shape_cast %2 : vector<1x128x128xbf16> to vector<128x128xbf16>
    %c0_5 = arith.constant 0 : index
    %c0_6 = arith.constant 0 : index
    %c0_7 = arith.constant 0 : index
    %4 = vector.load %arg3[%c0_5, %c0_6, %c0_7] : memref<1x64x128xf32, #tpu.memory_space<vmem>>, vector<1x64x128xf32>
    %5 = vector.shape_cast %4 : vector<1x64x128xf32> to vector<64x128xf32>
    %6 = arith.extf %3 : vector<128x128xbf16> to vector<128x128xf32>
    %cst = arith.constant dense<0.000000e+00> : vector<128xf32>
    %7 = vector.multi_reduction <add>, %6, %cst [1] : vector<128x128xf32> to vector<128xf32>
    %8 = vector.shape_cast %7 : vector<128xf32> to vector<128x1xf32>
    %cst_8 = arith.constant 1.000000e+00 : f32
    %9 = vector.broadcast %cst_8 : f32 to vector<128x1xf32>
    %10 = arith.maximumf %8, %9 : vector<128x1xf32>
    %11 = tpu.reciprocal %10 : vector<128x1xf32> -> vector<128x1xf32>
    %c0_9 = arith.constant 0 : index
    %c0_10 = arith.constant 0 : index
    %12 = vector.load %arg4[%c0_9, %c0_10] : memref<224x16xf32, #tpu.memory_space<vmem>>, vector<4x16xf32>
    %13 = arith.truncf %12 : vector<4x16xf32> to vector<4x16xbf16>
    %c8 = arith.constant 8 : index
    %c0_11 = arith.constant 0 : index
    %14 = vector.load %arg4[%c8, %c0_11] : memref<224x16xf32, #tpu.memory_space<vmem>>, vector<4x16xf32>
    %15 = arith.truncf %14 : vector<4x16xf32> to vector<4x16xbf16>
    %c16 = arith.constant 16 : index
    %c0_12 = arith.constant 0 : index
    %16 = vector.load %arg4[%c16, %c0_12] : memref<224x16xf32, #tpu.memory_space<vmem>>, vector<1x16xf32>
    %17 = arith.truncf %1 : vector<128x4xf32> to vector<128x4xbf16>
    %cst_13 = arith.constant dense<0.000000e+00> : vector<128x4xf32>
    %18 = tpu.matmul %3, %17, %cst_13 {dimension_numbers = #tpu.dot_dimension_numbers<[1], [0], [0], [1], [0, 0, 1, 1], [], []>} : vector<128x128xbf16>, vector<128x4xbf16>, vector<128x4xf32> -> vector<128x4xf32>
    %19 = vector.broadcast %11 : vector<128x1xf32> to vector<128x4xf32>
    %20 = arith.mulf %18, %19 : vector<128x4xf32>
    %21 = arith.truncf %20 : vector<128x4xf32> to vector<128x4xbf16>
    %cst_14 = arith.constant dense<0.000000e+00> : vector<128x16xf32>
    %22 = tpu.matmul %21, %13, %cst_14 {dimension_numbers = #tpu.dot_dimension_numbers<[1], [0], [0], [1], [0, 0, 1, 1], [], []>} : vector<128x4xbf16>, vector<4x16xbf16>, vector<128x16xf32> -> vector<128x16xf32>
    %cst_15 = arith.constant dense<0.000000e+00> : vector<128x16xf32>
    %23 = tpu.matmul %17, %15, %cst_15 {dimension_numbers = #tpu.dot_dimension_numbers<[1], [0], [0], [1], [0, 0, 1, 1], [], []>} : vector<128x4xbf16>, vector<4x16xbf16>, vector<128x16xf32> -> vector<128x16xf32>
    %24 = arith.addf %22, %23 : vector<128x16xf32>
    %25 = vector.broadcast %16 : vector<1x16xf32> to vector<128x16xf32>
    %26 = arith.addf %24, %25 : vector<128x16xf32>
    %cst_16 = arith.constant 0.000000e+00 : f32
    %27 = vector.broadcast %cst_16 : f32 to vector<128x16xf32>
    %28 = arith.maximumf %26, %27 : vector<128x16xf32>
    %c24 = arith.constant 24 : index
    %c0_17 = arith.constant 0 : index
    %29 = vector.load %arg4[%c24, %c0_17] : memref<224x16xf32, #tpu.memory_space<vmem>>, vector<16x16xf32>
    %30 = arith.truncf %29 : vector<16x16xf32> to vector<16x16xbf16>
    %c40 = arith.constant 40 : index
    %c0_18 = arith.constant 0 : index
    %31 = vector.load %arg4[%c40, %c0_18] : memref<224x16xf32, #tpu.memory_space<vmem>>, vector<16x16xf32>
    %32 = arith.truncf %31 : vector<16x16xf32> to vector<16x16xbf16>
    %c56 = arith.constant 56 : index
    %c0_19 = arith.constant 0 : index
    %33 = vector.load %arg4[%c56, %c0_19] : memref<224x16xf32, #tpu.memory_space<vmem>>, vector<1x16xf32>
    %34 = arith.truncf %28 : vector<128x16xf32> to vector<128x16xbf16>
    %cst_20 = arith.constant dense<0.000000e+00> : vector<128x16xf32>
    %35 = tpu.matmul %3, %34, %cst_20 {dimension_numbers = #tpu.dot_dimension_numbers<[1], [0], [0], [1], [0, 0, 1, 1], [], []>} : vector<128x128xbf16>, vector<128x16xbf16>, vector<128x16xf32> -> vector<128x16xf32>
    %36 = vector.broadcast %11 : vector<128x1xf32> to vector<128x16xf32>
    %37 = arith.mulf %35, %36 : vector<128x16xf32>
    %38 = arith.truncf %37 : vector<128x16xf32> to vector<128x16xbf16>
    %cst_21 = arith.constant dense<0.000000e+00> : vector<128x16xf32>
    %39 = tpu.matmul %38, %30, %cst_21 {dimension_numbers = #tpu.dot_dimension_numbers<[1], [0], [0], [1], [0, 0, 1, 1], [], []>} : vector<128x16xbf16>, vector<16x16xbf16>, vector<128x16xf32> -> vector<128x16xf32>
    %cst_22 = arith.constant dense<0.000000e+00> : vector<128x16xf32>
    %40 = tpu.matmul %34, %32, %cst_22 {dimension_numbers = #tpu.dot_dimension_numbers<[1], [0], [0], [1], [0, 0, 1, 1], [], []>} : vector<128x16xbf16>, vector<16x16xbf16>, vector<128x16xf32> -> vector<128x16xf32>
    %41 = arith.addf %39, %40 : vector<128x16xf32>
    %42 = vector.broadcast %33 : vector<1x16xf32> to vector<128x16xf32>
    %43 = arith.addf %41, %42 : vector<128x16xf32>
    %cst_23 = arith.constant 0.000000e+00 : f32
    %44 = vector.broadcast %cst_23 : f32 to vector<128x16xf32>
    %45 = arith.maximumf %43, %44 : vector<128x16xf32>
    %46 = arith.truncf %45 : vector<128x16xf32> to vector<128x16xbf16>
    %c64 = arith.constant 64 : index
    %c0_24 = arith.constant 0 : index
    %47 = vector.load %arg4[%c64, %c0_24] : memref<224x16xf32, #tpu.memory_space<vmem>>, vector<32x16xf32>
    %48 = arith.truncf %47 : vector<32x16xf32> to vector<32x16xbf16>
    %c96 = arith.constant 96 : index
    %c0_25 = arith.constant 0 : index
    %49 = vector.load %arg4[%c96, %c0_25] : memref<224x16xf32, #tpu.memory_space<vmem>>, vector<1x16xf32>
    %c104 = arith.constant 104 : index
    %c0_26 = arith.constant 0 : index
    %50 = vector.load %arg4[%c104, %c0_26] : memref<224x16xf32, #tpu.memory_space<vmem>>, vector<32x16xf32>
    %51 = arith.truncf %50 : vector<32x16xf32> to vector<32x16xbf16>
    %c136 = arith.constant 136 : index
    %c0_27 = arith.constant 0 : index
    %52 = vector.load %arg4[%c136, %c0_27] : memref<224x16xf32, #tpu.memory_space<vmem>>, vector<1x16xf32>
    %c144 = arith.constant 144 : index
    %c0_28 = arith.constant 0 : index
    %53 = vector.load %arg4[%c144, %c0_28] : memref<224x16xf32, #tpu.memory_space<vmem>>, vector<32x16xf32>
    %54 = arith.truncf %53 : vector<32x16xf32> to vector<32x16xbf16>
    %c176 = arith.constant 176 : index
    %c0_29 = arith.constant 0 : index
    %55 = vector.load %arg4[%c176, %c0_29] : memref<224x16xf32, #tpu.memory_space<vmem>>, vector<1x16xf32>
    %c184 = arith.constant 184 : index
    %c0_30 = arith.constant 0 : index
    %56 = vector.load %arg4[%c184, %c0_30] : memref<224x16xf32, #tpu.memory_space<vmem>>, vector<32x16xf32>
    %57 = arith.truncf %56 : vector<32x16xf32> to vector<32x16xbf16>
    %c216 = arith.constant 216 : index
    %c0_31 = arith.constant 0 : index
    %58 = vector.load %arg4[%c216, %c0_31] : memref<224x16xf32, #tpu.memory_space<vmem>>, vector<1x16xf32>
    %cst_32 = arith.constant 0.000000e+00 : f32
    %59 = vector.broadcast %cst_32 : f32 to vector<64x128xf32>
    %60 = arith.cmpf ogt, %5, %59 : vector<64x128xf32>
    %cst_33 = arith.constant 0.000000e+00 : f32
    %61 = vector.broadcast %cst_33 : f32 to vector<64x16xf32>
    %cst_34 = arith.constant 0.000000e+00 : f32
    %62 = vector.broadcast %cst_34 : f32 to vector<64x16xf32>
    %cst_35 = arith.constant 0.000000e+00 : f32
    %63 = vector.broadcast %cst_35 : f32 to vector<64x16xf32>
    %64 = tpu.concatenate %61, %63 in 1 : vector<64x16xf32>, vector<64x16xf32> -> vector<64x32xf32>
    %65 = arith.truncf %64 : vector<64x32xf32> to vector<64x32xbf16>
    %cst_36 = arith.constant dense<0.000000e+00> : vector<64x16xf32>
    %66 = tpu.matmul %65, %48, %cst_36 {dimension_numbers = #tpu.dot_dimension_numbers<[1], [0], [0], [1], [0, 0, 1, 1], [], []>} : vector<64x32xbf16>, vector<32x16xbf16>, vector<64x16xf32> -> vector<64x16xf32>
    %67 = vector.broadcast %49 : vector<1x16xf32> to vector<64x16xf32>
    %68 = arith.addf %66, %67 : vector<64x16xf32>
    %cst_37 = arith.constant dense<0.000000e+00> : vector<64x16xf32>
    %69 = tpu.matmul %65, %51, %cst_37 {dimension_numbers = #tpu.dot_dimension_numbers<[1], [0], [0], [1], [0, 0, 1, 1], [], []>} : vector<64x32xbf16>, vector<32x16xbf16>, vector<64x16xf32> -> vector<64x16xf32>
    %70 = vector.broadcast %52 : vector<1x16xf32> to vector<64x16xf32>
    %71 = arith.addf %69, %70 : vector<64x16xf32>
    %cst_38 = arith.constant dense<0.000000e+00> : vector<64x16xf32>
    %72 = tpu.matmul %65, %54, %cst_38 {dimension_numbers = #tpu.dot_dimension_numbers<[1], [0], [0], [1], [0, 0, 1, 1], [], []>} : vector<64x32xbf16>, vector<32x16xbf16>, vector<64x16xf32> -> vector<64x16xf32>
    %73 = vector.broadcast %55 : vector<1x16xf32> to vector<64x16xf32>
    %74 = arith.addf %72, %73 : vector<64x16xf32>
    %cst_39 = arith.constant dense<0.000000e+00> : vector<64x16xf32>
    %75 = tpu.matmul %65, %57, %cst_39 {dimension_numbers = #tpu.dot_dimension_numbers<[1], [0], [0], [1], [0, 0, 1, 1], [], []>} : vector<64x32xbf16>, vector<32x16xbf16>, vector<64x16xf32> -> vector<64x16xf32>
    %76 = vector.broadcast %58 : vector<1x16xf32> to vector<64x16xf32>
    %77 = arith.addf %75, %76 : vector<64x16xf32>
    %78 = arith.negf %68 : vector<64x16xf32>
    %79 = math.exp %78 : vector<64x16xf32>
    %cst_40 = arith.constant 1.000000e+00 : f32
    %80 = vector.broadcast %cst_40 : f32 to vector<64x16xf32>
    %81 = arith.addf %80, %79 : vector<64x16xf32>
    %82 = arith.divf %80, %81 : vector<64x16xf32>
    %83 = arith.negf %71 : vector<64x16xf32>
    %84 = math.exp %83 : vector<64x16xf32>
    %cst_41 = arith.constant 1.000000e+00 : f32
    %85 = vector.broadcast %cst_41 : f32 to vector<64x16xf32>
    %86 = arith.addf %85, %84 : vector<64x16xf32>
    %87 = arith.divf %85, %86 : vector<64x16xf32>
    %88 = math.tanh %74 : vector<64x16xf32>
    %89 = arith.negf %77 : vector<64x16xf32>
    %90 = math.exp %89 : vector<64x16xf32>
    %cst_42 = arith.constant 1.000000e+00 : f32
    %91 = vector.broadcast %cst_42 : f32 to vector<64x16xf32>
    %92 = arith.addf %91, %90 : vector<64x16xf32>
    %93 = arith.divf %91, %92 : vector<64x16xf32>
    %94 = arith.mulf %87, %62 : vector<64x16xf32>
    %95 = arith.mulf %82, %88 : vector<64x16xf32>
    %96 = arith.addf %94, %95 : vector<64x16xf32>
    %97 = math.tanh %96 : vector<64x16xf32>
    %98 = arith.mulf %93, %97 : vector<64x16xf32>
    %99 = arith.truncf %98 : vector<64x16xf32> to vector<64x16xbf16>
    %cst_43 = arith.constant dense<0.000000e+00> : vector<64x128xf32>
    %100 = tpu.matmul %99, %46, %cst_43 {dimension_numbers = #tpu.dot_dimension_numbers<[1], [1], [0], [0], [0, 0, 1, 0], [], []>} : vector<64x16xbf16>, vector<128x16xbf16>, vector<64x128xf32> -> vector<64x128xf32>
    %cst_44 = arith.constant -1.000000e+30 : f32
    %101 = vector.broadcast %cst_44 : f32 to vector<64x128xf32>
    %102 = arith.select %60, %100, %101 : vector<64x128xi1>, vector<64x128xf32>
    %cst_45 = arith.constant dense<0xFF800000> : vector<64xf32>
    %103 = vector.multi_reduction <maximumf>, %102, %cst_45 [1] : vector<64x128xf32> to vector<64xf32>
    %104 = vector.shape_cast %103 : vector<64xf32> to vector<64x1xf32>
    %105 = vector.broadcast %104 : vector<64x1xf32> to vector<64x128xf32>
    %106 = arith.subf %102, %105 : vector<64x128xf32>
    %107 = math.exp %106 : vector<64x128xf32>
    %cst_46 = arith.constant dense<0.000000e+00> : vector<64xf32>
    %108 = vector.multi_reduction <add>, %107, %cst_46 [1] : vector<64x128xf32> to vector<64xf32>
    %109 = vector.shape_cast %108 : vector<64xf32> to vector<64x1xf32>
    %cst_47 = arith.constant 1.000000e-30 : f32
    %110 = vector.broadcast %cst_47 : f32 to vector<64x1xf32>
    %111 = arith.maximumf %109, %110 : vector<64x1xf32>
    %112 = tpu.reciprocal %111 {approx = true} : vector<64x1xf32> -> vector<64x1xf32>
    %113 = vector.broadcast %112 : vector<64x1xf32> to vector<64x128xf32>
    %114 = arith.mulf %107, %113 : vector<64x128xf32>
    %115 = arith.truncf %114 : vector<64x128xf32> to vector<64x128xbf16>
    %cst_48 = arith.constant dense<0.000000e+00> : vector<64x16xf32>
    %116 = tpu.matmul %115, %46, %cst_48 {dimension_numbers = #tpu.dot_dimension_numbers<[1], [0], [0], [1], [0, 0, 1, 1], [], []>} : vector<64x128xbf16>, vector<128x16xbf16>, vector<64x16xf32> -> vector<64x16xf32>
    %117 = tpu.concatenate %98, %116 in 1 : vector<64x16xf32>, vector<64x16xf32> -> vector<64x32xf32>
    %118 = arith.truncf %117 : vector<64x32xf32> to vector<64x32xbf16>
    %cst_49 = arith.constant dense<0.000000e+00> : vector<64x16xf32>
    %119 = tpu.matmul %118, %48, %cst_49 {dimension_numbers = #tpu.dot_dimension_numbers<[1], [0], [0], [1], [0, 0, 1, 1], [], []>} : vector<64x32xbf16>, vector<32x16xbf16>, vector<64x16xf32> -> vector<64x16xf32>
    %120 = vector.broadcast %49 : vector<1x16xf32> to vector<64x16xf32>
    %121 = arith.addf %119, %120 : vector<64x16xf32>
    %cst_50 = arith.constant dense<0.000000e+00> : vector<64x16xf32>
    %122 = tpu.matmul %118, %51, %cst_50 {dimension_numbers = #tpu.dot_dimension_numbers<[1], [0], [0], [1], [0, 0, 1, 1], [], []>} : vector<64x32xbf16>, vector<32x16xbf16>, vector<64x16xf32> -> vector<64x16xf32>
    %123 = vector.broadcast %52 : vector<1x16xf32> to vector<64x16xf32>
    %124 = arith.addf %122, %123 : vector<64x16xf32>
    %cst_51 = arith.constant dense<0.000000e+00> : vector<64x16xf32>
    %125 = tpu.matmul %118, %54, %cst_51 {dimension_numbers = #tpu.dot_dimension_numbers<[1], [0], [0], [1], [0, 0, 1, 1], [], []>} : vector<64x32xbf16>, vector<32x16xbf16>, vector<64x16xf32> -> vector<64x16xf32>
    %126 = vector.broadcast %55 : vector<1x16xf32> to vector<64x16xf32>
    %127 = arith.addf %125, %126 : vector<64x16xf32>
    %cst_52 = arith.constant dense<0.000000e+00> : vector<64x16xf32>
    %128 = tpu.matmul %118, %57, %cst_52 {dimension_numbers = #tpu.dot_dimension_numbers<[1], [0], [0], [1], [0, 0, 1, 1], [], []>} : vector<64x32xbf16>, vector<32x16xbf16>, vector<64x16xf32> -> vector<64x16xf32>
    %129 = vector.broadcast %58 : vector<1x16xf32> to vector<64x16xf32>
    %130 = arith.addf %128, %129 : vector<64x16xf32>
    %131 = arith.negf %121 : vector<64x16xf32>
    %132 = math.exp %131 : vector<64x16xf32>
    %cst_53 = arith.constant 1.000000e+00 : f32
    %133 = vector.broadcast %cst_53 : f32 to vector<64x16xf32>
    %134 = arith.addf %133, %132 : vector<64x16xf32>
    %135 = arith.divf %133, %134 : vector<64x16xf32>
    %136 = arith.negf %124 : vector<64x16xf32>
    %137 = math.exp %136 : vector<64x16xf32>
    %cst_54 = arith.constant 1.000000e+00 : f32
    %138 = vector.broadcast %cst_54 : f32 to vector<64x16xf32>
    %139 = arith.addf %138, %137 : vector<64x16xf32>
    %140 = arith.divf %138, %139 : vector<64x16xf32>
    %141 = math.tanh %127 : vector<64x16xf32>
    %142 = arith.negf %130 : vector<64x16xf32>
    %143 = math.exp %142 : vector<64x16xf32>
    %cst_55 = arith.constant 1.000000e+00 : f32
    %144 = vector.broadcast %cst_55 : f32 to vector<64x16xf32>
    %145 = arith.addf %144, %143 : vector<64x16xf32>
    %146 = arith.divf %144, %145 : vector<64x16xf32>
    %147 = arith.mulf %140, %96 : vector<64x16xf32>
    %148 = arith.mulf %135, %141 : vector<64x16xf32>
    %149 = arith.addf %147, %148 : vector<64x16xf32>
    %150 = math.tanh %149 : vector<64x16xf32>
    %151 = arith.mulf %146, %150 : vector<64x16xf32>
    %152 = arith.truncf %151 : vector<64x16xf32> to vector<64x16xbf16>
    %cst_56 = arith.constant dense<0.000000e+00> : vector<64x128xf32>
    %153 = tpu.matmul %152, %46, %cst_56 {dimension_numbers = #tpu.dot_dimension_numbers<[1], [1], [0], [0], [0, 0, 1, 0], [], []>} : vector<64x16xbf16>, vector<128x16xbf16>, vector<64x128xf32> -> vector<64x128xf32>
    %cst_57 = arith.constant -1.000000e+30 : f32
    %154 = vector.broadcast %cst_57 : f32 to vector<64x128xf32>
    %155 = arith.select %60, %153, %154 : vector<64x128xi1>, vector<64x128xf32>
    %cst_58 = arith.constant dense<0xFF800000> : vector<64xf32>
    %156 = vector.multi_reduction <maximumf>, %155, %cst_58 [1] : vector<64x128xf32> to vector<64xf32>
    %157 = vector.shape_cast %156 : vector<64xf32> to vector<64x1xf32>
    %158 = vector.broadcast %157 : vector<64x1xf32> to vector<64x128xf32>
    %159 = arith.subf %155, %158 : vector<64x128xf32>
    %160 = math.exp %159 : vector<64x128xf32>
    %cst_59 = arith.constant dense<0.000000e+00> : vector<64xf32>
    %161 = vector.multi_reduction <add>, %160, %cst_59 [1] : vector<64x128xf32> to vector<64xf32>
    %162 = vector.shape_cast %161 : vector<64xf32> to vector<64x1xf32>
    %cst_60 = arith.constant 1.000000e-30 : f32
    %163 = vector.broadcast %cst_60 : f32 to vector<64x1xf32>
    %164 = arith.maximumf %162, %163 : vector<64x1xf32>
    %165 = tpu.reciprocal %164 {approx = true} : vector<64x1xf32> -> vector<64x1xf32>
    %166 = vector.broadcast %165 : vector<64x1xf32> to vector<64x128xf32>
    %167 = arith.mulf %160, %166 : vector<64x128xf32>
    %168 = arith.truncf %167 : vector<64x128xf32> to vector<64x128xbf16>
    %cst_61 = arith.constant dense<0.000000e+00> : vector<64x16xf32>
    %169 = tpu.matmul %168, %46, %cst_61 {dimension_numbers = #tpu.dot_dimension_numbers<[1], [0], [0], [1], [0, 0, 1, 1], [], []>} : vector<64x128xbf16>, vector<128x16xbf16>, vector<64x16xf32> -> vector<64x16xf32>
    %170 = tpu.concatenate %151, %169 in 1 : vector<64x16xf32>, vector<64x16xf32> -> vector<64x32xf32>
    %171 = arith.truncf %170 : vector<64x32xf32> to vector<64x32xbf16>
    %cst_62 = arith.constant dense<0.000000e+00> : vector<64x16xf32>
    %172 = tpu.matmul %171, %48, %cst_62 {dimension_numbers = #tpu.dot_dimension_numbers<[1], [0], [0], [1], [0, 0, 1, 1], [], []>} : vector<64x32xbf16>, vector<32x16xbf16>, vector<64x16xf32> -> vector<64x16xf32>
    %173 = vector.broadcast %49 : vector<1x16xf32> to vector<64x16xf32>
    %174 = arith.addf %172, %173 : vector<64x16xf32>
    %cst_63 = arith.constant dense<0.000000e+00> : vector<64x16xf32>
    %175 = tpu.matmul %171, %51, %cst_63 {dimension_numbers = #tpu.dot_dimension_numbers<[1], [0], [0], [1], [0, 0, 1, 1], [], []>} : vector<64x32xbf16>, vector<32x16xbf16>, vector<64x16xf32> -> vector<64x16xf32>
    %176 = vector.broadcast %52 : vector<1x16xf32> to vector<64x16xf32>
    %177 = arith.addf %175, %176 : vector<64x16xf32>
    %cst_64 = arith.constant dense<0.000000e+00> : vector<64x16xf32>
    %178 = tpu.matmul %171, %54, %cst_64 {dimension_numbers = #tpu.dot_dimension_numbers<[1], [0], [0], [1], [0, 0, 1, 1], [], []>} : vector<64x32xbf16>, vector<32x16xbf16>, vector<64x16xf32> -> vector<64x16xf32>
    %179 = vector.broadcast %55 : vector<1x16xf32> to vector<64x16xf32>
    %180 = arith.addf %178, %179 : vector<64x16xf32>
    %cst_65 = arith.constant dense<0.000000e+00> : vector<64x16xf32>
    %181 = tpu.matmul %171, %57, %cst_65 {dimension_numbers = #tpu.dot_dimension_numbers<[1], [0], [0], [1], [0, 0, 1, 1], [], []>} : vector<64x32xbf16>, vector<32x16xbf16>, vector<64x16xf32> -> vector<64x16xf32>
    %182 = vector.broadcast %58 : vector<1x16xf32> to vector<64x16xf32>
    %183 = arith.addf %181, %182 : vector<64x16xf32>
    %184 = arith.negf %174 : vector<64x16xf32>
    %185 = math.exp %184 : vector<64x16xf32>
    %cst_66 = arith.constant 1.000000e+00 : f32
    %186 = vector.broadcast %cst_66 : f32 to vector<64x16xf32>
    %187 = arith.addf %186, %185 : vector<64x16xf32>
    %188 = arith.divf %186, %187 : vector<64x16xf32>
    %189 = arith.negf %177 : vector<64x16xf32>
    %190 = math.exp %189 : vector<64x16xf32>
    %cst_67 = arith.constant 1.000000e+00 : f32
    %191 = vector.broadcast %cst_67 : f32 to vector<64x16xf32>
    %192 = arith.addf %191, %190 : vector<64x16xf32>
    %193 = arith.divf %191, %192 : vector<64x16xf32>
    %194 = math.tanh %180 : vector<64x16xf32>
    %195 = arith.negf %183 : vector<64x16xf32>
    %196 = math.exp %195 : vector<64x16xf32>
    %cst_68 = arith.constant 1.000000e+00 : f32
    %197 = vector.broadcast %cst_68 : f32 to vector<64x16xf32>
    %198 = arith.addf %197, %196 : vector<64x16xf32>
    %199 = arith.divf %197, %198 : vector<64x16xf32>
    %200 = arith.mulf %193, %149 : vector<64x16xf32>
    %201 = arith.mulf %188, %194 : vector<64x16xf32>
    %202 = arith.addf %200, %201 : vector<64x16xf32>
    %203 = math.tanh %202 : vector<64x16xf32>
    %204 = arith.mulf %199, %203 : vector<64x16xf32>
    %205 = arith.truncf %204 : vector<64x16xf32> to vector<64x16xbf16>
    %cst_69 = arith.constant dense<0.000000e+00> : vector<64x128xf32>
    %206 = tpu.matmul %205, %46, %cst_69 {dimension_numbers = #tpu.dot_dimension_numbers<[1], [1], [0], [0], [0, 0, 1, 0], [], []>} : vector<64x16xbf16>, vector<128x16xbf16>, vector<64x128xf32> -> vector<64x128xf32>
    %cst_70 = arith.constant -1.000000e+30 : f32
    %207 = vector.broadcast %cst_70 : f32 to vector<64x128xf32>
    %208 = arith.select %60, %206, %207 : vector<64x128xi1>, vector<64x128xf32>
    %cst_71 = arith.constant dense<0xFF800000> : vector<64xf32>
    %209 = vector.multi_reduction <maximumf>, %208, %cst_71 [1] : vector<64x128xf32> to vector<64xf32>
    %210 = vector.shape_cast %209 : vector<64xf32> to vector<64x1xf32>
    %211 = vector.broadcast %210 : vector<64x1xf32> to vector<64x128xf32>
    %212 = arith.subf %208, %211 : vector<64x128xf32>
    %213 = math.exp %212 : vector<64x128xf32>
    %cst_72 = arith.constant dense<0.000000e+00> : vector<64xf32>
    %214 = vector.multi_reduction <add>, %213, %cst_72 [1] : vector<64x128xf32> to vector<64xf32>
    %215 = vector.shape_cast %214 : vector<64xf32> to vector<64x1xf32>
    %cst_73 = arith.constant 1.000000e-30 : f32
    %216 = vector.broadcast %cst_73 : f32 to vector<64x1xf32>
    %217 = arith.maximumf %215, %216 : vector<64x1xf32>
    %218 = tpu.reciprocal %217 {approx = true} : vector<64x1xf32> -> vector<64x1xf32>
    %219 = vector.broadcast %218 : vector<64x1xf32> to vector<64x128xf32>
    %220 = arith.mulf %213, %219 : vector<64x128xf32>
    %221 = arith.truncf %220 : vector<64x128xf32> to vector<64x128xbf16>
    %cst_74 = arith.constant dense<0.000000e+00> : vector<64x16xf32>
    %222 = tpu.matmul %221, %46, %cst_74 {dimension_numbers = #tpu.dot_dimension_numbers<[1], [0], [0], [1], [0, 0, 1, 1], [], []>} : vector<64x128xbf16>, vector<128x16xbf16>, vector<64x16xf32> -> vector<64x16xf32>
    %223 = tpu.concatenate %204, %222 in 1 : vector<64x16xf32>, vector<64x16xf32> -> vector<64x32xf32>
    %224 = arith.truncf %223 : vector<64x32xf32> to vector<64x32xbf16>
    %cst_75 = arith.constant dense<0.000000e+00> : vector<64x16xf32>
    %225 = tpu.matmul %224, %48, %cst_75 {dimension_numbers = #tpu.dot_dimension_numbers<[1], [0], [0], [1], [0, 0, 1, 1], [], []>} : vector<64x32xbf16>, vector<32x16xbf16>, vector<64x16xf32> -> vector<64x16xf32>
    %226 = vector.broadcast %49 : vector<1x16xf32> to vector<64x16xf32>
    %227 = arith.addf %225, %226 : vector<64x16xf32>
    %cst_76 = arith.constant dense<0.000000e+00> : vector<64x16xf32>
    %228 = tpu.matmul %224, %51, %cst_76 {dimension_numbers = #tpu.dot_dimension_numbers<[1], [0], [0], [1], [0, 0, 1, 1], [], []>} : vector<64x32xbf16>, vector<32x16xbf16>, vector<64x16xf32> -> vector<64x16xf32>
    %229 = vector.broadcast %52 : vector<1x16xf32> to vector<64x16xf32>
    %230 = arith.addf %228, %229 : vector<64x16xf32>
    %cst_77 = arith.constant dense<0.000000e+00> : vector<64x16xf32>
    %231 = tpu.matmul %224, %54, %cst_77 {dimension_numbers = #tpu.dot_dimension_numbers<[1], [0], [0], [1], [0, 0, 1, 1], [], []>} : vector<64x32xbf16>, vector<32x16xbf16>, vector<64x16xf32> -> vector<64x16xf32>
    %232 = vector.broadcast %55 : vector<1x16xf32> to vector<64x16xf32>
    %233 = arith.addf %231, %232 : vector<64x16xf32>
    %cst_78 = arith.constant dense<0.000000e+00> : vector<64x16xf32>
    %234 = tpu.matmul %224, %57, %cst_78 {dimension_numbers = #tpu.dot_dimension_numbers<[1], [0], [0], [1], [0, 0, 1, 1], [], []>} : vector<64x32xbf16>, vector<32x16xbf16>, vector<64x16xf32> -> vector<64x16xf32>
    %235 = vector.broadcast %58 : vector<1x16xf32> to vector<64x16xf32>
    %236 = arith.addf %234, %235 : vector<64x16xf32>
    %237 = arith.negf %227 : vector<64x16xf32>
    %238 = math.exp %237 : vector<64x16xf32>
    %cst_79 = arith.constant 1.000000e+00 : f32
    %239 = vector.broadcast %cst_79 : f32 to vector<64x16xf32>
    %240 = arith.addf %239, %238 : vector<64x16xf32>
    %241 = arith.divf %239, %240 : vector<64x16xf32>
    %242 = arith.negf %230 : vector<64x16xf32>
    %243 = math.exp %242 : vector<64x16xf32>
    %cst_80 = arith.constant 1.000000e+00 : f32
    %244 = vector.broadcast %cst_80 : f32 to vector<64x16xf32>
    %245 = arith.addf %244, %243 : vector<64x16xf32>
    %246 = arith.divf %244, %245 : vector<64x16xf32>
    %247 = math.tanh %233 : vector<64x16xf32>
    %248 = arith.negf %236 : vector<64x16xf32>
    %249 = math.exp %248 : vector<64x16xf32>
    %cst_81 = arith.constant 1.000000e+00 : f32
    %250 = vector.broadcast %cst_81 : f32 to vector<64x16xf32>
    %251 = arith.addf %250, %249 : vector<64x16xf32>
    %252 = arith.divf %250, %251 : vector<64x16xf32>
    %253 = arith.mulf %246, %202 : vector<64x16xf32>
    %254 = arith.mulf %241, %247 : vector<64x16xf32>
    %255 = arith.addf %253, %254 : vector<64x16xf32>
    %256 = math.tanh %255 : vector<64x16xf32>
    %257 = arith.mulf %252, %256 : vector<64x16xf32>
    %258 = arith.truncf %257 : vector<64x16xf32> to vector<64x16xbf16>
    %cst_82 = arith.constant dense<0.000000e+00> : vector<64x128xf32>
    %259 = tpu.matmul %258, %46, %cst_82 {dimension_numbers = #tpu.dot_dimension_numbers<[1], [1], [0], [0], [0, 0, 1, 0], [], []>} : vector<64x16xbf16>, vector<128x16xbf16>, vector<64x128xf32> -> vector<64x128xf32>
    %cst_83 = arith.constant -1.000000e+30 : f32
    %260 = vector.broadcast %cst_83 : f32 to vector<64x128xf32>
    %261 = arith.select %60, %259, %260 : vector<64x128xi1>, vector<64x128xf32>
    %cst_84 = arith.constant dense<0xFF800000> : vector<64xf32>
    %262 = vector.multi_reduction <maximumf>, %261, %cst_84 [1] : vector<64x128xf32> to vector<64xf32>
    %263 = vector.shape_cast %262 : vector<64xf32> to vector<64x1xf32>
    %264 = vector.broadcast %263 : vector<64x1xf32> to vector<64x128xf32>
    %265 = arith.subf %261, %264 : vector<64x128xf32>
    %266 = math.exp %265 : vector<64x128xf32>
    %cst_85 = arith.constant dense<0.000000e+00> : vector<64xf32>
    %267 = vector.multi_reduction <add>, %266, %cst_85 [1] : vector<64x128xf32> to vector<64xf32>
    %268 = vector.shape_cast %267 : vector<64xf32> to vector<64x1xf32>
    %cst_86 = arith.constant 1.000000e-30 : f32
    %269 = vector.broadcast %cst_86 : f32 to vector<64x1xf32>
    %270 = arith.maximumf %268, %269 : vector<64x1xf32>
    %271 = tpu.reciprocal %270 {approx = true} : vector<64x1xf32> -> vector<64x1xf32>
    %272 = vector.broadcast %271 : vector<64x1xf32> to vector<64x128xf32>
    %273 = arith.mulf %266, %272 : vector<64x128xf32>
    %274 = arith.truncf %273 : vector<64x128xf32> to vector<64x128xbf16>
    %cst_87 = arith.constant dense<0.000000e+00> : vector<64x16xf32>
    %275 = tpu.matmul %274, %46, %cst_87 {dimension_numbers = #tpu.dot_dimension_numbers<[1], [0], [0], [1], [0, 0, 1, 1], [], []>} : vector<64x128xbf16>, vector<128x16xbf16>, vector<64x16xf32> -> vector<64x16xf32>
    %276 = tpu.concatenate %257, %275 in 1 : vector<64x16xf32>, vector<64x16xf32> -> vector<64x32xf32>
    %277 = arith.truncf %276 : vector<64x32xf32> to vector<64x32xbf16>
    %c0_88 = arith.constant 0 : index
    %c0_89 = arith.constant 0 : index
    %278 = vector.load %arg5[%c0_88, %c0_89] : memref<40x128xf32, #tpu.memory_space<vmem>>, vector<32x128xf32>
    %279 = arith.truncf %278 : vector<32x128xf32> to vector<32x128xbf16>
    %c32 = arith.constant 32 : index
    %c0_90 = arith.constant 0 : index
    %280 = vector.load %arg5[%c32, %c0_90] : memref<40x128xf32, #tpu.memory_space<vmem>>, vector<1x128xf32>
    %cst_91 = arith.constant dense<0.000000e+00> : vector<64x128xf32>
    %281 = tpu.matmul %277, %279, %cst_91 {dimension_numbers = #tpu.dot_dimension_numbers<[1], [0], [0], [1], [0, 0, 1, 1], [], []>} : vector<64x32xbf16>, vector<32x128xbf16>, vector<64x128xf32> -> vector<64x128xf32>
    %282 = vector.broadcast %280 : vector<1x128xf32> to vector<64x128xf32>
    %283 = arith.addf %281, %282 : vector<64x128xf32>
    %c0_92 = arith.constant 0 : index
    %c0_93 = arith.constant 0 : index
    %c0_94 = arith.constant 0 : index
    %284 = vector.load %arg6[%c0_92, %c0_93, %c0_94] : memref<1x64x128xf32, #tpu.memory_space<vmem>>, vector<1x64x128xf32>
    %285 = vector.shape_cast %284 : vector<1x64x128xf32> to vector<64x128xf32>
    %286 = vector.shape_cast %283 : vector<64x128xf32> to vector<1x64x128xf32>
    tpu.vector_store %arg6[%c0_92, %c0_93, %c0_94], %286 {strides = array<i32>} : memref<1x64x128xf32, #tpu.memory_space<vmem>>, vector<1x64x128xf32>,
    return
  }
  func.func @transform_0(%arg0: i32) -> (i32, i32, i32) {
    %c0_i32 = arith.constant 0 : i32
    %c0_i32_0 = arith.constant 0 : i32
    %c0_i32_1 = arith.constant 0 : i32
    return %arg0, %c0_i32, %c0_i32_0 : i32, i32, i32
  }
  func.func @transform_1(%arg0: i32) -> (i32, i32, i32) {
    %c0_i32 = arith.constant 0 : i32
    %c0_i32_0 = arith.constant 0 : i32
    %c0_i32_1 = arith.constant 0 : i32
    return %arg0, %c0_i32, %c0_i32_0 : i32, i32, i32
  }
  func.func @transform_2(%arg0: i32) -> (i32, i32, i32) {
    %c0_i32 = arith.constant 0 : i32
    %c0_i32_0 = arith.constant 0 : i32
    %c0_i32_1 = arith.constant 0 : i32
    return %arg0, %c0_i32, %c0_i32_0 : i32, i32, i32
  }
  func.func @transform_3(%arg0: i32) -> (i32, i32) {
    %c0_i32 = arith.constant 0 : i32
    %c0_i32_0 = arith.constant 0 : i32
    %c0_i32_1 = arith.constant 0 : i32
    return %c0_i32, %c0_i32_0 : i32, i32
  }
  func.func @transform_4(%arg0: i32) -> (i32, i32) {
    %c0_i32 = arith.constant 0 : i32
    %c0_i32_0 = arith.constant 0 : i32
    %c0_i32_1 = arith.constant 0 : i32
    return %c0_i32, %c0_i32_0 : i32, i32
  }
  func.func @transform_5(%arg0: i32) -> (i32, i32, i32) {
    %c0_i32 = arith.constant 0 : i32
    %c0_i32_0 = arith.constant 0 : i32
    %c0_i32_1 = arith.constant 0 : i32
    return %arg0, %c0_i32, %c0_i32_0 : i32, i32, i32
  }
}

</mosaic_0001>

<bundles_post_ra>
// kernel: tpu_custom_call.1
= control target key start
LH: loop header
LB: loop body
LE: loop exit
PB: predicated region body
PF: predicated region fallthrough
CT: control target
= control target key end

     0   :  { %10 = vsyncpa [#allocation3], 0  ;;  %s7971_s0 = inlined_call_operand.vmem [shape: f32[2,128,4], index: 0, kind: input, shape index: {}]   ;;  %s7972_s1 = inlined_call_operand.vmem [shape: bf16[2,128,128], index: 1, kind: input, shape index: {}]   ;;  %s7973_s2 = inlined_call_operand.vmem [shape: f32[2,64,128], index: 2, kind: input, shape index: {}]   ;;  %s7974_s3 = inlined_call_operand.vmem [shape: f32[224,16], index: 3, kind: input, shape index: {}]   ;;  %s7975_s4 = inlined_call_operand.vmem [shape: f32[40,128], index: 4, kind: input, shape index: {}]   ;;  %s7976_s5 = inlined_call_operand.hbm [shape: f32[2,64,128], index: 5, kind: output, shape index: {}]  }
   0x1   :  { %12 = vsyncpa [#allocation3 + $0x1], 0  ;;  %s6545_s18 = smov 0   ;;  %s6547_s19 = smov 0  }
   0x2   :  { %s6549_s20 = smov 0   ;;  %s6551_s21 = smov 0  }
   0x3 LB: > { %s6566_s22 = sadd.s32 4294967295, %s6508_s21   ;;  %s4524_s23 = sadd.s32 4294967294, %s6508_s21   ;;  %s6508_s21 = sphi %s6551_s21, %s8063_s21   ;;  %s6504_s20 = sphi %s6549_s20, %s8062_s20   ;;  %s6500_s19 = sphi %s6547_s19, %s8061_s19   ;;  %s6496_s18 = sphi %s6545_s18, %s8060_s18  }
   0x4   : > { %s6570_s24 = sadd.s32 1, %s6508_s21   ;;  %s145_s25 = sadd.s32 1, %s6504_s20 }
   0x5   : > { %s142_s26 = ssub.s32 %s6508_s21, %s6570_s24  ;;  %p155_p0 = scmp.ne.s32.totalorder %s6504_s20, %s6500_s19 }
   0x6   : > { %p143_p1 = scmp.eq.s32.totalorder %s142_s26, 0  ;;  %p156_p2 = scmp.eq.s32.totalorder %s6566_s22, 1 }
   0x7   : > { %p161_p3 = scmp.ne.s32.totalorder %s6500_s19, %s6496_s18  ;;  %p162_p4 = scmp.eq.s32.totalorder %s4524_s23, 1 }
   0x8   : > { %s6581_s27 = scalar_select %p143_p1, %s6504_s20, %s145_s25  }
   0x9   : > { %p6583_p5 = por %p156_p2, %p155_p0  ;;  %p6587_p6 = por %p162_p4, %p161_p3 }
   0xa   : > { %p4527_p7 = scmp.ge.s32.totalorder %s6508_s21, 1  ;;  %p210_p8 = scmp.lt.s32.totalorder %s6508_s21, 3 }
   0xc   : > { %p211_p9 = pnand %p4527_p7, %p210_p8 }
   0xe   : > { %214 = sbr.rel (%p211_p9) target bundleno = 5676 (0x162c), region = 40 }
  0x15   : > { %p248_p10 = scmp.lt.s32.totalorder %s6566_s22, 1  ;;  %v386_v0 = vld [vmem:[%s7974_s3 + $0x8] sm:$0xf]  ;;  %vm591_vm0 = vcmask 1041408   ;;  %v384_v2 = vld [vmem:[%s7974_s3] sm:$0xf] }
  0x16   : > { %v387_v1 = vpack.c.bf16 %v386_v0, %v386_v0  ;;  %v385_v3 = vpack.c.bf16 %v384_v2, %v384_v2  ;;  %vm566_vm1 = vcmask 31744   ;;  %vm988_vm2 = vcmask 130048   ;;  %s4754_s6 = sshll.u32 %s6566_s22, 10 }
  0x17   : > { %s6601_s9 = scalar_select %p248_p10, %s6566_s22, 1  ;;  %vm1316_vm11 = vcmask 261120  }
  0x18   : > { %5589 = vmatprep.subr.msk.bf16.mxu1 %vm591_vm0, %v387_v1  ;;  %v593_v4 = vsel %vm591_vm0, %v387_v1, 0  ;;  %v717_v13 = vsel %vm591_vm0, %v385_v3, 0  ;;  %s7924_s11 = scalar_lea.hbm %s7976_s5, %s4754_s6 }
  0x19   : > { %s4751_s10 = sshll.u32 %s6601_s9, 7  ;;  %5054 = vmatpush3.bf16.msra.mxu1 %v593_v4  ;;  %s4752_s14 = sshll.u32 %s6601_s9, 6 }
  0x1a   : > { %s6609_s13 = scalar_lea.vmem %s7971_s0, %s4751_s10  ;;  %5590 = vmatprep.subr.msk.bf16.mxu1 %vm591_vm0, %v385_v3  ;;  %s6624_s17 = scalar_lea.vmem %s7972_s1, %s4752_s14 }
  0x1b   : > { %v264_v5 = vld [vmem:[%s6609_s13] sm:$0xff]  ;;  %v265_v6 = vld [vmem:[%s6609_s13 + $0x8] sm:$0xff]  ;;  %v266_v7 = vld [vmem:[%s6609_s13 + $0x10] sm:$0xff]  ;;  %s262_s16 = scalar_lea.vmem %s7973_s2, %s4752_s14  ;;  %s6511_s9 = smov 16  }
  0x1c   : > { %v389_v8 = vpack.c.bf16 %v265_v6, %v264_v5  ;;  %v267_v9 = vld [vmem:[%s6609_s13 + $0x18] sm:$0xff]  ;;  %v268_v10 = vld [vmem:[%s6609_s13 + $0x20] sm:$0xff]  ;;  %v269_v11 = vld [vmem:[%s6609_s13 + $0x28] sm:$0xff] }
  0x1d   : > { %v390_v12 = vpack.c.bf16 %v267_v9, %v266_v7  ;;  %v391_v14 = vpack.c.bf16 %v269_v11, %v268_v10  ;;  %v6630_v15 = vld [vmem:[%s6624_s17] sm:$0xff]   ;;  %v270_v16 = vld [vmem:[%s6609_s13 + $0x30] sm:$0xff]  ;;  %v271_v17 = vld [vmem:[%s6609_s13 + $0x38] sm:$0xff] }
  0x1e   : > { %5021 = vmatprep.subr.bf16.mxu0 %v389_v8  ;;  %5055 = vmatprep.mubr.msk.bf16.mxu1 %vm566_vm1, %v389_v8  ;;  %v6635_v18 = vld [vmem:[%s6624_s17 + $0x8] sm:$0xff]   ;;  %v304_v19 = vunpack.c.l.bf16 %v6630_v15  ;;  %v392_v21 = vpack.c.bf16 %v271_v17, %v270_v16  ;;  %v272_v22 = vld [vmem:[%s6609_s13 + $0x40] sm:$0xff]  ;;  %v305_v24 = vunpack.c.h.bf16 %v6630_v15  ;;  %v6646_v27 = vld [vmem:[%s6624_s17 + $0x10] sm:$0xff]  }
  0x1f   : > { %5022 = vmatpush3.bf16.msra.mxu0 %v389_v8  ;;  %5056 = vmatmul.mubr.msk.bf16.vlgmr.msra.gmra.mrb[0].mxu1 %vm566_vm1, %v390_v12  ;;  %v306_v20 = vunpack.c.l.bf16 %v6635_v18  ;;  %v273_v23 = vld [vmem:[%s6609_s13 + $0x48] sm:$0xff]  ;;  %v307_v25 = vunpack.c.h.bf16 %v6635_v18  ;;  %v308_v28 = vunpack.c.l.bf16 %v6646_v27  ;;  %v274_v29 = vld [vmem:[%s6609_s13 + $0x50] sm:$0xff]  ;;  %v275_v30 = vld [vmem:[%s6609_s13 + $0x58] sm:$0xff]  ;;  %v309_v31 = vunpack.c.h.bf16 %v6646_v27 }
  0x20   : > { %5023 = vmatprep.subr.bf16.mxu0 %v390_v12  ;;  %5072 = vmatpush3.bf16.msra.mxu1 %v717_v13  ;;  %v393_v26 = vpack.c.bf16 %v273_v23, %v272_v22  ;;  %v6655_v32 = vld [vmem:[%s6624_s17 + $0x18] sm:$0xff]   ;;  %v394_v33 = vpack.c.bf16 %v275_v30, %v274_v29  ;;  %v276_v34 = vld [vmem:[%s6609_s13 + $0x60] sm:$0xff]  ;;  %v277_v35 = vld [vmem:[%s6609_s13 + $0x68] sm:$0xff] }
  0x21   : > { %5059 = vmatprep.mubr.msk.bf16.mxu1 %vm566_vm1, %v391_v14  ;;  %5037 = vmatprep.mubr.bf16.mxu0 %v6630_v15  ;;  %v310_v36 = vunpack.c.l.bf16 %v6655_v32  ;;  %v311_v37 = vunpack.c.h.bf16 %v6655_v32  ;;  %v395_v38 = vpack.c.bf16 %v277_v35, %v276_v34  ;;  %v6662_v39 = vld [vmem:[%s6624_s17 + $0x20] sm:$0xff]   ;;  %v278_v41 = vld [vmem:[%s6609_s13 + $0x70] sm:$0xff]  ;;  %v279_v42 = vld [vmem:[%s6609_s13 + $0x78] sm:$0xff]  ;;  %s6512_s13 = smov [#allocation2]  }
  0x22   : > { %320 = vadd.xlane.f32.xlu0 %v304_v19  ;;  %324 = vadd.xlane.f32.xlu1 %v306_v20  ;;  %v312_v40 = vunpack.c.l.bf16 %v6662_v39  ;;  %v313_v43 = vunpack.c.h.bf16 %v6662_v39  ;;  %v6671_v44 = vld [vmem:[%s6624_s17 + $0x28] sm:$0xff]   ;;  %v396_v45 = vpack.c.bf16 %v279_v42, %v278_v41  ;;  %v6676_v48 = vld [vmem:[%s6624_s17 + $0x30] sm:$0xff]   ;;  %v6682_v51 = vld [vmem:[%s6624_s17 + $0x38] sm:$0xff]   ;;  %s6450_s15 = sshll.u32 %s6512_s13, 4  ;;  %s6451_s15 = int_to_ptr.vmem [resolvable:$false] %s6450_s15 }
  0x23   : > { %5024 = vmatpush3.bf16.msra.mxu0 %v390_v12  ;;  %v314_v46 = vunpack.c.l.bf16 %v6671_v44  ;;  %v315_v47 = vunpack.c.h.bf16 %v6671_v44  ;;  %v316_v49 = vunpack.c.l.bf16 %v6676_v48  ;;  %v317_v50 = vunpack.c.h.bf16 %v6676_v48 }
  0x24   : > { %5025 = vmatprep.subr.bf16.mxu0 %v391_v14  ;;  %v318_v52 = vunpack.c.l.bf16 %v6682_v51  ;;  %v319_v53 = vunpack.c.h.bf16 %v6682_v51 }
  0x26   : > { %322 = vadd.xlane.f32.xlu0 %v305_v24  ;;  %326 = vadd.xlane.f32.xlu1 %v307_v25 }
  0x27   : > { %5026 = vmatpush3.bf16.msra.mxu0 %v391_v14  ;;  %5060 = vmatmul.mubr.msk.bf16.gmra.mrb[4].mxu1 %vm566_vm1, %v392_v21 }
  0x28   : > { %5027 = vmatprep.subr.bf16.mxu0 %v392_v21  ;;  %5063 = vmatprep.mubr.msk.bf16.mxu1 %vm566_vm1, %v393_v26 }
  0x2a   : > { %328 = vadd.xlane.f32.xlu0 %v308_v28  ;;  %330 = vadd.xlane.f32.xlu1 %v309_v31 }
  0x2b   : > { %5028 = vmatpush3.bf16.msra.mxu0 %v392_v21 }
  0x2c   : > { %5029 = vmatprep.subr.bf16.mxu0 %v393_v26 }
  0x2e   : > { %332 = vadd.xlane.f32.xlu0 %v310_v36  ;;  %334 = vadd.xlane.f32.xlu1 %v311_v37 }
  0x2f   : > { %5030 = vmatpush3.bf16.msra.mxu0 %v393_v26  ;;  %5064 = vmatmul.mubr.msk.bf16.gmra.mrb[8].mxu1 %vm566_vm1, %v394_v33 }
  0x30   : > { %5031 = vmatprep.subr.bf16.mxu0 %v394_v33  ;;  %5067 = vmatprep.mubr.msk.bf16.mxu1 %vm566_vm1, %v395_v38 }
  0x32   : > { %336 = vadd.xlane.f32.xlu0 %v312_v40  ;;  %338 = vadd.xlane.f32.xlu1 %v313_v43 }
  0x33   : > { %5032 = vmatpush3.bf16.msra.mxu0 %v394_v33 }
  0x34   : > { %5033 = vmatprep.subr.bf16.mxu0 %v395_v38 }
  0x36   : > { %340 = vadd.xlane.f32.xlu0 %v314_v46  ;;  %342 = vadd.xlane.f32.xlu1 %v315_v47 }
  0x37   : > { %5034 = vmatpush3.bf16.msra.mxu0 %v395_v38  ;;  %5068 = vmatmul.mubr.msk.bf16.gmra.mrb[12].mxu1 %vm566_vm1, %v396_v45 }
  0x38   : > { %5035 = vmatprep.subr.bf16.mxu0 %v396_v45 }
  0x3a   : > { %344 = vadd.xlane.f32.xlu0 %v316_v49  ;;  %346 = vadd.xlane.f32.xlu1 %v317_v50 }
  0x3b   : > { %5036 = vmatpush3.bf16.msra.mxu0 %v396_v45 }
  0x3e   : > { %5038 = vmatmul.mubr.bf16.vlgmr.msra.gmra.mrb[0].mxu0 %v6635_v18  ;;  %348 = vadd.xlane.f32.xlu0 %v318_v52 }
  0x3f   : > { %5041 = vmatprep.mubr.bf16.mxu0 %v6646_v27  ;;  %350 = vadd.xlane.f32.xlu1 %v319_v53 }
  0x46   : > { %5042 = vmatmul.mubr.bf16.gmra.mrb[4].mxu0 %v6655_v32 }
  0x47   : > { %5045 = vmatprep.mubr.bf16.mxu0 %v6662_v39 }
  0x4e   : > { %5046 = vmatmul.mubr.bf16.gmra.mrb[8].mxu0 %v6671_v44 }
  0x4f   : > { %5049 = vmatprep.mubr.bf16.mxu0 %v6676_v48 }
  0x56   : > { %5050 = vmatmul.mubr.bf16.gmra.mrb[12].mxu0 %v6682_v51 }
  0x57   : > { %5105 = vmatprep.mubr.bf16.mxu0 %v6630_v15 }
  0xaf   : > { %v321_v54 = vpop.xlane.xlu0 %320  ;;  %v325_v55 = vpop.xlane.xlu1 %324 }
  0xb0   : > { %v354_v62 = vmax.f32 %v325_v55, 1.0  ;;  %v352_v2 = vmax.f32 %v321_v54, 1.0 }
  0xb2   : > { %5762 = vrcp.f32 %v354_v62 }
  0xb3   : > { %v323_v56 = vpop.xlane.xlu0 %322  ;;  %v327_v57 = vpop.xlane.xlu1 %326 }
  0xb4   : > { %v355_v63 = vmax.f32 %v327_v57, 1.0  ;;  %v353_v0 = vmax.f32 %v323_v56, 1.0 }
  0xb6   : > { %5764 = vrcp.f32 %v355_v63 }
  0xb7   : > { %v329_v58 = vpop.xlane.xlu0 %328  ;;  %v331_v59 = vpop.xlane.xlu1 %330  ;;  %5766 = vrcp.f32 %v353_v0 }
  0xb8   : > { %5768 = vrcp.f32 %v352_v2  ;;  %v356_v7 = vmax.f32 %v329_v58, 1.0  ;;  %v357_v9 = vmax.f32 %v331_v59, 1.0 }
  0xbb   : > { %v333_v60 = vpop.xlane.xlu0 %332  ;;  %v335_v61 = vpop.xlane.xlu1 %334 }
  0xbc   : > { %v358_v4 = vmax.f32 %v333_v60, 1.0  ;;  %v359_v5 = vmax.f32 %v335_v61, 1.0  ;;  %v6694_v10 = vpop.eup %5762 }
  0xbe   : > { %5770 = vrcp.f32 %v358_v4 }
  0xbf   : > { %v337_v1 = vpop.xlane.xlu0 %336  ;;  %v339_v3 = vpop.xlane.xlu1 %338  ;;  %5772 = vrcp.f32 %v359_v5 }
  0xc0   : > { %5774 = vrcp.f32 %v356_v7  ;;  %v6696_v11 = vpop.eup %5764  ;;  %v360_v22 = vmax.f32 %v337_v1, 1.0  ;;  %v361_v29 = vmax.f32 %v339_v3, 1.0 }
  0xc1   : > { %v6698_v14 = vpop.eup %5766  ;;  %5776 = vrcp.f32 %v357_v9 }
  0xc2   : > { %v6700_v21 = vpop.eup %5768 }
  0xc3   : > { %v341_v6 = vpop.xlane.xlu0 %340  ;;  %v343_v8 = vpop.xlane.xlu1 %342 }
  0xc4   : > { %v362_v16 = vmax.f32 %v341_v6, 1.0  ;;  %v363_v20 = vmax.f32 %v343_v8, 1.0 }
  0xc6   : > { %5778 = vrcp.f32 %v362_v16 }
  0xc7   : > { %v345_v13 = vpop.xlane.xlu0 %344  ;;  %v347_v17 = vpop.xlane.xlu1 %346  ;;  %5780 = vrcp.f32 %v363_v20 }
  0xc8   : > { %v6706_v34 = vpop.eup %5770  ;;  %5782 = vrcp.f32 %v360_v22  ;;  %v364_v46 = vmax.f32 %v345_v13, 1.0  ;;  %v365_v54 = vmax.f32 %v347_v17, 1.0 }
  0xc9   : > { %v6708_v36 = vpop.eup %5772  ;;  %5784 = vrcp.f32 %v361_v29 }
  0xca   : > { %v6711_v38 = vpop.eup %5774 }
  0xcb   : > { %v349_v33 = vpop.xlane.xlu0 %348  ;;  %v6714_v45 = vpop.eup %5776 }
  0xcc   : > { %v351_v35 = vpop.xlane.xlu1 %350  ;;  %v366_v41 = vmax.f32 %v349_v33, 1.0 }
  0xcd   : > { %v367_v43 = vmax.f32 %v351_v35, 1.0  ;;  %v6765_v35 = vld [vmem:[%s7974_s3 + $0x10] ss:$0 sm:$0xff] }
  0xce   : > { %5786 = vrcp.f32 %v366_v41 }
  0xcf   : > { %5788 = vrcp.f32 %v367_v43 }
  0xd0   : > { %v6720_v57 = vpop.eup %5778  ;;  %5790 = vrcp.f32 %v364_v46 }
  0xd1   : > { %v6722_v58 = vpop.eup %5780  ;;  %5792 = vrcp.f32 %v365_v54 }
  0xd2   : > { %v6725_v60 = vpop.eup %5782 }
  0xd3   : > { %v6728_v63 = vpop.eup %5784 }
  0xd8   : > { %v6734_v7 = vpop.eup %5786 }
  0xd9   : > { %v6736_v8 = vpop.eup %5788 }
 0x111   : > { %v5039_v12 = vpop.f32.mrb[0].mxu0 }
 0x112   : > { %v479_v15 = vpop.f32.mrb[1].mxu0  ;;  %v544_v23 = vmul.f32 %v6694_v10, %v5039_v12  ;;  %v6739_v12 = vpop.eup %5790 }
 0x113   : > { %v5040_v19 = vpop.f32.mrb[2].mxu0  ;;  %v542_v26 = vmul.f32 %v6700_v21, %v479_v15  ;;  %v6742_v16 = vpop.eup %5792 }
 0x114   : > { %v545_v24 = vmul.f32 %v6696_v11, %v5040_v19  ;;  %v482_v25 = vpop.f32.mrb[3].mxu0 }
 0x115   : > { %v543_v28 = vmul.f32 %v6698_v14, %v482_v25 }
 0x116   : > { %v559_v30 = vpack.c.bf16 %v545_v24, %v544_v23 }
 0x117   : > { %v558_v31 = vpack.c.bf16 %v543_v28, %v542_v26  ;;  %v855_v26 = vld [vmem:[%s7974_s3 + $0x28] sm:$0xff]  ;;  %v856_v28 = vld [vmem:[%s7974_s3 + $0x30] sm:$0xff] }
 0x118   : > { %v857_v29 = vpack.c.bf16 %v856_v28, %v855_v26 }
 0x119   : > { %v5043_v37 = vpop.f32.mrb[4].mxu0  ;;  %5073 = vmatprep.mubr.msk.bf16.mxu1 %vm566_vm1, %v558_v31  ;;  %v853_v31 = vld [vmem:[%s7974_s3 + $0x20] sm:$0xff] }
 0x11a   : > { %v495_v40 = vpop.f32.mrb[5].mxu0  ;;  %5074 = vmatmul.mubr.msk.bf16.vlgmr.msra.gmra.mrb[0].mxu1 %vm566_vm1, %v559_v30  ;;  %v548_v47 = vmul.f32 %v6706_v34, %v5043_v37  ;;  %5121 = vmatprep.subr.bf16.mxu1 %v857_v29  ;;  %v852_v30 = vld [vmem:[%s7974_s3 + $0x18] sm:$0xff] }
 0x11b   : > { %v5044_v42 = vpop.f32.mrb[6].mxu0  ;;  %v546_v52 = vmul.f32 %v6711_v38, %v495_v40  ;;  %5122 = vmatpush3.bf16.msra.mxu1 %v857_v29  ;;  %v854_v33 = vpack.c.bf16 %v853_v31, %v852_v30 }
 0x11c   : > { %v549_v49 = vmul.f32 %v6708_v36, %v5044_v42  ;;  %v498_v50 = vpop.f32.mrb[7].mxu0 }
 0x11d   : > { %v547_v53 = vmul.f32 %v6714_v45, %v498_v50  ;;  %5139 = vmatprep.subr.bf16.mxu1 %v854_v33 }
 0x11e   : > { %v561_v55 = vpack.c.bf16 %v549_v49, %v548_v47 }
 0x11f   : > { %v560_v56 = vpack.c.bf16 %v547_v53, %v546_v52 }
 0x121   : > { %v5047_v59 = vpop.f32.mrb[8].mxu0  ;;  %5077 = vmatprep.mubr.msk.bf16.mxu1 %vm566_vm1, %v560_v56 }
 0x122   : > { %v511_v61 = vpop.f32.mrb[9].mxu0  ;;  %5078 = vmatmul.mubr.msk.bf16.gmra.mrb[4].mxu1 %vm566_vm1, %v561_v55  ;;  %v552_v0 = vmul.f32 %v6720_v57, %v5047_v59 }
 0x123   : > { %v5048_v62 = vpop.f32.mrb[10].mxu0  ;;  %v550_v3 = vmul.f32 %v6725_v60, %v511_v61  ;;  %v1275_v61 = vld [vmem:[%s7974_s3 + $0x40] sm:$0xff] }
 0x124   : > { %v553_v1 = vmul.f32 %v6722_v58, %v5048_v62  ;;  %v514_v2 = vpop.f32.mrb[11].mxu0  ;;  %v1276_v62 = vld [vmem:[%s7974_s3 + $0x48] sm:$0xff] }
 0x125   : > { %v551_v4 = vmul.f32 %v6728_v63, %v514_v2 }
 0x126   : > { %v563_v5 = vpack.c.bf16 %v553_v1, %v552_v0 }
 0x127   : > { %v562_v6 = vpack.c.bf16 %v551_v4, %v550_v3 }
 0x129   : > { %v5051_v9 = vpop.f32.mrb[12].mxu0  ;;  %5081 = vmatprep.mubr.msk.bf16.mxu1 %vm566_vm1, %v562_v6  ;;  %v6782_v6 = vpack.c.bf16 %v1276_v62, %v1275_v61 }
 0x12a   : > { %v527_v13 = vpop.f32.mrb[13].mxu0  ;;  %5082 = vmatmul.mubr.msk.bf16.gmra.mrb[8].mxu1 %vm566_vm1, %v563_v5  ;;  %v556_v17 = vmul.f32 %v6734_v7, %v5051_v9 }
 0x12b   : > { %v5052_v15 = vpop.f32.mrb[14].mxu0  ;;  %v554_v22 = vmul.f32 %v6739_v12, %v527_v13 }
 0x12c   : > { %v557_v19 = vmul.f32 %v6736_v8, %v5052_v15  ;;  %v530_v20 = vpop.f32.mrb[15].mxu0 }
 0x12d   : > { %v555_v23 = vmul.f32 %v6742_v16, %v530_v20 }
 0x12e   : > { %v565_v24 = vpack.c.bf16 %v557_v19, %v556_v17 }
 0x12f   : > { %v564_v25 = vpack.c.bf16 %v555_v23, %v554_v22 }
 0x131   : > { %5085 = vmatprep.mubr.msk.bf16.mxu1 %vm566_vm1, %v564_v25 }
 0x132   : > { %5086 = vmatmul.mubr.msk.bf16.gmra.mrb[12].mxu1 %vm566_vm1, %v565_v24 }
 0x1ed   : > { %v5075_v37 = vpop.f32.mrb[0].mxu1 }
 0x1ee   : > { %v822_v40 = vadd.f32 %v5075_v37, %v6765_v35  ;;  %v753_v41 = vpop.f32.mrb[1].mxu1 }
 0x1ef   : > { %v820_v42 = vadd.f32 %v6765_v35, %v753_v41  ;;  %v5076_v43 = vpop.f32.mrb[2].mxu1 }
 0x1f0   : > { %v823_v46 = vadd.f32 %v5076_v43, %v6765_v35  ;;  %v756_v47 = vpop.f32.mrb[3].mxu1  ;;  %v838_v50 = vmax.f32 %v822_v40, 0.0 }
 0x1f1   : > { %v821_v49 = vadd.f32 %v6765_v35, %v756_v47  ;;  %v836_v53 = vmax.f32 %v820_v42, 0.0 }
 0x1f2   : > { %v839_v52 = vmax.f32 %v823_v46, 0.0 }
 0x1f3   : > { %v837_v54 = vmax.f32 %v821_v49, 0.0 }
 0x1f4   : > { %v860_v55 = vpack.c.bf16 %v839_v52, %v838_v50 }
 0x1f5   : > { %v859_v56 = vpack.c.bf16 %v837_v54, %v836_v53  ;;  %v5079_v59 = vpop.f32.mrb[4].mxu1 }
 0x1f6   : > { %v826_v0 = vadd.f32 %v5079_v59, %v6765_v35  ;;  %v769_v1 = vpop.f32.mrb[5].mxu1 }
 0x1f7   : > { %v824_v2 = vadd.f32 %v6765_v35, %v769_v1  ;;  %v5080_v3 = vpop.f32.mrb[6].mxu1  ;;  %5089 = vmatprep.subr.bf16.mxu0 %v859_v56  ;;  %5123 = vmatprep.mubr.msk.bf16.mxu1 %vm988_vm2, %v859_v56 }
 0x1f8   : > { %v827_v4 = vadd.f32 %v5080_v3, %v6765_v35  ;;  %v772_v5 = vpop.f32.mrb[7].mxu1  ;;  %5090 = vmatpush3.bf16.msra.mxu0 %v859_v56  ;;  %5124 = vmatmul.mubr.msk.bf16.vlgmr.msra.gmra.mrb[16].mxu1 %vm988_vm2, %v860_v55  ;;  %v842_v13 = vmax.f32 %v826_v0, 0.0 }
 0x1f9   : > { %v825_v9 = vadd.f32 %v6765_v35, %v772_v5  ;;  %5091 = vmatprep.subr.bf16.mxu0 %v860_v55  ;;  %5140 = vmatpush3.bf16.msra.mxu1 %v854_v33  ;;  %v840_v17 = vmax.f32 %v824_v2, 0.0  ;;  %v1285_v2 = vld [vmem:[%s7974_s3 + $0x80] sm:$0xff]  ;;  %v1290_v5 = vld [vmem:[%s7974_s3 + $0x98] sm:$0xff] }
 0x1fa   : > { %v843_v15 = vmax.f32 %v827_v4, 0.0  ;;  %5553 = vmatprep.subr.bf16.mxu1 %v6782_v6  ;;  %v1289_v4 = vld [vmem:[%s7974_s3 + $0x90] sm:$0xff] }
 0x1fb   : > { %v841_v19 = vmax.f32 %v825_v9, 0.0  ;;  %v6850_v9 = vpack.c.bf16 %v1290_v5, %v1289_v4 }
 0x1fc   : > { %v862_v20 = vpack.c.bf16 %v843_v15, %v842_v13  ;;  %5092 = vmatpush3.bf16.msra.mxu0 %v860_v55  ;;  %v1291_v13 = vld [vmem:[%s7974_s3 + $0xa0] sm:$0xff]  ;;  %v1292_v15 = vld [vmem:[%s7974_s3 + $0xa8] sm:$0xff] }
 0x1fd   : > { %v861_v22 = vpack.c.bf16 %v841_v19, %v840_v17  ;;  %v5083_v23 = vpop.f32.mrb[8].mxu1  ;;  %v6862_v17 = vpack.c.bf16 %v1292_v15, %v1291_v13 }
 0x1fe   : > { %v830_v24 = vadd.f32 %v5083_v23, %v6765_v35  ;;  %v785_v25 = vpop.f32.mrb[9].mxu1 }
 0x1ff   : > { %v828_v26 = vadd.f32 %v6765_v35, %v785_v25  ;;  %v5084_v28 = vpop.f32.mrb[10].mxu1  ;;  %5093 = vmatprep.subr.bf16.mxu0 %v861_v22  ;;  %5127 = vmatprep.mubr.msk.bf16.mxu1 %vm988_vm2, %v861_v22  ;;  %8007 = vst [vmem:[#allocation5_spill] sm:$0xff] %v6862_v17 }
 0x200   : > { %v831_v29 = vadd.f32 %v5084_v28, %v6765_v35  ;;  %v788_v30 = vpop.f32.mrb[11].mxu1  ;;  %5094 = vmatpush3.bf16.msra.mxu0 %v861_v22  ;;  %5128 = vmatmul.mubr.msk.bf16.gmra.mrb[20].mxu1 %vm988_vm2, %v862_v20  ;;  %v846_v33 = vmax.f32 %v830_v24, 0.0 }
 0x201   : > { %v829_v31 = vadd.f32 %v6765_v35, %v788_v30  ;;  %5095 = vmatprep.subr.bf16.mxu0 %v862_v20  ;;  %v844_v40 = vmax.f32 %v828_v26, 0.0 }
 0x202   : > { %v847_v37 = vmax.f32 %v831_v29, 0.0 }
 0x203   : > { %v845_v41 = vmax.f32 %v829_v31, 0.0 }
 0x204   : > { %v864_v42 = vpack.c.bf16 %v847_v37, %v846_v33  ;;  %5096 = vmatpush3.bf16.msra.mxu0 %v862_v20  ;;  %v1296_v33 = vld [vmem:[%s7974_s3 + $0xb8] sm:$0xff] }
 0x205   : > { %v863_v43 = vpack.c.bf16 %v845_v41, %v844_v40  ;;  %v5087_v46 = vpop.f32.mrb[12].mxu1 }
 0x206   : > { %v834_v47 = vadd.f32 %v5087_v46, %v6765_v35  ;;  %v801_v49 = vpop.f32.mrb[13].mxu1 }
 0x207   : > { %v832_v50 = vadd.f32 %v6765_v35, %v801_v49  ;;  %v5088_v52 = vpop.f32.mrb[14].mxu1  ;;  %5097 = vmatprep.subr.bf16.mxu0 %v863_v43  ;;  %5131 = vmatprep.mubr.msk.bf16.mxu1 %vm988_vm2, %v863_v43 }
 0x208   : > { %v835_v53 = vadd.f32 %v5088_v52, %v6765_v35  ;;  %v804_v54 = vpop.f32.mrb[15].mxu1  ;;  %5098 = vmatpush3.bf16.msra.mxu0 %v863_v43  ;;  %5132 = vmatmul.mubr.msk.bf16.gmra.mrb[24].mxu1 %vm988_vm2, %v864_v42  ;;  %v850_v56 = vmax.f32 %v834_v47, 0.0 }
 0x209   : > { %v833_v55 = vadd.f32 %v6765_v35, %v804_v54  ;;  %5099 = vmatprep.subr.bf16.mxu0 %v864_v42  ;;  %v848_v61 = vmax.f32 %v832_v50, 0.0  ;;  %v1277_v35 = vld [vmem:[%s7974_s3 + $0x50] sm:$0xff] }
 0x20a   : > { %v851_v59 = vmax.f32 %v835_v53, 0.0 }
 0x20b   : > { %v849_v62 = vmax.f32 %v833_v55, 0.0 }
 0x20c   : > { %v866_v0 = vpack.c.bf16 %v851_v59, %v850_v56  ;;  %5100 = vmatpush3.bf16.msra.mxu0 %v864_v42 }
 0x20d   : > { %v865_v1 = vpack.c.bf16 %v849_v62, %v848_v61 }
 0x20f   : > { %5101 = vmatprep.subr.bf16.mxu0 %v865_v1  ;;  %5135 = vmatprep.mubr.msk.bf16.mxu1 %vm988_vm2, %v865_v1 }
 0x210   : > { %5102 = vmatpush3.bf16.msra.mxu0 %v865_v1  ;;  %5136 = vmatmul.mubr.msk.bf16.gmra.mrb[28].mxu1 %vm988_vm2, %v866_v0 }
 0x211   : > { %5103 = vmatprep.subr.bf16.mxu0 %v866_v0 }
 0x214   : > { %5104 = vmatpush3.bf16.msra.mxu0 %v866_v0 }
 0x215   : > { %5157 = vmatprep.subr.bf16.mxu0 %v6782_v6 }
 0x217   : > { %5106 = vmatmul.mubr.bf16.vlgmr.msra.gmra.mrb[16].mxu0 %v6635_v18  ;;  %v1278_v18 = vld [vmem:[%s7974_s3 + $0x58] sm:$0xff] }
 0x218   : > { %5109 = vmatprep.mubr.bf16.mxu0 %v6646_v27  ;;  %5158 = vmatpush3.bf16.msra.mxu0 %v6782_v6  ;;  %v6815_v27 = vpack.c.bf16 %v1278_v18, %v1277_v35  ;;  %v1298_v35 = vld [vmem:[%s7974_s3 + $0xc8] sm:$0xff] }
 0x21a   : > { %5159 = vmatprep.subr.bf16.mxu0 %v6815_v27 }
 0x21c   : > { %5160 = vmatpush3.bf16.msra.mxu0 %v6815_v27 }
 0x21f   : > { %5110 = vmatmul.mubr.bf16.gmra.mrb[20].mxu0 %v6655_v32  ;;  %v1282_v32 = vld [vmem:[%s7974_s3 + $0x68] sm:$0xff] }
 0x220   : > { %5113 = vmatprep.mubr.bf16.mxu0 %v6662_v39  ;;  %v1283_v39 = vld [vmem:[%s7974_s3 + $0x70] sm:$0xff] }
 0x227   : > { %5114 = vmatmul.mubr.bf16.gmra.mrb[24].mxu0 %v6671_v44  ;;  %v6825_v44 = vpack.c.bf16 %v1283_v39, %v1282_v32 }
 0x228   : > { %5117 = vmatprep.mubr.bf16.mxu0 %v6676_v48  ;;  %v6510_v48 = vmov 0.0|0.0  }
 0x229   : > { %5169 = vmatprep.subr.bf16.mxu0 %v6825_v44 }
 0x22f   : > { %5118 = vmatmul.mubr.bf16.gmra.mrb[28].mxu0 %v6682_v51  ;;  %v1284_v51 = vld [vmem:[%s7974_s3 + $0x78] sm:$0xff] }
 0x230   : > { %5161 = vmatprep.mubr.bf16.mxu0 %v6510_v48  ;;  %v6838_v3 = vpack.c.bf16 %v1285_v2, %v1284_v51  ;;  %v6925_v2 = vld [vmem:[%s7974_s3 + $0x60] ss:$0 sm:$0xff] }
 0x237   : > { %5162 = vmatmul.mubr.bf16.vlgmr.msra.gmra.mrb[32].mxu0 %v6510_v48 }
 0x238   : > { %5170 = vmatpush3.bf16.msra.mxu0 %v6825_v44  ;;  %5173 = vmatprep.mubr.bf16.mxu0 %v6510_v48 }
 0x239   : > { %5171 = vmatprep.subr.bf16.mxu0 %v6838_v3 }
 0x23c   : > { %5172 = vmatpush3.bf16.msra.mxu0 %v6838_v3 }
 0x23d   : > { %5181 = vmatprep.subr.bf16.mxu0 %v6850_v9 }
 0x23f   : > { %5174 = vmatmul.mubr.bf16.vlgmr.msra.gmra.mrb[36].mxu0 %v6510_v48 }
 0x240   : > { %5177 = vmatprep.mubr.bf16.mxu0 %v6510_v48  ;;  %5182 = vmatpush3.bf16.msra.mxu0 %v6850_v9 }
 0x241   : > { %5183 = vmatprep.subr.bf16.mxu0 %v6862_v17 }
 0x244   : > { %5184 = vmatpush3.bf16.msra.mxu0 %v6862_v17 }
 0x247   : > { %5178 = vmatmul.mubr.bf16.gmra.mrb[40].mxu0 %v6510_v48 }
 0x248   : > { %5185 = vmatprep.mubr.bf16.mxu0 %v6510_v48 }
 0x24f   : > { %5186 = vmatmul.mubr.bf16.vlgmr.msra.gmra.mrb[44].mxu0 %v6510_v48 }
 0x250   : > { %5189 = vmatprep.mubr.bf16.mxu0 %v6510_v48 }
 0x257   : > { %5190 = vmatmul.mubr.bf16.gmra.mrb[48].mxu0 %v6510_v48 }
 0x2ea   : > { %v5107_v19 = vpop.f32.mrb[16].mxu0 }
 0x2eb   : > { %v901_v20 = vpop.f32.mrb[17].mxu0  ;;  %v966_v23 = vmul.f32 %v6694_v10, %v5107_v19  ;;  %v1297_v10 = vld [vmem:[%s7974_s3 + $0xc0] sm:$0xff] }
 0x2ec   : > { %v5108_v22 = vpop.f32.mrb[18].mxu0  ;;  %v964_v26 = vmul.f32 %v6700_v21, %v901_v20  ;;  %v6885_v41 = vpack.c.bf16 %v1297_v10, %v1296_v33 }
 0x2ed   : > { %v967_v24 = vmul.f32 %v6696_v11, %v5108_v22  ;;  %v904_v25 = vpop.f32.mrb[19].mxu0 }
 0x2ee   : > { %v965_v28 = vmul.f32 %v6698_v14, %v904_v25 }
 0x2ef   : > { %v981_v29 = vpack.c.bf16 %v967_v24, %v966_v23 }
 0x2f0   : > { %v980_v30 = vpack.c.bf16 %v965_v28, %v964_v26 }
 0x2f2   : > { %v5111_v31 = vpop.f32.mrb[20].mxu0  ;;  %5141 = vmatprep.mubr.msk.bf16.mxu1 %vm988_vm2, %v980_v30 }
 0x2f3   : > { %v917_v37 = vpop.f32.mrb[21].mxu0  ;;  %5142 = vmatmul.mubr.msk.bf16.vlgmr.msra.gmra.mrb[16].mxu1 %vm988_vm2, %v981_v29  ;;  %v970_v14 = vmul.f32 %v6706_v34, %v5111_v31 }
 0x2f4   : > { %v5112_v11 = vpop.f32.mrb[22].mxu0  ;;  %5555 = vmatpush3.bf16.msra.mxu1 %v6782_v6  ;;  %v968_v42 = vmul.f32 %v6711_v38, %v917_v37 }
 0x2f5   : > { %v971_v21 = vmul.f32 %v6708_v36, %v5112_v11  ;;  %v920_v40 = vpop.f32.mrb[23].mxu0  ;;  %5554 = vmatprep.subr.bf16.mxu1 %v6815_v27 }
 0x2f6   : > { %v969_v43 = vmul.f32 %v6714_v45, %v920_v40 }
 0x2f7   : > { %v983_v46 = vpack.c.bf16 %v971_v21, %v970_v14 }
 0x2f8   : > { %v982_v47 = vpack.c.bf16 %v969_v43, %v968_v42  ;;  %5556 = vmatpush3.bf16.msra.mxu1 %v6815_v27 }
 0x2f9   : > { %5193 = vmatprep.subr.bf16.mxu1 %v6885_v41 }
 0x2fa   : > { %v5115_v49 = vpop.f32.mrb[24].mxu0  ;;  %5145 = vmatprep.mubr.msk.bf16.mxu1 %vm988_vm2, %v982_v47 }
 0x2fb   : > { %v933_v34 = vpop.f32.mrb[25].mxu0  ;;  %5146 = vmatmul.mubr.msk.bf16.gmra.mrb[20].mxu1 %vm988_vm2, %v983_v46  ;;  %v974_v50 = vmul.f32 %v6720_v57, %v5115_v49 }
 0x2fc   : > { %v5116_v36 = vpop.f32.mrb[26].mxu0  ;;  %v972_v45 = vmul.f32 %v6725_v60, %v933_v34 }
 0x2fd   : > { %v975_v52 = vmul.f32 %v6722_v58, %v5116_v36  ;;  %v936_v38 = vpop.f32.mrb[27].mxu0 }
 0x2fe   : > { %v973_v53 = vmul.f32 %v6728_v63, %v936_v38 }
 0x2ff   : > { %v985_v54 = vpack.c.bf16 %v975_v52, %v974_v50 }
 0x300   : > { %v984_v55 = vpack.c.bf16 %v973_v53, %v972_v45 }
 0x302   : > { %v5119_v56 = vpop.f32.mrb[28].mxu0  ;;  %5149 = vmatprep.mubr.msk.bf16.mxu1 %vm988_vm2, %v984_v55 }
 0x303   : > { %v949_v59 = vpop.f32.mrb[29].mxu0  ;;  %5150 = vmatmul.mubr.msk.bf16.gmra.mrb[24].mxu1 %vm988_vm2, %v985_v54  ;;  %v978_v62 = vmul.f32 %v6734_v7, %v5119_v56  ;;  %v1299_v7 = vld [vmem:[%s7974_s3 + $0xd0] sm:$0xff] }
 0x304   : > { %v5120_v61 = vpop.f32.mrb[30].mxu0  ;;  %v976_v58 = vmul.f32 %v6739_v12, %v949_v59 }
 0x305   : > { %v979_v57 = vmul.f32 %v6736_v8, %v5120_v61  ;;  %v952_v0 = vpop.f32.mrb[31].mxu0  ;;  %v6912_v8 = vpack.c.bf16 %v1299_v7, %v1298_v35  ;;  %v6951_v61 = vld [vmem:[%s7974_s3 + $0xb0] ss:$0 sm:$0xff] }
 0x306   : > { %v977_v60 = vmul.f32 %v6742_v16, %v952_v0 }
 0x307   : > { %v987_v1 = vpack.c.bf16 %v979_v57, %v978_v62 }
 0x308   : > { %v986_v63 = vpack.c.bf16 %v977_v60, %v976_v58 }
 0x30a   : > { %5153 = vmatprep.mubr.msk.bf16.mxu1 %vm988_vm2, %v986_v63  ;;  %v5163_v12 = vpop.f32.mrb[32].mxu0 }
 0x30b   : > { %5154 = vmatmul.mubr.msk.bf16.gmra.mrb[28].mxu1 %vm988_vm2, %v987_v1  ;;  %v1354_v16 = vpop.f32.mrb[33].mxu0  ;;  %v1363_v5 = vadd.f32 %v5163_v12, %v6925_v2 }
 0x30c   : > { %5165 = vmatprep.mubr.bf16.mxu1 %v6510_v48  ;;  %v5164_v18 = vpop.f32.mrb[34].mxu0  ;;  %v1355_v13 = vadd.f32 %v6925_v2, %v1354_v16 }
 0x30d   : > { %v1357_v32 = vpop.f32.mrb[35].mxu0  ;;  %v1366_v15 = vadd.f32 %v5164_v18, %v6925_v2  ;;  %v4583_v23 = vmul.f32 -1.442695, %v1363_v5 }
 0x30e   : > { %v4581_v24 = vmul.f32 -1.442695, %v1355_v13  ;;  %v1358_v29 = vadd.f32 %v6925_v2, %v1357_v32 }
 0x30f   : > { %v4584_v25 = vmul.f32 -1.442695, %v1366_v15  ;;  %5794 = vpow2.f32 %v4583_v23 }
 0x310   : > { %5796 = vpow2.f32 %v4581_v24  ;;  %v4582_v37 = vmul.f32 -1.442695, %v1358_v29 }
 0x311   : > { %5798 = vpow2.f32 %v4584_v25 }
 0x312   : > { %v5175_v39 = vpop.f32.mrb[36].mxu0 }
 0x313   : > { %5166 = vmatmul.mubr.bf16.vlgmr.msra.gmra.mrb[32].mxu1 %v6510_v48  ;;  %v1423_v51 = vpop.f32.mrb[37].mxu0 }
 0x314   : > { %5194 = vmatpush3.bf16.msra.mxu1 %v6885_v41  ;;  %5197 = vmatprep.mubr.bf16.mxu1 %v6510_v48  ;;  %v5176_v4 = vpop.f32.mrb[38].mxu0 }
 0x315   : > { %5195 = vmatprep.subr.bf16.mxu1 %v6912_v8  ;;  %v1426_v19 = vpop.f32.mrb[39].mxu0 }
 0x318   : > { %5196 = vmatpush3.bf16.msra.mxu1 %v6912_v8 }
 0x319   : > { %v5795_v46 = vpop.eup %5794 }
 0x31a   : > { %v6940_v11 = vpop.f32.mrb[40].mxu0  ;;  %v5797_v49 = vpop.eup %5796  ;;  %v1618_v50 = vadd.f32 1.0, %v5795_v46 }
 0x31b   : > { %5198 = vmatmul.mubr.bf16.vlgmr.msra.gmra.mrb[36].mxu1 %v6510_v48  ;;  %v6942_v14 = vpop.f32.mrb[41].mxu0  ;;  %v5799_v36 = vpop.eup %5798  ;;  %v1616_v38 = vadd.f32 1.0, %v5797_v49 }
 0x31c   : > { %5201 = vmatprep.mubr.bf16.mxu1 %v6510_v48  ;;  %v6944_v21 = vpop.f32.mrb[42].mxu0  ;;  %v1619_v53 = vadd.f32 1.0, %v5799_v36 }
 0x31d   : > { %v6946_v40 = vpop.f32.mrb[43].mxu0 }
 0x322   : > { %v5187_v42 = vpop.f32.mrb[44].mxu0 }
 0x323   : > { %5202 = vmatmul.mubr.bf16.gmra.mrb[40].mxu1 %v6510_v48  ;;  %v6933_v48 = vld [vmem:[%s7974_s3 + $0x88] ss:$0 sm:$0xff]  ;;  %v1492_v43 = vpop.f32.mrb[45].mxu0  ;;  %v1501_v58 = vadd.f32 %v5187_v42, %v6951_v61 }
 0x324   : > { %v1432_v20 = vadd.f32 %v5175_v39, %v6933_v48  ;;  %v1424_v22 = vadd.f32 %v6933_v48, %v1423_v51  ;;  %v1435_v26 = vadd.f32 %v5176_v4, %v6933_v48  ;;  %v1427_v28 = vadd.f32 %v6933_v48, %v1426_v19  ;;  %v5188_v47 = vpop.f32.mrb[46].mxu0 }
 0x325   : > { %v1495_v34 = vpop.f32.mrb[47].mxu0  ;;  %v1493_v1 = vadd.f32 %v6951_v61, %v1492_v43  ;;  %v1504_v63 = vadd.f32 %v5188_v47, %v6951_v61  ;;  %v6976_v47 = vld [vmem:[%s7974_s3 + $0x38] ss:$0 sm:$0xff] }
 0x326   : > { %v4591_v30 = vmul.f32 -1.442695, %v1432_v20  ;;  %v4589_v31 = vmul.f32 -1.442695, %v1424_v22  ;;  %v4592_v33 = vmul.f32 -1.442695, %v1435_v26  ;;  %v1496_v35 = vadd.f32 %v6951_v61, %v1495_v34 }
 0x327   : > { %v4590_v10 = vmul.f32 -1.442695, %v1427_v28 }
 0x328   : > { %5800 = vpow2.f32 %v4591_v30 }
 0x329   : > { %5802 = vpow2.f32 %v4589_v31 }
 0x32a   : > { %5804 = vpow2.f32 %v4592_v33  ;;  %v6957_v7 = vpop.f32.mrb[48].mxu0 }
 0x32b   : > { %5806 = vpow2.f32 %v4590_v10  ;;  %v6959_v12 = vpop.f32.mrb[49].mxu0 }
 0x32c   : > { %5808 = vpow2.f32 %v4582_v37  ;;  %v6961_v18 = vpop.f32.mrb[50].mxu0 }
 0x32d   : > { %5810 = vrcp.f32 %v1618_v50  ;;  %v6963_v4 = vpop.f32.mrb[51].mxu0 }
 0x32e   : > { %5812 = vrcp.f32 %v1616_v38 }
 0x32f   : > { %5814 = vrcp.f32 %v1619_v53 }
 0x332   : > { %v5801_v52 = vpop.eup %5800 }
 0x333   : > { %v5803_v45 = vpop.eup %5802  ;;  %v1666_v55 = vadd.f32 1.0, %v5801_v52 }
 0x334   : > { %v5805_v54 = vpop.eup %5804  ;;  %v1664_v59 = vadd.f32 1.0, %v5803_v45 }
 0x335   : > { %v5807_v56 = vpop.eup %5806  ;;  %v1667_v57 = vadd.f32 1.0, %v5805_v54  ;;  %5816 = vrcp.f32 %v1666_v55 }
 0x336   : > { %v5809_v62 = vpop.eup %5808  ;;  %v1665_v0 = vadd.f32 1.0, %v5807_v56  ;;  %5818 = vrcp.f32 %v1664_v59 }
 0x337   : > { %v1617_v60 = vadd.f32 1.0, %v5809_v62  ;;  %5820 = vrcp.f32 %v1667_v57  ;;  %v5811_v16 = vpop.eup %5810  ;;  %v1448_v62 = vadd.f32 %v6940_v11, %v6933_v48 }
 0x338   : > { %5822 = vrcp.f32 %v1665_v0  ;;  %v5813_v32 = vpop.eup %5812 }
 0x339   : > { %5824 = vtanh.f32 %v1501_v58  ;;  %v5815_v39 = vpop.eup %5814  ;;  %v4595_v11 = vmul.f32 -1.442695, %v1448_v62 }
 0x33a   : > { %5826 = vrcp.f32 %v1617_v60 }
 0x33b   : > { %5828 = vtanh.f32 %v1493_v1 }
 0x33c   : > { %5830 = vtanh.f32 %v1504_v63 }
 0x33d   : > { %5832 = vtanh.f32 %v1496_v35 }
 0x33e   : > { %5834 = vpow2.f32 %v4595_v11  ;;  %v1517_v11 = vadd.f32 %v6957_v7, %v6951_v61 }
 0x33f   : > { %v5817_v51 = vpop.eup %5816 }
 0x340   : > { %v5819_v5 = vpop.eup %5818  ;;  %v1746_v19 = vmul.f32 0.0, %v5817_v51  ;;  %v1440_v51 = vadd.f32 %v6933_v48, %v6942_v14 }
 0x341   : > { %v5821_v13 = vpop.eup %5820  ;;  %v1744_v23 = vmul.f32 0.0, %v5819_v5 }
 0x342   : > { %v5823_v15 = vpop.eup %5822  ;;  %v1747_v26 = vmul.f32 0.0, %v5821_v13 }
 0x343   : > { %v5825_v20 = vpop.eup %5824  ;;  %v1745_v29 = vmul.f32 0.0, %v5823_v15 }
 0x344   : > { %v5827_v22 = vpop.eup %5826  ;;  %v1754_v24 = vmul.f32 %v5825_v20, %v5811_v16 }
 0x345   : > { %v5829_v25 = vpop.eup %5828 }
 0x346   : > { %v5831_v28 = vpop.eup %5830  ;;  %v6965_v30 = vadd.f32 %v1754_v24, %v1746_v19  ;;  %v1752_v31 = vmul.f32 %v5829_v25, %v5813_v32  ;;  %v1451_v25 = vadd.f32 %v6944_v21, %v6933_v48 }
 0x347   : > { %v5833_v33 = vpop.eup %5832  ;;  %v1755_v10 = vmul.f32 %v5831_v28, %v5815_v39 }
 0x348   : > { %v6967_v37 = vadd.f32 %v1752_v31, %v1744_v23  ;;  %v1753_v42 = vmul.f32 %v5833_v33, %v5827_v22  ;;  %v4593_v23 = vmul.f32 -1.442695, %v1440_v51 }
 0x349   : > { %v6969_v43 = vadd.f32 %v1755_v10, %v1747_v26 }
 0x34a   : > { %v6971_v46 = vadd.f32 %v1753_v42, %v1745_v29  ;;  %v1443_v29 = vadd.f32 %v6933_v48, %v6946_v40  ;;  %5836 = vpow2.f32 %v4593_v23  ;;  %v4596_v48 = vmul.f32 -1.442695, %v1451_v25 }
 0x34c   : > { %5838 = vpow2.f32 %v4596_v48 }
 0x3c6   : > { %v5143_v49 = vpop.f32.mrb[16].mxu1 }
 0x3c7   : > { %v1237_v34 = vadd.f32 %v5143_v49, %v6976_v47  ;;  %v1168_v36 = vpop.f32.mrb[17].mxu1 }
 0x3c8   : > { %v1235_v50 = vadd.f32 %v6976_v47, %v1168_v36  ;;  %v5144_v52 = vpop.f32.mrb[18].mxu1  ;;  %v4594_v36 = vmul.f32 -1.442695, %v1443_v29 }
 0x3c9   : > { %v1238_v38 = vadd.f32 %v5144_v52, %v6976_v47  ;;  %v1171_v45 = vpop.f32.mrb[19].mxu1  ;;  %v1253_v54 = vmax.f32 %v1237_v34, 0.0 }
 0x3ca   : > { %v1236_v53 = vadd.f32 %v6976_v47, %v1171_v45  ;;  %v1251_v56 = vmax.f32 %v1235_v50, 0.0  ;;  %v5835_v45 = vpop.eup %5834  ;;  %5840 = vpow2.f32 %v4594_v36  ;;  %v4580_v36 = vld [vmem:[%s7974_s3 + $0xd8] ss:$0 sm:$0xff] }
 0x3cb   : > { %v1254_v55 = vmax.f32 %v1238_v38, 0.0 }
 0x3cc   : > { %v1252_v59 = vmax.f32 %v1236_v53, 0.0 }
 0x3cd   : > { %v6984_v57 = vpack.c.bf16 %v1254_v55, %v1253_v54 }
 0x3ce   : > { %v6986_v0 = vpack.c.bf16 %v1252_v59, %v1251_v56  ;;  %v5147_v58 = vpop.f32.mrb[20].mxu1 }
 0x3cf   : > { %v1241_v60 = vadd.f32 %v5147_v58, %v6976_v47  ;;  %v1184_v1 = vpop.f32.mrb[21].mxu1  ;;  %v7020_v10 = vsel %vm988_vm2, %v6984_v57, 0 }
 0x3d0   : > { %v1239_v63 = vadd.f32 %v6976_v47, %v1184_v1  ;;  %v5148_v35 = vpop.f32.mrb[22].mxu1  ;;  %5591 = vmatprep.subr.msk.bf16.mxu0 %vm988_vm2, %v6986_v0  ;;  %5229 = vmatprep.subr.bf16.mxu1 %v6986_v0  ;;  %v6995_v16 = vsel %vm988_vm2, %v6986_v0, 0 }
 0x3d1   : > { %v1242_v32 = vadd.f32 %v5148_v35, %v6976_v47  ;;  %v1187_v39 = vpop.f32.mrb[23].mxu1  ;;  %5206 = vmatpush3.bf16.xpose.msra.mxu0 %v6995_v16  ;;  %5230 = vmatpush3.bf16.msra.mxu1 %v6986_v0  ;;  %v1257_v13 = vmax.f32 %v1241_v60, 0.0  ;;  %v1670_v60 = vadd.f32 1.0, %v5835_v45 }
 0x3d2   : > { %v1240_v5 = vadd.f32 %v6976_v47, %v1187_v39  ;;  %5592 = vmatprep.subr.msk.bf16.mxu0 %vm988_vm2, %v6984_v57  ;;  %5231 = vmatprep.subr.bf16.mxu1 %v6984_v57  ;;  %v1255_v19 = vmax.f32 %v1239_v63, 0.0 }
 0x3d3   : > { %v1258_v15 = vmax.f32 %v1242_v32, 0.0  ;;  %v5837_v32 = vpop.eup %5836  ;;  %5842 = vrcp.f32 %v1670_v60 }
 0x3d4   : > { %v1256_v20 = vmax.f32 %v1240_v5, 0.0  ;;  %v1509_v5 = vadd.f32 %v6951_v61, %v6959_v12  ;;  %v1668_v7 = vadd.f32 1.0, %v5837_v32  ;;  %5844 = vtanh.f32 %v1517_v11 }
 0x3d5   : > { %v7006_v22 = vpack.c.bf16 %v1258_v15, %v1257_v13  ;;  %5232 = vmatpush3.bf16.msra.mxu1 %v6984_v57 }
 0x3d6   : > { %v7009_v24 = vpack.c.bf16 %v1256_v20, %v1255_v19  ;;  %v5151_v14 = vpop.f32.mrb[24].mxu1  ;;  %v1520_v19 = vadd.f32 %v6961_v18, %v6951_v61  ;;  %v1512_v20 = vadd.f32 %v6951_v61, %v6963_v4  ;;  %5846 = vtanh.f32 %v1509_v5 }
 0x3d7   : > { %v1245_v26 = vadd.f32 %v5151_v14, %v6976_v47  ;;  %v1200_v28 = vpop.f32.mrb[25].mxu1  ;;  %v7066_v29 = vsel %vm988_vm2, %v7006_v22, 0 }
 0x3d8   : > { %v1243_v31 = vadd.f32 %v6976_v47, %v1200_v28  ;;  %v5152_v33 = vpop.f32.mrb[26].mxu1  ;;  %5233 = vmatprep.subr.bf16.mxu1 %v7009_v24  ;;  %v7039_v58 = vsel %vm988_vm2, %v7009_v24, 0  ;;  %5848 = vtanh.f32 %v1520_v19 }
 0x3d9   : > { %v1246_v42 = vadd.f32 %v5152_v33, %v6976_v47  ;;  %v1203_v49 = vpop.f32.mrb[27].mxu1  ;;  %5208 = vmatpush3.bf16.xpose.msra.mxu0 %v7020_v10  ;;  %5234 = vmatpush3.bf16.msra.mxu1 %v7009_v24  ;;  %v1261_v40 = vmax.f32 %v1245_v26, 0.0  ;;  %v5839_v26 = vpop.eup %5838  ;;  %5850 = vtanh.f32 %v1512_v20 }
 0x3da   : > { %v1244_v21 = vadd.f32 %v6976_v47, %v1203_v49  ;;  %5593 = vmatprep.subr.msk.bf16.mxu0 %vm988_vm2, %v7009_v24  ;;  %5235 = vmatprep.subr.bf16.mxu1 %v7006_v22  ;;  %v1259_v50 = vmax.f32 %v1243_v31, 0.0  ;;  %v5841_v61 = vpop.eup %5840  ;;  %5852 = vrcp.f32 %v1668_v7 }
 0x3db   : > { %v1262_v34 = vmax.f32 %v1246_v42, 0.0 }
 0x3dc   : > { %v1260_v52 = vmax.f32 %v1244_v21, 0.0  ;;  %v1671_v21 = vadd.f32 1.0, %v5839_v26 }
 0x3dd   : > { %v7029_v38 = vpack.c.bf16 %v1262_v34, %v1261_v40  ;;  %5236 = vmatpush3.bf16.msra.mxu1 %v7006_v22  ;;  %v1669_v40 = vadd.f32 1.0, %v5841_v61 }
 0x3de   : > { %v7032_v53 = vpack.c.bf16 %v1260_v52, %v1259_v50  ;;  %v5155_v54 = vpop.f32.mrb[28].mxu1  ;;  %v7080_v50 = vpop.eup %5842 }
 0x3df   : > { %v1249_v55 = vadd.f32 %v5155_v54, %v6976_v47  ;;  %v1216_v56 = vpop.f32.mrb[29].mxu1  ;;  %v7082_v54 = vpop.eup %5844 }
 0x3e0   : > { %v1247_v59 = vadd.f32 %v6976_v47, %v1216_v56  ;;  %v5156_v62 = vpop.f32.mrb[30].mxu1  ;;  %5237 = vmatprep.subr.bf16.mxu1 %v7032_v53 }
 0x3e1   : > { %v1250_v1 = vadd.f32 %v5156_v62, %v6976_v47  ;;  %v1219_v63 = vpop.f32.mrb[31].mxu1  ;;  %5210 = vmatpush3.bf16.xpose.msra.mxu0 %v7039_v58  ;;  %5238 = vmatpush3.bf16.msra.mxu1 %v7032_v53  ;;  %v1265_v39 = vmax.f32 %v1249_v55, 0.0  ;;  %v7088_v62 = vpop.eup %5846 }
 0x3e2   : > { %v1248_v35 = vadd.f32 %v6976_v47, %v1219_v63  ;;  %5594 = vmatprep.subr.msk.bf16.mxu0 %vm988_vm2, %v7006_v22  ;;  %5239 = vmatprep.subr.bf16.mxu1 %v7029_v38  ;;  %v1263_v13 = vmax.f32 %v1247_v59, 0.0  ;;  %v7086_v59 = vsel %vm988_vm2, %v7032_v53, 0 }
 0x3e3   : > { %v1266_v51 = vmax.f32 %v1250_v1, 0.0 }
 0x3e4   : > { %v1264_v15 = vmax.f32 %v1248_v35, 0.0  ;;  %v7092_v35 = vpop.eup %5848 }
 0x3e5   : > { %v7054_v47 = vpack.c.bf16 %v1266_v51, %v1265_v39  ;;  %5240 = vmatpush3.bf16.msra.mxu1 %v7029_v38  ;;  %v7097_v39 = vpop.eup %5850 }
 0x3e6   : > { %v7059_v23 = vpack.c.bf16 %v1264_v15, %v1263_v13  ;;  %v5167_v14 = vpop.f32.mrb[32].mxu1  ;;  %v5853_v5 = vpop.eup %5852 }
 0x3e7   : > { %v1379_v12 = vadd.f32 %v5167_v14, %v6925_v2  ;;  %v1370_v25 = vpop.f32.mrb[33].mxu1 }
 0x3e8   : > { %v1371_v18 = vadd.f32 %v6925_v2, %v1370_v25  ;;  %v5168_v28 = vpop.f32.mrb[34].mxu1  ;;  %5241 = vmatprep.subr.bf16.mxu1 %v7059_v23 }
 0x3e9   : > { %v4587_v4 = vmul.f32 -1.442695, %v1379_v12  ;;  %v1382_v31 = vadd.f32 %v5168_v28, %v6925_v2  ;;  %v1373_v33 = vpop.f32.mrb[35].mxu1  ;;  %5212 = vmatpush3.bf16.xpose.msra.mxu0 %v7066_v29  ;;  %5242 = vmatpush3.bf16.msra.mxu1 %v7059_v23 }
 0x3ea   : > { %v4585_v42 = vmul.f32 -1.442695, %v1371_v18  ;;  %v1374_v49 = vadd.f32 %v6925_v2, %v1373_v33  ;;  %5595 = vmatprep.subr.msk.bf16.mxu0 %vm988_vm2, %v7032_v53  ;;  %5243 = vmatprep.subr.bf16.mxu1 %v7054_v47 }
 0x3eb   : > { %5854 = vpow2.f32 %v4587_v4  ;;  %v4588_v48 = vmul.f32 -1.442695, %v1382_v31  ;;  %v7102_v31 = vsel %vm988_vm2, %v7029_v38, 0 }
 0x3ec   : > { %5856 = vpow2.f32 %v4585_v42  ;;  %v4586_v34 = vmul.f32 -1.442695, %v1374_v49 }
 0x3ed   : > { %5858 = vpow2.f32 %v4588_v48  ;;  %5244 = vmatpush3.bf16.msra.mxu1 %v7054_v47 }
 0x3ee   : > { %5860 = vpow2.f32 %v4586_v34  ;;  %v5199_v2 = vpop.f32.mrb[36].mxu1  ;;  %5253 = vmatprep.subr.bf16.mxu1 %v6782_v6 }
 0x3ef   : > { %5862 = vrcp.f32 %v1671_v21  ;;  %v1570_v52 = vadd.f32 %v5199_v2, %v4580_v36  ;;  %v1561_v45 = vpop.f32.mrb[37].mxu1 }
 0x3f0   : > { %5864 = vrcp.f32 %v1669_v40  ;;  %v1562_v55 = vadd.f32 %v4580_v36, %v1561_v45  ;;  %v5200_v56 = vpop.f32.mrb[38].mxu1 }
 0x3f1   : > { %5866 = vtanh.f32 %v6967_v37  ;;  %v4599_v60 = vmul.f32 -1.442695, %v1570_v52  ;;  %v1573_v1 = vadd.f32 %v5200_v56, %v4580_v36  ;;  %v1564_v63 = vpop.f32.mrb[39].mxu1  ;;  %5214 = vmatpush3.bf16.xpose.msra.mxu0 %v7086_v59 }
 0x3f2   : > { %5868 = vtanh.f32 %v6969_v43  ;;  %v4597_v11 = vmul.f32 -1.442695, %v1562_v55  ;;  %v1565_v32 = vadd.f32 %v4580_v36, %v1564_v63  ;;  %5596 = vmatprep.subr.msk.bf16.mxu0 %vm988_vm2, %v7029_v38 }
 0x3f3   : > { %5870 = vpow2.f32 %v4599_v60  ;;  %v4600_v51 = vmul.f32 -1.442695, %v1573_v1 }
 0x3f4   : > { %5872 = vpow2.f32 %v4597_v11  ;;  %v4598_v13 = vmul.f32 -1.442695, %v1565_v32 }
 0x3f5   : > { %v5855_v15 = vpop.eup %5854  ;;  %5874 = vpow2.f32 %v4600_v51 }
 0x3f6   : > { %v5857_v19 = vpop.eup %5856  ;;  %v1622_v20 = vadd.f32 1.0, %v5855_v15  ;;  %5876 = vpow2.f32 %v4598_v13  ;;  %v5203_v7 = vpop.f32.mrb[40].mxu1  ;;  %v7111_v13 = vsel %vm988_vm2, %v7059_v23, 0 }
 0x3f7   : > { %v5859_v14 = vpop.eup %5858  ;;  %5878 = vtanh.f32 %v6971_v46  ;;  %v1620_v12 = vadd.f32 1.0, %v5857_v19  ;;  %v1586_v25 = vadd.f32 %v5203_v7, %v4580_v36  ;;  %v1577_v26 = vpop.f32.mrb[41].mxu1  ;;  %v1750_v19 = vmul.f32 0.0, %v7080_v50 }
 0x3f8   : > { %v5861_v18 = vpop.eup %5860  ;;  %5880 = vrcp.f32 %v1622_v20  ;;  %v1623_v28 = vadd.f32 1.0, %v5859_v14  ;;  %v1578_v61 = vadd.f32 %v4580_v36, %v1577_v26  ;;  %v5204_v4 = vpop.f32.mrb[42].mxu1  ;;  %v1748_v14 = vmul.f32 0.0, %v5853_v5 }
 0x3f9   : > { %v5863_v33 = vpop.eup %5862  ;;  %5882 = vrcp.f32 %v1620_v12  ;;  %v1621_v42 = vadd.f32 1.0, %v5861_v18  ;;  %v4603_v49 = vmul.f32 -1.442695, %v1586_v25  ;;  %v1589_v21 = vadd.f32 %v5204_v4, %v4580_v36  ;;  %v1580_v48 = vpop.f32.mrb[43].mxu1  ;;  %5216 = vmatpush3.bf16.xpose.msra.mxu0 %v7102_v31 }
 0x3fa   : > { %v5865_v40 = vpop.eup %5864  ;;  %5884 = vrcp.f32 %v1623_v28  ;;  %v4601_v34 = vmul.f32 -1.442695, %v1578_v61  ;;  %v1581_v2 = vadd.f32 %v4580_v36, %v1580_v48  ;;  %5597 = vmatprep.subr.msk.bf16.mxu0 %vm988_vm2, %v7059_v23  ;;  %v1751_v28 = vmul.f32 0.0, %v5863_v33 }
 0x3fb   : > { %v7107_v52 = vpop.eup %5866  ;;  %5886 = vrcp.f32 %v1621_v42  ;;  %v4604_v45 = vmul.f32 -1.442695, %v1589_v21  ;;  %v1749_v42 = vmul.f32 0.0, %v5865_v40 }
 0x3fc   : > { %v5869_v55 = vpop.eup %5868  ;;  %5888 = vpow2.f32 %v4603_v49  ;;  %v4602_v56 = vmul.f32 -1.442695, %v1581_v2 }
 0x3fd   : > { %v5871_v60 = vpop.eup %5870  ;;  %5890 = vpow2.f32 %v4601_v34 }
 0x3fe   : > { %v5873_v1 = vpop.eup %5872  ;;  %v1722_v63 = vadd.f32 1.0, %v5871_v60  ;;  %5892 = vpow2.f32 %v4604_v45 }
 0x3ff   : > { %v5875_v11 = vpop.eup %5874  ;;  %v1720_v32 = vadd.f32 1.0, %v5873_v1  ;;  %5894 = vpow2.f32 %v4602_v56 }
 0x400   : > { %v5877_v51 = vpop.eup %5876  ;;  %5896 = vrcp.f32 %v1722_v63  ;;  %v1723_v36 = vadd.f32 1.0, %v5875_v11 }
 0x401   : > { %v5879_v15 = vpop.eup %5878  ;;  %5898 = vrcp.f32 %v1720_v32  ;;  %v1721_v20 = vadd.f32 1.0, %v5877_v51  ;;  %5218 = vmatpush3.bf16.xpose.msra.mxu0 %v7111_v13 }
 0x402   : > { %v5881_v7 = vpop.eup %5880  ;;  %5900 = vrcp.f32 %v1723_v36  ;;  %5598 = vmatprep.subr.msk.bf16.mxu0 %vm988_vm2, %v7054_v47 }
 0x403   : > { %v5883_v12 = vpop.eup %5882  ;;  %5902 = vrcp.f32 %v1721_v20  ;;  %v1758_v25 = vmul.f32 %v5881_v7, %v7082_v54 }
 0x404   : > { %v5885_v26 = vpop.eup %5884  ;;  %5904 = vtanh.f32 %v6965_v30  ;;  %v1756_v18 = vmul.f32 %v5883_v12, %v7088_v62 }
 0x405   : > { %v5887_v50 = vpop.eup %5886  ;;  %v7120_v61 = vadd.f32 %v1758_v25, %v1750_v19  ;;  %v1759_v4 = vmul.f32 %v5885_v26, %v7092_v35  ;;  %v7134_v35 = vsel %vm988_vm2, %v7054_v47, 0 }
 0x406   : > { %v5889_v5 = vpop.eup %5888  ;;  %v7123_v49 = vadd.f32 %v1756_v18, %v1748_v14  ;;  %v1757_v21 = vmul.f32 %v5887_v50, %v7097_v39 }
 0x407   : > { %v5891_v48 = vpop.eup %5890  ;;  %5906 = vtanh.f32 %v7120_v61  ;;  %v7127_v54 = vadd.f32 %v1759_v4, %v1751_v28  ;;  %v1726_v34 = vadd.f32 1.0, %v5889_v5 }
 0x408   : > { %v5893_v2 = vpop.eup %5892  ;;  %5908 = vtanh.f32 %v7123_v49  ;;  %v7130_v62 = vadd.f32 %v1757_v21, %v1749_v42  ;;  %v1724_v33 = vadd.f32 1.0, %v5891_v48  ;;  %v7179_v48 = vld [vmem:[%s262_s16] sm:$0xff] }
 0x409   : > { %v5895_v40 = vpop.eup %5894  ;;  %5910 = vtanh.f32 %v7127_v54  ;;  %v1727_v39 = vadd.f32 1.0, %v5893_v2  ;;  %5220 = vmatpush3.bf16.xpose.msra.mxu0 %v7134_v35  ;;  %8009 = vst [vmem:[#allocation7_spill] sm:$0xff] %v7179_v48  ;;  %vm1303_vm3 = vcmp.gt.f32.partialorder %v7179_v48, 0.0 }
 0x40a   : > { %8008 = vst [vmem:[#allocation6_spill] sm:$0xff] %v7130_v62  ;;  %v5897_v45 = vpop.eup %5896  ;;  %5912 = vrcp.f32 %v1726_v34  ;;  %v1725_v56 = vadd.f32 1.0, %v5895_v40  ;;  %5277 = vmatprep.subr.bf16.mxu0 %v6850_v9  ;;  %v7181_v34 = vld [vmem:[%s262_s16 + $0x8] sm:$0xff] }
 0x40b   : > { %v5899_v60 = vpop.eup %5898  ;;  %5914 = vtanh.f32 %v7130_v62  ;;  %8010 = vst [vmem:[#allocation8_spill] sm:$0xff] %v7181_v34  ;;  %vm1304_vm4 = vcmp.gt.f32.partialorder %v7181_v34, 0.0 }
 0x40c   : > { %v5901_v1 = vpop.eup %5900  ;;  %5916 = vrcp.f32 %v1724_v33  ;;  %v7143_v51 = vmul.f32 %v5899_v60, %v7107_v52  ;;  %v7184_v33 = vld [vmem:[%s262_s16 + $0x10] sm:$0xff] }
 0x40d   : > { %v5903_v63 = vpop.eup %5902  ;;  %v7140_v11 = vmul.f32 %v5901_v1, %v5869_v55  ;;  %5918 = vrcp.f32 %v1727_v39  ;;  %8011 = vst [vmem:[#allocation9_spill] sm:$0xff] %v7184_v33  ;;  %vm1305_vm5 = vcmp.gt.f32.partialorder %v7184_v33, 0.0 }
 0x40e   : > { %v5905_v32 = vpop.eup %5904  ;;  %5920 = vrcp.f32 %v1725_v56  ;;  %v7145_v36 = vmul.f32 %v5903_v63, %v5879_v15  ;;  %v7189_v56 = vld [vmem:[%s262_s16 + $0x18] sm:$0xff] }
 0x40f   : > { %v7147_v19 = vmul.f32 %v5905_v32, %v5897_v45  ;;  %8012 = vst [vmem:[#allocation10_spill] sm:$0xff] %v7189_v56  ;;  %vm1306_vm6 = vcmp.gt.f32.partialorder %v7189_v56, 0.0  ;;  %v7197_v32 = vld [vmem:[%s262_s16 + $0x20] sm:$0xff] }
 0x410   : > { %v1784_v20 = vpack.c.bf16 %v7145_v36, %v7143_v51  ;;  %8013 = vst [vmem:[#allocation11_spill] sm:$0xff] %v7197_v32  ;;  %vm1307_vm7 = vcmp.gt.f32.partialorder %v7197_v32, 0.0 }
 0x411   : > { %v5907_v7 = vpop.eup %5906  ;;  %v1785_v14 = vpack.c.bf16 %v7140_v11, %v7147_v19 }
 0x412   : > { %v5909_v12 = vpop.eup %5908  ;;  %5221 = vmatprep.mubr.msk.bf16.mxu0 %vm988_vm2, %v1784_v20 }
 0x413   : > { %v5911_v55 = vpop.eup %5910  ;;  %5222 = vmatmul.mubr.msk.bf16.vlgmr.msra.gmra.mrb[52].mxu0 %vm988_vm2, %v1785_v14 }
 0x414   : > { %v5913_v25 = vpop.eup %5912  ;;  %5278 = vmatpush3.bf16.msra.mxu0 %v6850_v9 }
 0x415   : > { %v5915_v52 = vpop.eup %5914  ;;  %5279 = vmatprep.subr.bf16.mxu0 %v6862_v17  ;;  %v7166_v5 = vmul.f32 %v5913_v25, %v5907_v7  ;;  %v7201_v7 = vld [vmem:[%s262_s16 + $0x28] sm:$0xff] }
 0x416   : > { %v5917_v15 = vpop.eup %5916  ;;  %8014 = vst [vmem:[#allocation12_spill] sm:$0xff] %v7201_v7  ;;  %vm1308_vm8 = vcmp.gt.f32.partialorder %v7201_v7, 0.0 }
 0x417   : > { %v5919_v26 = vpop.eup %5918  ;;  %v7162_v28 = vmul.f32 %v5917_v15, %v5909_v12  ;;  %v7204_v12 = vld [vmem:[%s262_s16 + $0x30] sm:$0xff]  ;;  %v7209_v15 = vld [vmem:[%s262_s16 + $0x38] sm:$0xff]  ;;  %s6452_s16 = scalar_lea.vmem %s6451_s15, 2048 }
 0x418   : > { %v5921_v18 = vpop.eup %5920  ;;  %5280 = vmatpush3.bf16.msra.mxu0 %v6862_v17  ;;  %v7158_v50 = vmul.f32 %v5919_v26, %v5911_v55  ;;  %8015 = vst [vmem:[#allocation13_spill] sm:$0xff] %v7204_v12  ;;  %8016 = vst [vmem:[#allocation14_spill] sm:$0xff] %v7209_v15  ;;  %vm1309_vm9 = vcmp.gt.f32.partialorder %v7204_v12, 0.0  ;;  %vm1310_vm10 = vcmp.gt.f32.partialorder %v7209_v15, 0.0 }
 0x419   : > { %5599 = vmatprep.subr.msk.bf16.mxu0 %vm988_vm2, %v6986_v0  ;;  %v7164_v4 = vmul.f32 %v5921_v18, %v5915_v52 }
 0x41a   : > { %v1787_v21 = vpack.c.bf16 %v7158_v50, %v7166_v5 }
 0x41b   : > { %v1786_v42 = vpack.c.bf16 %v7164_v4, %v7162_v28 }
 0x41d   : > { %5225 = vmatprep.mubr.msk.bf16.mxu0 %vm988_vm2, %v1786_v42 }
 0x41e   : > { %5226 = vmatmul.mubr.msk.bf16.gmra.mrb[56].mxu0 %vm988_vm2, %v1787_v21 }
 0x4e6   : > { %v5223_v2 = vpop.f32.mrb[52].mxu0 }
 0x4e7   : > { %v1858_v40 = vpop.f32.mrb[53].mxu0  ;;  %v1891_v63 = vsel %vm1305_vm5, %v5223_v2, -1e+30 }
 0x4e8   : > { %v5224_v39 = vpop.f32.mrb[54].mxu0  ;;  %v1889_v45 = vsel %vm1303_vm3, %v1858_v40, -1e+30 }
 0x4e9   : > { %1897 = vmax.xlane.f32.xlu0 %v1889_v45  ;;  %v1861_v60 = vpop.f32.mrb[55].mxu0  ;;  %v1892_v20 = vsel %vm1306_vm6, %v5224_v39, -1e+30 }
 0x4ea   : > { %v1890_v1 = vsel %vm1304_vm4, %v1861_v60, -1e+30 }
 0x4eb   : > { %1899 = vmax.xlane.f32.xlu1 %v1890_v1 }
 0x4ed   : > { %1901 = vmax.xlane.f32.xlu0 %v1891_v63 }
 0x4ef   : > { %1903 = vmax.xlane.f32.xlu1 %v1892_v20 }
 0x4f1   : > { %v5227_v14 = vpop.f32.mrb[56].mxu0 }
 0x4f2   : > { %v1874_v55 = vpop.f32.mrb[57].mxu0  ;;  %v1895_v42 = vsel %vm1309_vm9, %v5227_v14, -1e+30 }
 0x4f3   : > { %v5228_v25 = vpop.f32.mrb[58].mxu0  ;;  %v1893_v52 = vsel %vm1307_vm7, %v1874_v55, -1e+30 }
 0x4f4   : > { %1905 = vmax.xlane.f32.xlu0 %v1893_v52  ;;  %v1877_v26 = vpop.f32.mrb[59].mxu0  ;;  %v1896_v21 = vsel %vm1310_vm10, %v5228_v25, -1e+30 }
 0x4f5   : > { %v1894_v18 = vsel %vm1308_vm8, %v1877_v26, -1e+30 }
 0x4f6   : > { %1907 = vmax.xlane.f32.xlu1 %v1894_v18 }
 0x4f8   : > { %1909 = vmax.xlane.f32.xlu0 %v1895_v42 }
 0x4fa   : > { %1911 = vmax.xlane.f32.xlu1 %v1896_v21 }
 0x576   : > { %v1898_v2 = vpop.xlane.xlu0 %1897 }
 0x577   : > { %v1913_v40 = vsub.f32 %v1889_v45, %v1898_v2 }
 0x578   : > { %v1900_v39 = vpop.xlane.xlu1 %1899 }
 0x579   : > { %v1921_v60 = vmul.f32 1.442695, %v1913_v40  ;;  %v1914_v55 = vsub.f32 %v1890_v1, %v1900_v39 }
 0x57a   : > { %v1902_v32 = vpop.xlane.xlu0 %1901 }
 0x57b   : > { %5922 = vpow2.f32 %v1921_v60  ;;  %v1923_v7 = vmul.f32 1.442695, %v1914_v55  ;;  %v1915_v26 = vsub.f32 %v1891_v63, %v1902_v32 }
 0x57c   : > { %v1904_v56 = vpop.xlane.xlu1 %1903 }
 0x57d   : > { %5924 = vpow2.f32 %v1923_v7  ;;  %v1925_v33 = vmul.f32 1.442695, %v1915_v26  ;;  %v1916_v34 = vsub.f32 %v1892_v20, %v1904_v56 }
 0x57f   : > { %5926 = vpow2.f32 %v1925_v33  ;;  %v1927_v14 = vmul.f32 1.442695, %v1916_v34 }
 0x581   : > { %5928 = vpow2.f32 %v1927_v14  ;;  %v1906_v12 = vpop.xlane.xlu0 %1905 }
 0x582   : > { %v1917_v15 = vsub.f32 %v1893_v52, %v1906_v12 }
 0x583   : > { %v1908_v25 = vpop.xlane.xlu1 %1907 }
 0x584   : > { %v1929_v48 = vmul.f32 1.442695, %v1917_v15  ;;  %v1918_v17 = vsub.f32 %v1894_v18, %v1908_v25 }
 0x585   : > { %v5923_v45 = vpop.eup %5922  ;;  %v1910_v2 = vpop.xlane.xlu0 %1909 }
 0x586   : > { %5930 = vpow2.f32 %v1929_v48  ;;  %v1931_v1 = vmul.f32 1.442695, %v1918_v17  ;;  %v1919_v40 = vsub.f32 %v1895_v42, %v1910_v2  ;;  %1937 = vadd.xlane.f32.xlu0 %v5923_v45 }
 0x587   : > { %v5925_v39 = vpop.eup %5924  ;;  %v1912_v63 = vpop.xlane.xlu1 %1911 }
 0x588   : > { %5932 = vpow2.f32 %v1931_v1  ;;  %v1933_v32 = vmul.f32 1.442695, %v1919_v40  ;;  %v1920_v7 = vsub.f32 %v1896_v21, %v1912_v63  ;;  %1939 = vadd.xlane.f32.xlu1 %v5925_v39 }
 0x589   : > { %v5927_v33 = vpop.eup %5926 }
 0x58a   : > { %5934 = vpow2.f32 %v1933_v32  ;;  %v1935_v34 = vmul.f32 1.442695, %v1920_v7  ;;  %1941 = vadd.xlane.f32.xlu0 %v5927_v33 }
 0x58b   : > { %v5929_v56 = vpop.eup %5928 }
 0x58c   : > { %5936 = vpow2.f32 %v1935_v34  ;;  %1943 = vadd.xlane.f32.xlu1 %v5929_v56 }
 0x590   : > { %v5931_v20 = vpop.eup %5930 }
 0x591   : > { %1945 = vadd.xlane.f32.xlu0 %v5931_v20 }
 0x592   : > { %v5933_v12 = vpop.eup %5932 }
 0x593   : > { %1947 = vadd.xlane.f32.xlu1 %v5933_v12 }
 0x594   : > { %v5935_v17 = vpop.eup %5934 }
 0x595   : > { %1949 = vadd.xlane.f32.xlu0 %v5935_v17 }
 0x596   : > { %v5937_v48 = vpop.eup %5936 }
 0x597   : > { %1951 = vadd.xlane.f32.xlu1 %v5937_v48 }
 0x613   : > { %v1938_v52 = vpop.xlane.xlu0 %1937 }
 0x614   : > { %v1953_v15 = vmax.f32 %v1938_v52, 1e-30 }
 0x615   : > { %v1940_v18 = vpop.xlane.xlu1 %1939 }
 0x616   : > { %5938 = vrcp.f32 %v1953_v15  ;;  %v1954_v42 = vmax.f32 %v1940_v18, 1e-30 }
 0x617   : > { %v1942_v21 = vpop.xlane.xlu0 %1941 }
 0x618   : > { %5940 = vrcp.f32 %v1954_v42  ;;  %v1955_v60 = vmax.f32 %v1942_v21, 1e-30 }
 0x619   : > { %v1944_v55 = vpop.xlane.xlu1 %1943 }
 0x61a   : > { %5942 = vrcp.f32 %v1955_v60  ;;  %v1956_v26 = vmax.f32 %v1944_v55, 1e-30 }
 0x61c   : > { %5944 = vrcp.f32 %v1956_v26 }
 0x61e   : > { %v1946_v14 = vpop.xlane.xlu0 %1945 }
 0x61f   : > { %v1957_v25 = vmax.f32 %v1946_v14, 1e-30 }
 0x620   : > { %v5939_v2 = vpop.eup %5938  ;;  %v1948_v1 = vpop.xlane.xlu1 %1947 }
 0x621   : > { %5946 = vrcp.f32 %v1957_v25  ;;  %v1958_v40 = vmax.f32 %v1948_v1, 1e-30  ;;  %v1969_v34 = vmul.f32 %v5939_v2, %v5923_v45 }
 0x622   : > { %v5941_v63 = vpop.eup %5940  ;;  %v1950_v32 = vpop.xlane.xlu0 %1949 }
 0x623   : > { %5948 = vrcp.f32 %v1958_v40  ;;  %v1959_v7 = vmax.f32 %v1950_v32, 1e-30  ;;  %v1970_v52 = vmul.f32 %v5941_v63, %v5925_v39 }
 0x624   : > { %v5943_v15 = vpop.eup %5942  ;;  %v1952_v18 = vpop.xlane.xlu1 %1951 }
 0x625   : > { %5950 = vrcp.f32 %v1959_v7  ;;  %v1960_v42 = vmax.f32 %v1952_v18, 1e-30  ;;  %v1977_v21 = vpack.c.bf16 %v1970_v52, %v1969_v34  ;;  %v1971_v55 = vmul.f32 %v5943_v15, %v5927_v33 }
 0x626   : > { %v5945_v60 = vpop.eup %5944 }
 0x627   : > { %v1972_v26 = vmul.f32 %v5945_v60, %v5929_v56  ;;  %5952 = vrcp.f32 %v1960_v42  ;;  %5245 = vmatprep.mubr.bf16.mxu1 %v1977_v21 }
 0x629   : > { %v1978_v14 = vpack.c.bf16 %v1972_v26, %v1971_v55 }
 0x62b   : > { %v5947_v62 = vpop.eup %5946  ;;  %5246 = vmatmul.mubr.bf16.vlgmr.msra.gmra.mrb[44].mxu1 %v1978_v14 }
 0x62c   : > { %5254 = vmatpush3.bf16.msra.mxu1 %v6782_v6  ;;  %v1973_v45 = vmul.f32 %v5947_v62, %v5931_v20 }
 0x62d   : > { %v5949_v25 = vpop.eup %5948  ;;  %5255 = vmatprep.subr.bf16.mxu1 %v6815_v27 }
 0x62e   : > { %v1974_v39 = vmul.f32 %v5949_v25, %v5933_v12 }
 0x62f   : > { %v5951_v2 = vpop.eup %5950 }
 0x630   : > { %v1979_v1 = vpack.c.bf16 %v1974_v39, %v1973_v45  ;;  %5256 = vmatpush3.bf16.msra.mxu1 %v6815_v27  ;;  %v1975_v33 = vmul.f32 %v5951_v2, %v5935_v17 }
 0x631   : > { %v5953_v40 = vpop.eup %5952  ;;  %5265 = vmatprep.subr.bf16.mxu1 %v6825_v44 }
 0x632   : > { %5249 = vmatprep.mubr.bf16.mxu1 %v1979_v1  ;;  %v1976_v56 = vmul.f32 %v5953_v40, %v5937_v48 }
 0x634   : > { %v1980_v63 = vpack.c.bf16 %v1976_v56, %v1975_v33 }
 0x636   : > { %5250 = vmatmul.mubr.bf16.gmra.mrb[48].mxu1 %v1980_v63 }
 0x6fe   : > { %v5247_v32 = vpop.f32.mrb[44].mxu1 }
 0x6ff   : > { %v2015_v7 = vpop.f32.mrb[45].mxu1 }
 0x700   : > { %v5248_v34 = vpop.f32.mrb[46].mxu1 }
 0x701   : > { %v5671_v52 = vpack.i.bf16 %v5248_v34, %v5247_v32  ;;  %v2018_v15 = vpop.f32.mrb[47].mxu1 }
 0x702   : > { %v5666_v18 = vpack.i.bf16 %v2018_v15, %v2015_v7 }
 0x703   : > { %5672 = vrot.lane.b32.xlu1 %v5671_v52, %s6511_s9 }
 0x704   : > { %5667 = vrot.lane.b32.xlu0 %v5666_v18, %s6511_s9 }
 0x709   : > { %v5251_v62 = vpop.f32.mrb[48].mxu1 }
 0x70a   : > { %v2031_v20 = vpop.f32.mrb[49].mxu1 }
 0x70b   : > { %v5252_v12 = vpop.f32.mrb[50].mxu1 }
 0x70c   : > { %v5681_v42 = vpack.i.bf16 %v5252_v12, %v5251_v62  ;;  %v2034_v21 = vpop.f32.mrb[51].mxu1 }
 0x70d   : > { %v5676_v17 = vpack.i.bf16 %v2034_v21, %v2031_v20 }
 0x70f   : > { %5677 = vrot.lane.b32.xlu1 %v5676_v17, %s6511_s9 }
 0x713   : > { %5682 = vrot.lane.b32.xlu1 %v5681_v42, %s6511_s9 }
 0x775   : > { %v5673_v48 = vpop.permute.xlu1 %5672 }
 0x776   : > { %v5675_v60 = vunpack.i.h.bf16 %v5673_v48  ;;  %v5674_v55 = vunpack.i.l.bf16 %v5673_v48  ;;  %v5668_v26 = vpop.permute.xlu0 %5667 }
 0x777   : > { %v5670_v14 = vunpack.i.h.bf16 %v5668_v26  ;;  %v5669_v25 = vunpack.i.l.bf16 %v5668_v26 }
 0x778   : > { %v2081_v45 = vsel %vm988_vm2, %v7140_v11, %v5675_v60  ;;  %v2080_v39 = vsel %vm988_vm2, %v7147_v19, %v5674_v55 }
 0x779   : > { %v2079_v2 = vsel %vm988_vm2, %v7145_v36, %v5670_v14  ;;  %v2078_v1 = vsel %vm988_vm2, %v7143_v51, %v5669_v25  ;;  %v2087_v33 = vpack.c.bf16 %v2081_v45, %v2080_v39  ;;  %v7318_v39 = vld [vmem:[%s7974_s3 + $0xb0] ss:$0 sm:$0xff] }
 0x77a   : > { %v2086_v40 = vpack.c.bf16 %v2079_v2, %v2078_v1 }
 0x77c   : > { %5257 = vmatprep.mubr.msk.bf16.mxu1 %vm1316_vm11, %v2086_v40  ;;  %5281 = vmatprep.mubr.msk.bf16.mxu0 %vm1316_vm11, %v2086_v40 }
 0x77d   : > { %5258 = vmatmul.mubr.msk.bf16.vlgmr.msra.gmra.mrb[52].mxu1 %vm1316_vm11, %v2087_v33  ;;  %5282 = vmatmul.mubr.msk.bf16.vlgmr.msra.gmra.mrb[60].mxu0 %vm1316_vm11, %v2087_v33 }
 0x77e   : > { %5302 = vmatpush3.bf16.xpose.msra.mxu0 %v6995_v16  ;;  %5266 = vmatpush3.bf16.msra.mxu1 %v6825_v44 }
 0x77f   : > { %5600 = vmatprep.subr.msk.bf16.mxu0 %vm988_vm2, %v6984_v57  ;;  %5267 = vmatprep.subr.bf16.mxu1 %v6838_v3 }
 0x781   : > { %v5678_v11 = vpop.permute.xlu1 %5677 }
 0x782   : > { %v5680_v51 = vunpack.i.h.bf16 %v5678_v11  ;;  %v5679_v36 = vunpack.i.l.bf16 %v5678_v11  ;;  %5268 = vmatpush3.bf16.msra.mxu1 %v6838_v3 }
 0x783   : > { %5289 = vmatprep.subr.bf16.mxu1 %v6885_v41 }
 0x784   : > { %v2083_v19 = vsel %vm988_vm2, %v7164_v4, %v5680_v51  ;;  %v2082_v56 = vsel %vm988_vm2, %v7162_v28, %v5679_v36 }
 0x785   : > { %v2088_v63 = vpack.c.bf16 %v2083_v19, %v2082_v56  ;;  %v5683_v32 = vpop.permute.xlu1 %5682 }
 0x786   : > { %v5685_v7 = vunpack.i.h.bf16 %v5683_v32  ;;  %v5684_v34 = vunpack.i.l.bf16 %v5683_v32  ;;  %5304 = vmatpush3.bf16.xpose.msra.mxu0 %v7020_v10 }
 0x787   : > { %5261 = vmatprep.mubr.msk.bf16.mxu1 %vm1316_vm11, %v2088_v63  ;;  %5285 = vmatprep.mubr.msk.bf16.mxu0 %vm1316_vm11, %v2088_v63 }
 0x788   : > { %v2085_v52 = vsel %vm988_vm2, %v7158_v50, %v5685_v7  ;;  %v2084_v15 = vsel %vm988_vm2, %v7166_v5, %v5684_v34  ;;  %5601 = vmatprep.subr.msk.bf16.mxu0 %vm988_vm2, %v7009_v24  ;;  %v7309_v5 = vld [vmem:[%s7974_s3 + $0x60] ss:$0 sm:$0xff] }
 0x789   : > { %v2089_v28 = vpack.c.bf16 %v2085_v52, %v2084_v15 }
 0x78b   : > { %5262 = vmatmul.mubr.msk.bf16.gmra.mrb[56].mxu1 %vm1316_vm11, %v2089_v28  ;;  %5286 = vmatmul.mubr.msk.bf16.gmra.mrb[64].mxu0 %vm1316_vm11, %v2089_v28 }
 0x78c   : > { %5269 = vmatprep.mubr.msk.bf16.mxu1 %vm1316_vm11, %v2086_v40 }
 0x78e   : > { %5306 = vmatpush3.bf16.xpose.msra.mxu0 %v7039_v58 }
 0x78f   : > { %5602 = vmatprep.subr.msk.bf16.mxu0 %vm988_vm2, %v7006_v22 }
 0x793   : > { %5270 = vmatmul.mubr.msk.bf16.vlgmr.msra.gmra.mrb[60].mxu1 %vm1316_vm11, %v2087_v33 }
 0x794   : > { %5290 = vmatpush3.bf16.msra.mxu1 %v6885_v41  ;;  %5273 = vmatprep.mubr.msk.bf16.mxu1 %vm1316_vm11, %v2088_v63 }
 0x795   : > { %5291 = vmatprep.subr.bf16.mxu1 %v6912_v8 }
 0x796   : > { %5308 = vmatpush3.bf16.xpose.msra.mxu0 %v7066_v29 }
 0x797   : > { %5603 = vmatprep.subr.msk.bf16.mxu0 %vm988_vm2, %v7032_v53 }
 0x798   : > { %5292 = vmatpush3.bf16.msra.mxu1 %v6912_v8 }
 0x799   : > { %5325 = vmatprep.subr.bf16.mxu1 %v6986_v0 }
 0x79b   : > { %5274 = vmatmul.mubr.msk.bf16.gmra.mrb[64].mxu1 %vm1316_vm11, %v2089_v28 }
 0x79c   : > { %5293 = vmatprep.mubr.msk.bf16.mxu1 %vm1316_vm11, %v2086_v40 }
 0x79e   : > { %5310 = vmatpush3.bf16.xpose.msra.mxu0 %v7086_v59 }
 0x79f   : > { %5604 = vmatprep.subr.msk.bf16.mxu0 %vm988_vm2, %v7029_v38 }
 0x7a3   : > { %5294 = vmatmul.mubr.msk.bf16.vlgmr.msra.gmra.mrb[68].mxu1 %vm1316_vm11, %v2087_v33 }
 0x7a4   : > { %5326 = vmatpush3.bf16.msra.mxu1 %v6986_v0  ;;  %5297 = vmatprep.mubr.msk.bf16.mxu1 %vm1316_vm11, %v2088_v63 }
 0x7a5   : > { %5327 = vmatprep.subr.bf16.mxu1 %v6984_v57 }
 0x7a6   : > { %5312 = vmatpush3.bf16.xpose.msra.mxu0 %v7102_v31 }
 0x7a7   : > { %5605 = vmatprep.subr.msk.bf16.mxu0 %vm988_vm2, %v7059_v23 }
 0x7a8   : > { %5328 = vmatpush3.bf16.msra.mxu1 %v6984_v57 }
 0x7a9   : > { %5329 = vmatprep.subr.bf16.mxu1 %v7009_v24 }
 0x7ab   : > { %5298 = vmatmul.mubr.msk.bf16.gmra.mrb[72].mxu1 %vm1316_vm11, %v2089_v28 }
 0x7ac   : > { %5330 = vmatpush3.bf16.msra.mxu1 %v7009_v24 }
 0x7ad   : > { %5331 = vmatprep.subr.bf16.mxu1 %v7006_v22 }
 0x7ae   : > { %5314 = vmatpush3.bf16.xpose.msra.mxu0 %v7111_v13 }
 0x7af   : > { %5606 = vmatprep.subr.msk.bf16.mxu0 %vm988_vm2, %v7054_v47 }
 0x7b0   : > { %5332 = vmatpush3.bf16.msra.mxu1 %v7006_v22 }
 0x7b1   : > { %5333 = vmatprep.subr.bf16.mxu1 %v7032_v53 }
 0x7b4   : > { %5334 = vmatpush3.bf16.msra.mxu1 %v7032_v53 }
 0x7b5   : > { %5335 = vmatprep.subr.bf16.mxu1 %v7029_v38 }
 0x7b6   : > { %5316 = vmatpush3.bf16.xpose.msra.mxu0 %v7134_v35 }
 0x7b7   : > { %5373 = vmatprep.subr.bf16.mxu0 %v6850_v9 }
 0x7b8   : > { %5336 = vmatpush3.bf16.msra.mxu1 %v7029_v38 }
 0x7b9   : > { %5337 = vmatprep.subr.bf16.mxu1 %v7059_v23 }
 0x7bc   : > { %5338 = vmatpush3.bf16.msra.mxu1 %v7059_v23 }
 0x7bd   : > { %5339 = vmatprep.subr.bf16.mxu1 %v7054_v47 }
 0x7c0   : > { %5340 = vmatpush3.bf16.msra.mxu1 %v7054_v47 }
 0x7c1   : > { %5349 = vmatprep.subr.bf16.mxu1 %v6782_v6 }
 0x850   : > { %v5259_v50 = vpop.f32.mrb[52].mxu1  ;;  %v5283_v4 = vpop.f32.mrb[60].mxu0 }
 0x851   : > { %v2145_v18 = vadd.f32 %v7309_v5, %v5259_v50  ;;  %v2136_v62 = vpop.f32.mrb[53].mxu1  ;;  %v2266_v20 = vpop.f32.mrb[61].mxu0  ;;  %v2275_v2 = vadd.f32 %v7318_v39, %v5283_v4 }
 0x852   : > { %v2137_v12 = vadd.f32 %v7309_v5, %v2136_v62  ;;  %v5260_v42 = vpop.f32.mrb[54].mxu1  ;;  %v5284_v21 = vpop.f32.mrb[62].mxu0  ;;  %v2267_v1 = vadd.f32 %v7318_v39, %v2266_v20 }
 0x853   : > { %v4627_v17 = vmul.f32 -1.442695, %v2145_v18  ;;  %v2148_v48 = vadd.f32 %v7309_v5, %v5260_v42  ;;  %v2139_v60 = vpop.f32.mrb[55].mxu1  ;;  %v2269_v55 = vpop.f32.mrb[63].mxu0  ;;  %v2278_v40 = vadd.f32 %v7318_v39, %v5284_v21 }
 0x854   : > { %v4625_v26 = vmul.f32 -1.442695, %v2137_v12  ;;  %v2140_v14 = vadd.f32 %v7309_v5, %v2139_v60  ;;  %v2270_v33 = vadd.f32 %v7318_v39, %v2269_v55 }
 0x855   : > { %5954 = vpow2.f32 %v4627_v17  ;;  %v4628_v25 = vmul.f32 -1.442695, %v2148_v48 }
 0x856   : > { %5956 = vpow2.f32 %v4625_v26  ;;  %v4626_v45 = vmul.f32 -1.442695, %v2140_v14 }
 0x857   : > { %5958 = vpow2.f32 %v4628_v25 }
 0x858   : > { %5960 = vpow2.f32 %v4626_v45  ;;  %v6436_v45 = vld [vmem:[%s7974_s3 + $0x88] ss:$0 sm:$0xff] }
 0x859   : > { %5962 = vtanh.f32 %v2275_v2 }
 0x85a   : > { %5964 = vtanh.f32 %v2267_v1 }
 0x85b   : > { %5966 = vtanh.f32 %v2278_v40 }
 0x85c   : > { %5968 = vtanh.f32 %v2270_v33 }
 0x85e   : > { %v5263_v11 = vpop.f32.mrb[56].mxu1  ;;  %v5287_v51 = vpop.f32.mrb[64].mxu0 }
 0x85f   : > { %v5955_v36 = vpop.eup %5954  ;;  %v2161_v19 = vadd.f32 %v7309_v5, %v5263_v11  ;;  %v2152_v56 = vpop.f32.mrb[57].mxu1  ;;  %v2291_v60 = vadd.f32 %v7318_v39, %v5287_v51 }
 0x860   : > { %v2282_v63 = vpop.f32.mrb[65].mxu0  ;;  %v5957_v32 = vpop.eup %5956  ;;  %v2388_v7 = vadd.f32 1.0, %v5955_v36  ;;  %v2153_v34 = vadd.f32 %v7309_v5, %v2152_v56 }
 0x861   : > { %v5264_v52 = vpop.f32.mrb[58].mxu1  ;;  %v5288_v15 = vpop.f32.mrb[66].mxu0  ;;  %v2386_v50 = vadd.f32 1.0, %v5957_v32  ;;  %v4631_v4 = vmul.f32 -1.442695, %v2161_v19  ;;  %v2283_v26 = vadd.f32 %v7318_v39, %v2282_v63 }
 0x862   : > { %v5959_v28 = vpop.eup %5958  ;;  %v2164_v18 = vadd.f32 %v7309_v5, %v5264_v52  ;;  %v2155_v62 = vpop.f32.mrb[59].mxu1  ;;  %5970 = vrcp.f32 %v2388_v7  ;;  %v4629_v21 = vmul.f32 -1.442695, %v2153_v34  ;;  %v2294_v33 = vadd.f32 %v7318_v39, %v5288_v15 }
 0x863   : > { %v2285_v20 = vpop.f32.mrb[67].mxu0  ;;  %v2389_v12 = vadd.f32 1.0, %v5959_v28  ;;  %v5961_v42 = vpop.eup %5960  ;;  %5972 = vrcp.f32 %v2386_v50  ;;  %v2156_v17 = vadd.f32 %v7309_v5, %v2155_v62 }
 0x864   : > { %v2387_v48 = vadd.f32 1.0, %v5961_v42  ;;  %v4632_v55 = vmul.f32 -1.442695, %v2164_v18  ;;  %v5963_v40 = vpop.eup %5962  ;;  %v2286_v15 = vadd.f32 %v7318_v39, %v2285_v20 }
 0x865   : > { %5974 = vrcp.f32 %v2389_v12  ;;  %v4630_v25 = vmul.f32 -1.442695, %v2156_v17  ;;  %v5965_v36 = vpop.eup %5964 }
 0x866   : > { %5976 = vpow2.f32 %v4631_v4  ;;  %v5271_v14 = vpop.f32.mrb[60].mxu1  ;;  %v5967_v32 = vpop.eup %5966 }
 0x867   : > { %5978 = vrcp.f32 %v2387_v48  ;;  %v2210_v2 = vadd.f32 %v6436_v45, %v5271_v14  ;;  %v2201_v1 = vpop.f32.mrb[61].mxu1  ;;  %v5969_v52 = vpop.eup %5968 }
 0x868   : > { %5980 = vpow2.f32 %v4629_v21  ;;  %v2202_v11 = vadd.f32 %v6436_v45, %v2201_v1  ;;  %v5272_v51 = vpop.f32.mrb[62].mxu1 }
 0x869   : > { %5982 = vtanh.f32 %v2291_v60  ;;  %v4635_v19 = vmul.f32 -1.442695, %v2210_v2  ;;  %v2213_v56 = vadd.f32 %v6436_v45, %v5272_v51  ;;  %v2204_v63 = vpop.f32.mrb[63].mxu1 }
 0x86a   : > { %5984 = vpow2.f32 %v4632_v55  ;;  %v4633_v7 = vmul.f32 -1.442695, %v2202_v11  ;;  %v2205_v34 = vadd.f32 %v6436_v45, %v2204_v63 }
 0x86b   : > { %5986 = vtanh.f32 %v2283_v26  ;;  %v4636_v28 = vmul.f32 -1.442695, %v2213_v56 }
 0x86c   : > { %5988 = vpow2.f32 %v4630_v25  ;;  %v5971_v50 = vpop.eup %5970  ;;  %v4634_v4 = vmul.f32 -1.442695, %v2205_v34 }
 0x86d   : > { %5990 = vtanh.f32 %v2294_v33  ;;  %v5973_v18 = vpop.eup %5972  ;;  %v7334_v62 = vmul.f32 %v5971_v50, %v5963_v40 }
 0x86e   : > { %5992 = vpow2.f32 %v4635_v19  ;;  %v7337_v42 = vmul.f32 %v5973_v18, %v5965_v36  ;;  %v5275_v21 = vpop.f32.mrb[64].mxu1 }
 0x86f   : > { %v5975_v12 = vpop.eup %5974  ;;  %5994 = vpow2.f32 %v4633_v7  ;;  %v2226_v60 = vadd.f32 %v6436_v45, %v5275_v21  ;;  %v2217_v55 = vpop.f32.mrb[65].mxu1 }
 0x870   : > { %v5977_v17 = vpop.eup %5976  ;;  %v7339_v48 = vmul.f32 %v5975_v12, %v5967_v32  ;;  %5996 = vpow2.f32 %v4636_v28  ;;  %v2218_v25 = vadd.f32 %v6436_v45, %v2217_v55  ;;  %v5276_v2 = vpop.f32.mrb[66].mxu1  ;;  %v7346_v12 = vld [vmem:[%s7974_s3 + $0xd8] ss:$0 sm:$0xff] }
 0x871   : > { %v5979_v26 = vpop.eup %5978  ;;  %v2392_v14 = vadd.f32 1.0, %v5977_v17  ;;  %5998 = vpow2.f32 %v4634_v4  ;;  %v4639_v20 = vmul.f32 -1.442695, %v2226_v60  ;;  %v2229_v33 = vadd.f32 %v6436_v45, %v5276_v2  ;;  %v2220_v11 = vpop.f32.mrb[67].mxu1 }
 0x872   : > { %v5981_v1 = vpop.eup %5980  ;;  %v7341_v40 = vmul.f32 %v5979_v26, %v5969_v52  ;;  %6000 = vtanh.f32 %v2286_v15  ;;  %v4637_v19 = vmul.f32 -1.442695, %v2218_v25  ;;  %v2221_v56 = vadd.f32 %v6436_v45, %v2220_v11 }
 0x873   : > { %v5983_v51 = vpop.eup %5982  ;;  %6002 = vrcp.f32 %v2392_v14  ;;  %v2390_v36 = vadd.f32 1.0, %v5981_v1  ;;  %v4640_v32 = vmul.f32 -1.442695, %v2229_v33 }
 0x874   : > { %v5985_v63 = vpop.eup %5984  ;;  %6004 = vpow2.f32 %v4639_v20  ;;  %v4638_v50 = vmul.f32 -1.442695, %v2221_v56 }
 0x875   : > { %v5987_v7 = vpop.eup %5986  ;;  %6006 = vrcp.f32 %v2390_v36  ;;  %v2393_v34 = vadd.f32 1.0, %v5985_v63 }
 0x876   : > { %v5989_v28 = vpop.eup %5988  ;;  %6008 = vpow2.f32 %v4637_v19  ;;  %v5295_v18 = vpop.f32.mrb[68].mxu1 }
 0x877   : > { %v5991_v52 = vpop.eup %5990  ;;  %6010 = vrcp.f32 %v2393_v34  ;;  %v2391_v4 = vadd.f32 1.0, %v5989_v28  ;;  %v2340_v45 = vadd.f32 %v7346_v12, %v5295_v18  ;;  %v2331_v21 = vpop.f32.mrb[69].mxu1 }
 0x878   : > { %v5993_v15 = vpop.eup %5992  ;;  %6012 = vpow2.f32 %v4640_v32  ;;  %v2332_v55 = vadd.f32 %v7346_v12, %v2331_v21  ;;  %v5296_v26 = vpop.f32.mrb[70].mxu1 }
 0x879   : > { %v5995_v17 = vpop.eup %5994  ;;  %6014 = vrcp.f32 %v2391_v4  ;;  %v2436_v60 = vadd.f32 1.0, %v5993_v15  ;;  %v2343_v2 = vadd.f32 %v7346_v12, %v5296_v26  ;;  %v2334_v1 = vpop.f32.mrb[71].mxu1  ;;  %v4643_v11 = vmul.f32 -1.442695, %v2340_v45 }
 0x87a   : > { %v5997_v14 = vpop.eup %5996  ;;  %v2434_v25 = vadd.f32 1.0, %v5995_v17  ;;  %6016 = vpow2.f32 %v4638_v50  ;;  %v4641_v56 = vmul.f32 -1.442695, %v2332_v55  ;;  %v2335_v63 = vadd.f32 %v7346_v12, %v2334_v1 }
 0x87b   : > { %v5999_v20 = vpop.eup %5998  ;;  %6018 = vrcp.f32 %v2436_v60  ;;  %v2437_v33 = vadd.f32 1.0, %v5997_v14  ;;  %v4644_v4 = vmul.f32 -1.442695, %v2343_v2 }
 0x87c   : > { %v6001_v36 = vpop.eup %6000  ;;  %6020 = vrcp.f32 %v2434_v25  ;;  %v2435_v19 = vadd.f32 1.0, %v5999_v20  ;;  %v4642_v45 = vmul.f32 -1.442695, %v2335_v63 }
 0x87d   : > { %v6003_v32 = vpop.eup %6002  ;;  %6022 = vrcp.f32 %v2437_v33 }
 0x87e   : > { %v6005_v34 = vpop.eup %6004  ;;  %v2528_v28 = vmul.f32 %v6003_v32, %v5983_v51  ;;  %6024 = vrcp.f32 %v2435_v19  ;;  %v5299_v15 = vpop.f32.mrb[72].mxu1 }
 0x87f   : > { %v6007_v50 = vpop.eup %6006  ;;  %v2440_v18 = vadd.f32 1.0, %v6005_v34  ;;  %6026 = vpow2.f32 %v4643_v11  ;;  %v2347_v60 = vpop.f32.mrb[73].mxu1 }
 0x880   : > { %v6009_v21 = vpop.eup %6008  ;;  %v2526_v17 = vmul.f32 %v6007_v50, %v5987_v7  ;;  %6028 = vpow2.f32 %v4641_v56  ;;  %v5300_v14 = vpop.f32.mrb[74].mxu1  ;;  %v2348_v51 = vadd.f32 %v7346_v12, %v2347_v60 }
 0x881   : > { %v6011_v26 = vpop.eup %6010  ;;  %6030 = vrcp.f32 %v2440_v18  ;;  %v2438_v55 = vadd.f32 1.0, %v6009_v21  ;;  %v2350_v20 = vpop.f32.mrb[75].mxu1  ;;  %v2359_v11 = vadd.f32 %v7346_v12, %v5300_v14 }
 0x882   : > { %v6013_v25 = vpop.eup %6012  ;;  %v2529_v1 = vmul.f32 %v6011_v26, %v5991_v52  ;;  %6032 = vpow2.f32 %v4644_v4  ;;  %v4645_v50 = vmul.f32 -1.442695, %v2348_v51 }
 0x883   : > { %v6015_v2 = vpop.eup %6014  ;;  %6034 = vrcp.f32 %v2438_v55  ;;  %v2441_v33 = vadd.f32 1.0, %v6013_v25  ;;  %v4648_v18 = vmul.f32 -1.442695, %v2359_v11 }
 0x884   : > { %v6017_v19 = vpop.eup %6016  ;;  %v2527_v7 = vmul.f32 %v6015_v2, %v6001_v36  ;;  %6036 = vpow2.f32 %v4642_v45 }
 0x885   : > { %v6019_v56 = vpop.eup %6018  ;;  %6038 = vrcp.f32 %v2441_v33  ;;  %v2439_v63 = vadd.f32 1.0, %v6017_v19 }
 0x886   : > { %v6021_v32 = vpop.eup %6020  ;;  %v2516_v34 = vmul.f32 %v6019_v56, %v6965_v30 }
 0x887   : > { %v6023_v52 = vpop.eup %6022  ;;  %v2514_v4 = vmul.f32 %v6021_v32, %v6967_v37  ;;  %6040 = vrcp.f32 %v2439_v63 }
 0x888   : > { %v6025_v21 = vpop.eup %6024  ;;  %v7357_v60 = vadd.f32 %v7334_v62, %v2516_v34  ;;  %v2517_v26 = vmul.f32 %v6023_v52, %v6969_v43  ;;  %6042 = vpow2.f32 %v4645_v50  ;;  %v2351_v34 = vadd.f32 %v7346_v12, %v2350_v20 }
 0x889   : > { %v6027_v36 = vpop.eup %6026  ;;  %v7361_v45 = vadd.f32 %v7337_v42, %v2514_v4  ;;  %v2515_v55 = vmul.f32 %v6025_v21, %v6971_v46  ;;  %6044 = vpow2.f32 %v4648_v18  ;;  %v2356_v42 = vadd.f32 %v7346_v12, %v5299_v15 }
 0x88a   : > { %v6029_v14 = vpop.eup %6028  ;;  %v7365_v30 = vadd.f32 %v7339_v48, %v2517_v26  ;;  %6046 = vtanh.f32 %v7357_v60  ;;  %v2492_v11 = vadd.f32 1.0, %v6027_v36  ;;  %v4646_v18 = vmul.f32 -1.442695, %v2351_v34 }
 0x88b   : > { %v6031_v37 = vpop.eup %6030  ;;  %v7368_v25 = vadd.f32 %v7341_v40, %v2515_v55  ;;  %v2490_v51 = vadd.f32 1.0, %v6029_v14  ;;  %6048 = vtanh.f32 %v7361_v45  ;;  %v4647_v63 = vmul.f32 -1.442695, %v2356_v42 }
 0x88c   : > { %v6033_v62 = vpop.eup %6032  ;;  %v2520_v43 = vmul.f32 %v6031_v37, %v7120_v61  ;;  %6050 = vtanh.f32 %v7365_v30 }
 0x88d   : > { %v6035_v2 = vpop.eup %6034  ;;  %v2493_v46 = vadd.f32 1.0, %v6033_v62  ;;  %6052 = vtanh.f32 %v7368_v25 }
 0x88e   : > { %v6037_v48 = vpop.eup %6036  ;;  %v7375_v33 = vadd.f32 %v2528_v28, %v2520_v43  ;;  %v2518_v40 = vmul.f32 %v6035_v2, %v7123_v49  ;;  %6054 = vrcp.f32 %v2490_v51  ;;  %v8020_v28 = vld [vmem:[#allocation6_spill] sm:$0xff] }
 0x88f   : > { %v6039_v19 = vpop.eup %6038  ;;  %v2491_v56 = vadd.f32 1.0, %v6037_v48  ;;  %6056 = vrcp.f32 %v2493_v46 }
 0x890   : > { %8017 = vst [vmem:[#allocation15_spill] sm:$0xff] %v7375_v33  ;;  %v7379_v61 = vadd.f32 %v2526_v17, %v2518_v40  ;;  %v2521_v15 = vmul.f32 %v6039_v19, %v7127_v54  ;;  %6058 = vrcp.f32 %v2492_v11 }
 0x891   : > { %v6041_v32 = vpop.eup %6040  ;;  %6060 = vrcp.f32 %v2491_v56  ;;  %v8022_v56 = vld [vmem:[#allocation5_spill] sm:$0xff] }
 0x892   : > { %8018 = vst [vmem:[#allocation16_spill] sm:$0xff] %v7379_v61  ;;  %v7383_v50 = vadd.f32 %v2529_v1, %v2521_v15  ;;  %v2519_v52 = vmul.f32 %v6041_v32, %v8020_v28  ;;  %v6043_v49 = vpop.eup %6042  ;;  %6062 = vpow2.f32 %v4647_v63 }
 0x893   : > { %v6045_v17 = vpop.eup %6044  ;;  %6064 = vpow2.f32 %v4646_v18  ;;  %v2494_v2 = vadd.f32 1.0, %v6043_v49 }
 0x894   : > { %8019 = vst [vmem:[#allocation17_spill] sm:$0xff] %v7383_v50  ;;  %v7386_v4 = vadd.f32 %v2527_v7, %v2519_v52  ;;  %v6047_v21 = vpop.eup %6046  ;;  %6066 = vtanh.f32 %v7375_v33  ;;  %v2497_v42 = vadd.f32 1.0, %v6045_v17 }
 0x895   : > { %v6049_v54 = vpop.eup %6048  ;;  %6068 = vtanh.f32 %v7379_v61 }
 0x896   : > { %8021 = vst [vmem:[#allocation6_spill] sm:$0xff] %v7386_v4  ;;  %v6051_v26 = vpop.eup %6050  ;;  %6070 = vtanh.f32 %v7383_v50 }
 0x897   : > { %v6053_v36 = vpop.eup %6052  ;;  %6072 = vtanh.f32 %v7386_v4 }
 0x898   : > { %v6055_v55 = vpop.eup %6054  ;;  %6074 = vrcp.f32 %v2497_v42 }
 0x899   : > { %v6057_v14 = vpop.eup %6056  ;;  %v7390_v43 = vmul.f32 %v6055_v55, %v6049_v54  ;;  %6076 = vrcp.f32 %v2494_v2 }
 0x89a   : > { %v6059_v20 = vpop.eup %6058  ;;  %v7388_v37 = vmul.f32 %v6057_v14, %v6051_v26 }
 0x89b   : > { %v6061_v1 = vpop.eup %6060  ;;  %v7395_v7 = vmul.f32 %v6059_v20, %v6047_v21 }
 0x89c   : > { %v6063_v62 = vpop.eup %6062  ;;  %v7392_v51 = vmul.f32 %v6061_v1, %v6053_v36 }
 0x89d   : > { %v2496_v48 = vadd.f32 1.0, %v6063_v62  ;;  %v2555_v40 = vpack.c.bf16 %v7388_v37, %v7395_v7  ;;  %v6065_v11 = vpop.eup %6064 }
 0x89e   : > { %v2554_v46 = vpack.c.bf16 %v7392_v51, %v7390_v43  ;;  %v2495_v19 = vadd.f32 1.0, %v6065_v11  ;;  %v6067_v15 = vpop.eup %6066 }
 0x89f   : > { %6078 = vrcp.f32 %v2496_v48  ;;  %v6069_v63 = vpop.eup %6068 }
 0x8a0   : > { %5317 = vmatprep.mubr.msk.bf16.mxu0 %vm988_vm2, %v2554_v46  ;;  %6080 = vrcp.f32 %v2495_v19  ;;  %v6071_v32 = vpop.eup %6070 }
 0x8a1   : > { %5318 = vmatmul.mubr.msk.bf16.vlgmr.msra.gmra.mrb[68].mxu0 %vm988_vm2, %v2555_v40  ;;  %v6073_v34 = vpop.eup %6072 }
 0x8a2   : > { %5374 = vmatpush3.bf16.msra.mxu0 %v6850_v9  ;;  %v6075_v28 = vpop.eup %6074 }
 0x8a3   : > { %5375 = vmatprep.subr.bf16.mxu0 %v8022_v56  ;;  %v6077_v52 = vpop.eup %6076  ;;  %v7411_v18 = vmul.f32 %v6075_v28, %v6071_v32 }
 0x8a4   : > { %v7413_v21 = vmul.f32 %v6077_v52, %v6069_v63 }
 0x8a6   : > { %5376 = vmatpush3.bf16.msra.mxu0 %v8022_v56 }
 0x8a7   : > { %5607 = vmatprep.subr.msk.bf16.mxu0 %vm988_vm2, %v6986_v0 }
 0x8a9   : > { %v6079_v49 = vpop.eup %6078 }
 0x8aa   : > { %v6081_v17 = vpop.eup %6080  ;;  %v7417_v26 = vmul.f32 %v6079_v49, %v6067_v15 }
 0x8ab   : > { %v7415_v54 = vmul.f32 %v6081_v17, %v6073_v34 }
 0x8ac   : > { %v2557_v55 = vpack.c.bf16 %v7411_v18, %v7417_v26 }
 0x8ad   : > { %v2556_v36 = vpack.c.bf16 %v7415_v54, %v7413_v21 }
 0x8af   : > { %5321 = vmatprep.mubr.msk.bf16.mxu0 %vm988_vm2, %v2556_v36 }
 0x8b0   : > { %5322 = vmatmul.mubr.msk.bf16.gmra.mrb[72].mxu0 %vm988_vm2, %v2557_v55 }
 0x974   : > { %v5319_v14 = vpop.f32.mrb[68].mxu0 }
 0x975   : > { %v2604_v20 = vpop.f32.mrb[69].mxu0  ;;  %v2637_v11 = vsel %vm1305_vm5, %v5319_v14, -1e+30 }
 0x976   : > { %v5320_v1 = vpop.f32.mrb[70].mxu0  ;;  %v2635_v42 = vsel %vm1303_vm3, %v2604_v20, -1e+30 }
 0x977   : > { %2643 = vmax.xlane.f32.xlu0 %v2635_v42  ;;  %v2607_v2 = vpop.f32.mrb[71].mxu0  ;;  %v2638_v15 = vsel %vm1306_vm6, %v5320_v1, -1e+30 }
 0x978   : > { %v2636_v48 = vsel %vm1304_vm4, %v2607_v2, -1e+30 }
 0x979   : > { %2645 = vmax.xlane.f32.xlu1 %v2636_v48 }
 0x97b   : > { %2647 = vmax.xlane.f32.xlu0 %v2637_v11 }
 0x97f   : > { %2649 = vmax.xlane.f32.xlu0 %v2638_v15 }
 0x983   : > { %v5323_v63 = vpop.f32.mrb[72].mxu0 }
 0x984   : > { %v2620_v32 = vpop.f32.mrb[73].mxu0  ;;  %v2641_v14 = vsel %vm1309_vm9, %v5323_v63, -1e+30 }
 0x985   : > { %v5324_v34 = vpop.f32.mrb[74].mxu0  ;;  %v2639_v52 = vsel %vm1307_vm7, %v2620_v32, -1e+30 }
 0x986   : > { %v2623_v49 = vpop.f32.mrb[75].mxu0  ;;  %2651 = vmax.xlane.f32.xlu0 %v2639_v52  ;;  %v2642_v1 = vsel %vm1310_vm10, %v5324_v34, -1e+30 }
 0x987   : > { %v2640_v36 = vsel %vm1308_vm8, %v2623_v49, -1e+30 }
 0x988   : > { %2653 = vmax.xlane.f32.xlu1 %v2640_v36 }
 0x98a   : > { %2655 = vmax.xlane.f32.xlu0 %v2641_v14 }
 0x98c   : > { %2657 = vmax.xlane.f32.xlu1 %v2642_v1 }
 0xa04   : > { %v2644_v2 = vpop.xlane.xlu0 %2643 }
 0xa05   : > { %v2659_v19 = vsub.f32 %v2635_v42, %v2644_v2 }
 0xa06   : > { %v2646_v40 = vpop.xlane.xlu1 %2645 }
 0xa07   : > { %v2667_v46 = vmul.f32 1.442695, %v2659_v19  ;;  %v2660_v28 = vsub.f32 %v2636_v48, %v2646_v40 }
 0xa08   : > { %v2648_v32 = vpop.xlane.xlu0 %2647 }
 0xa09   : > { %6082 = vpow2.f32 %v2667_v46  ;;  %v2669_v62 = vmul.f32 1.442695, %v2660_v28  ;;  %v2661_v56 = vsub.f32 %v2637_v11, %v2648_v32 }
 0xa0b   : > { %6084 = vpow2.f32 %v2669_v62  ;;  %v2671_v49 = vmul.f32 1.442695, %v2661_v56 }
 0xa0c   : > { %v2650_v17 = vpop.xlane.xlu0 %2649 }
 0xa0d   : > { %6086 = vpow2.f32 %v2671_v49  ;;  %v2662_v55 = vsub.f32 %v2638_v15, %v2650_v17 }
 0xa0f   : > { %v2673_v63 = vmul.f32 1.442695, %v2662_v55 }
 0xa11   : > { %6088 = vpow2.f32 %v2673_v63 }
 0xa13   : > { %v6083_v4 = vpop.eup %6082  ;;  %v2652_v42 = vpop.xlane.xlu0 %2651 }
 0xa14   : > { %2683 = vadd.xlane.f32.xlu0 %v6083_v4  ;;  %v2663_v2 = vsub.f32 %v2639_v52, %v2652_v42 }
 0xa15   : > { %v6085_v34 = vpop.eup %6084  ;;  %v2654_v48 = vpop.xlane.xlu1 %2653 }
 0xa16   : > { %2685 = vadd.xlane.f32.xlu1 %v6085_v34  ;;  %v2664_v40 = vsub.f32 %v2640_v36, %v2654_v48  ;;  %v2675_v46 = vmul.f32 1.442695, %v2663_v2 }
 0xa17   : > { %v6087_v20 = vpop.eup %6086  ;;  %v2656_v11 = vpop.xlane.xlu0 %2655 }
 0xa18   : > { %2687 = vadd.xlane.f32.xlu0 %v6087_v20  ;;  %v2677_v62 = vmul.f32 1.442695, %v2664_v40  ;;  %6090 = vpow2.f32 %v2675_v46  ;;  %v2665_v56 = vsub.f32 %v2641_v14, %v2656_v11 }
 0xa19   : > { %v2658_v15 = vpop.xlane.xlu1 %2657 }
 0xa1a   : > { %6092 = vpow2.f32 %v2677_v62  ;;  %v2666_v28 = vsub.f32 %v2642_v1, %v2658_v15  ;;  %v2679_v17 = vmul.f32 1.442695, %v2665_v56 }
 0xa1b   : > { %v6089_v19 = vpop.eup %6088 }
 0xa1c   : > { %2689 = vadd.xlane.f32.xlu1 %v6089_v19  ;;  %v2681_v55 = vmul.f32 1.442695, %v2666_v28  ;;  %6094 = vpow2.f32 %v2679_v17 }
 0xa1e   : > { %6096 = vpow2.f32 %v2681_v55 }
 0xa22   : > { %v6091_v32 = vpop.eup %6090 }
 0xa23   : > { %2691 = vadd.xlane.f32.xlu0 %v6091_v32 }
 0xa24   : > { %v6093_v52 = vpop.eup %6092 }
 0xa25   : > { %2693 = vadd.xlane.f32.xlu1 %v6093_v52 }
 0xa26   : > { %v6095_v49 = vpop.eup %6094 }
 0xa27   : > { %2695 = vadd.xlane.f32.xlu0 %v6095_v49 }
 0xa28   : > { %v6097_v36 = vpop.eup %6096 }
 0xa29   : > { %2697 = vadd.xlane.f32.xlu1 %v6097_v36 }
 0xaa1   : > { %v2684_v63 = vpop.xlane.xlu0 %2683 }
 0xaa2   : > { %v2699_v42 = vmax.f32 %v2684_v63, 1e-30 }
 0xaa3   : > { %v2686_v2 = vpop.xlane.xlu1 %2685 }
 0xaa4   : > { %6098 = vrcp.f32 %v2699_v42  ;;  %v2700_v14 = vmax.f32 %v2686_v2, 1e-30 }
 0xaa5   : > { %v2688_v48 = vpop.xlane.xlu0 %2687 }
 0xaa6   : > { %6100 = vrcp.f32 %v2700_v14  ;;  %v2701_v1 = vmax.f32 %v2688_v48, 1e-30 }
 0xaa8   : > { %6102 = vrcp.f32 %v2701_v1 }
 0xaa9   : > { %v2690_v40 = vpop.xlane.xlu1 %2689 }
 0xaaa   : > { %v2702_v46 = vmax.f32 %v2690_v40, 1e-30 }
 0xaac   : > { %6104 = vrcp.f32 %v2702_v46 }
 0xaae   : > { %v6099_v11 = vpop.eup %6098 }
 0xaaf   : > { %v2715_v56 = vmul.f32 %v6099_v11, %v6083_v4 }
 0xab0   : > { %v6101_v62 = vpop.eup %6100  ;;  %v2692_v55 = vpop.xlane.xlu0 %2691 }
 0xab1   : > { %v2716_v15 = vmul.f32 %v6101_v62, %v6085_v34  ;;  %v2703_v50 = vmax.f32 %v2692_v55, 1e-30 }
 0xab2   : > { %v6103_v17 = vpop.eup %6102  ;;  %v2694_v61 = vpop.xlane.xlu1 %2693 }
 0xab3   : > { %v2723_v28 = vpack.c.bf16 %v2716_v15, %v2715_v56  ;;  %v2717_v42 = vmul.f32 %v6103_v17, %v6087_v20  ;;  %6106 = vrcp.f32 %v2703_v50  ;;  %v2704_v14 = vmax.f32 %v2694_v61, 1e-30 }
 0xab4   : > { %v2696_v48 = vpop.xlane.xlu0 %2695 }
 0xab5   : > { %5341 = vmatprep.mubr.bf16.mxu1 %v2723_v28  ;;  %6108 = vrcp.f32 %v2704_v14  ;;  %v2705_v1 = vmax.f32 %v2696_v48, 1e-30 }
 0xab6   : > { %v6105_v63 = vpop.eup %6104  ;;  %v2698_v46 = vpop.xlane.xlu1 %2697 }
 0xab7   : > { %v2718_v2 = vmul.f32 %v6105_v63, %v6089_v19  ;;  %6110 = vrcp.f32 %v2705_v1  ;;  %v2706_v33 = vmax.f32 %v2698_v46, 1e-30 }
 0xab9   : > { %v2724_v40 = vpack.c.bf16 %v2718_v2, %v2717_v42  ;;  %6112 = vrcp.f32 %v2706_v33 }
 0xabb   : > { %5342 = vmatmul.mubr.bf16.vlgmr.msra.gmra.mrb[76].mxu1 %v2724_v40 }
 0xabc   : > { %5350 = vmatpush3.bf16.msra.mxu1 %v6782_v6 }
 0xabd   : > { %5351 = vmatprep.subr.bf16.mxu1 %v6815_v27  ;;  %v6107_v4 = vpop.eup %6106 }
 0xabe   : > { %v2719_v50 = vmul.f32 %v6107_v4, %v6091_v32 }
 0xabf   : > { %v6109_v61 = vpop.eup %6108 }
 0xac0   : > { %5352 = vmatpush3.bf16.msra.mxu1 %v6815_v27  ;;  %v2720_v20 = vmul.f32 %v6109_v61, %v6093_v52 }
 0xac1   : > { %5361 = vmatprep.subr.bf16.mxu1 %v6825_v44  ;;  %v6111_v34 = vpop.eup %6110 }
 0xac2   : > { %v2725_v19 = vpack.c.bf16 %v2720_v20, %v2719_v50  ;;  %v2721_v11 = vmul.f32 %v6111_v34, %v6095_v49 }
 0xac3   : > { %v6113_v62 = vpop.eup %6112 }
 0xac4   : > { %5345 = vmatprep.mubr.bf16.mxu1 %v2725_v19  ;;  %v2722_v56 = vmul.f32 %v6113_v62, %v6097_v36 }
 0xac6   : > { %v2726_v15 = vpack.c.bf16 %v2722_v56, %v2721_v11 }
 0xac8   : > { %5346 = vmatmul.mubr.bf16.gmra.mrb[80].mxu1 %v2726_v15 }
 0xb8e   : > { %v5343_v28 = vpop.f32.mrb[76].mxu1 }
 0xb8f   : > { %v2761_v33 = vpop.f32.mrb[77].mxu1 }
 0xb90   : > { %v5344_v17 = vpop.f32.mrb[78].mxu1 }
 0xb91   : > { %v5691_v55 = vpack.i.bf16 %v5344_v17, %v5343_v28  ;;  %v2764_v63 = vpop.f32.mrb[79].mxu1 }
 0xb92   : > { %v5686_v42 = vpack.i.bf16 %v2764_v63, %v2761_v33 }
 0xb93   : > { %5692 = vrot.lane.b32.xlu1 %v5691_v55, %s6511_s9 }
 0xb94   : > { %5687 = vrot.lane.b32.xlu0 %v5686_v42, %s6511_s9 }
 0xb9b   : > { %v5347_v32 = vpop.f32.mrb[80].mxu1 }
 0xb9c   : > { %v2777_v52 = vpop.f32.mrb[81].mxu1 }
 0xb9d   : > { %v5348_v2 = vpop.f32.mrb[82].mxu1 }
 0xb9e   : > { %v5701_v14 = vpack.i.bf16 %v5348_v2, %v5347_v32  ;;  %v2780_v49 = vpop.f32.mrb[83].mxu1 }
 0xb9f   : > { %v5696_v48 = vpack.i.bf16 %v2780_v49, %v2777_v52 }
 0xba1   : > { %5697 = vrot.lane.b32.xlu1 %v5696_v48, %s6511_s9 }
 0xba5   : > { %5702 = vrot.lane.b32.xlu1 %v5701_v14, %s6511_s9 }
 0xc05   : > { %v5693_v36 = vpop.permute.xlu1 %5692 }
 0xc06   : > { %v5695_v1 = vunpack.i.h.bf16 %v5693_v36  ;;  %v5694_v40 = vunpack.i.l.bf16 %v5693_v36  ;;  %v5688_v46 = vpop.permute.xlu0 %5687 }
 0xc07   : > { %v5690_v4 = vunpack.i.h.bf16 %v5688_v46  ;;  %v5689_v50 = vunpack.i.l.bf16 %v5688_v46  ;;  %v7534_v46 = vld [vmem:[%s7974_s3 + $0x60] ss:$0 sm:$0xff] }
 0xc08   : > { %v2827_v61 = vsel %vm988_vm2, %v7388_v37, %v5695_v1  ;;  %v2826_v20 = vsel %vm988_vm2, %v7395_v7, %v5694_v40 }
 0xc09   : > { %v2825_v34 = vsel %vm988_vm2, %v7392_v51, %v5690_v4  ;;  %v2824_v19 = vsel %vm988_vm2, %v7390_v43, %v5689_v50  ;;  %v2833_v62 = vpack.c.bf16 %v2827_v61, %v2826_v20 }
 0xc0a   : > { %v2832_v11 = vpack.c.bf16 %v2825_v34, %v2824_v19 }
 0xc0c   : > { %5353 = vmatprep.mubr.msk.bf16.mxu1 %vm1316_vm11, %v2832_v11  ;;  %5377 = vmatprep.mubr.msk.bf16.mxu0 %vm1316_vm11, %v2832_v11 }
 0xc0d   : > { %5354 = vmatmul.mubr.msk.bf16.vlgmr.msra.gmra.mrb[84].mxu1 %vm1316_vm11, %v2833_v62  ;;  %5378 = vmatmul.mubr.msk.bf16.vlgmr.msra.gmra.mrb[76].mxu0 %vm1316_vm11, %v2833_v62 }
 0xc0e   : > { %5398 = vmatpush3.bf16.xpose.msra.mxu0 %v6995_v16  ;;  %5362 = vmatpush3.bf16.msra.mxu1 %v6825_v44 }
 0xc0f   : > { %5608 = vmatprep.subr.msk.bf16.mxu0 %vm988_vm2, %v6984_v57  ;;  %5363 = vmatprep.subr.bf16.mxu1 %v6838_v3 }
 0xc12   : > { %5364 = vmatpush3.bf16.msra.mxu1 %v6838_v3 }
 0xc13   : > { %5385 = vmatprep.subr.bf16.mxu1 %v6885_v41  ;;  %v5698_v37 = vpop.permute.xlu1 %5697 }
 0xc14   : > { %v5700_v43 = vunpack.i.h.bf16 %v5698_v37  ;;  %v5699_v51 = vunpack.i.l.bf16 %v5698_v37 }
 0xc16   : > { %5400 = vmatpush3.bf16.xpose.msra.mxu0 %v7020_v10  ;;  %v2829_v7 = vsel %vm988_vm2, %v7415_v54, %v5700_v43  ;;  %v2828_v56 = vsel %vm988_vm2, %v7413_v21, %v5699_v51  ;;  %v7543_v51 = vld [vmem:[%s7974_s3 + $0xb0] ss:$0 sm:$0xff] }
 0xc17   : > { %5609 = vmatprep.subr.msk.bf16.mxu0 %vm988_vm2, %v7009_v24  ;;  %v2834_v15 = vpack.c.bf16 %v2829_v7, %v2828_v56  ;;  %v5703_v28 = vpop.permute.xlu1 %5702 }
 0xc18   : > { %v5705_v33 = vunpack.i.h.bf16 %v5703_v28  ;;  %v5704_v17 = vunpack.i.l.bf16 %v5703_v28 }
 0xc19   : > { %5357 = vmatprep.mubr.msk.bf16.mxu1 %vm1316_vm11, %v2834_v15  ;;  %5381 = vmatprep.mubr.msk.bf16.mxu0 %vm1316_vm11, %v2834_v15 }
 0xc1a   : > { %v2831_v55 = vsel %vm988_vm2, %v7411_v18, %v5705_v33  ;;  %v2830_v63 = vsel %vm988_vm2, %v7417_v26, %v5704_v17 }
 0xc1b   : > { %v2835_v54 = vpack.c.bf16 %v2831_v55, %v2830_v63 }
 0xc1d   : > { %5358 = vmatmul.mubr.msk.bf16.gmra.mrb[88].mxu1 %vm1316_vm11, %v2835_v54  ;;  %5382 = vmatmul.mubr.msk.bf16.gmra.mrb[80].mxu0 %vm1316_vm11, %v2835_v54 }
 0xc1e   : > { %5402 = vmatpush3.bf16.xpose.msra.mxu0 %v7039_v58  ;;  %5365 = vmatprep.mubr.msk.bf16.mxu1 %vm1316_vm11, %v2832_v11 }
 0xc1f   : > { %5610 = vmatprep.subr.msk.bf16.mxu0 %vm988_vm2, %v7006_v22 }
 0xc25   : > { %5366 = vmatmul.mubr.msk.bf16.vlgmr.msra.gmra.mrb[92].mxu1 %vm1316_vm11, %v2833_v62 }
 0xc26   : > { %5404 = vmatpush3.bf16.xpose.msra.mxu0 %v7066_v29  ;;  %5386 = vmatpush3.bf16.msra.mxu1 %v6885_v41 }
 0xc27   : > { %5611 = vmatprep.subr.msk.bf16.mxu0 %vm988_vm2, %v7032_v53  ;;  %5369 = vmatprep.mubr.msk.bf16.mxu1 %vm1316_vm11, %v2834_v15 }
 0xc28   : > { %5387 = vmatprep.subr.bf16.mxu1 %v6912_v8 }
 0xc2a   : > { %5388 = vmatpush3.bf16.msra.mxu1 %v6912_v8 }
 0xc2b   : > { %5421 = vmatprep.subr.bf16.mxu1 %v6986_v0 }
 0xc2d   : > { %5370 = vmatmul.mubr.msk.bf16.gmra.mrb[96].mxu1 %vm1316_vm11, %v2835_v54 }
 0xc2e   : > { %5406 = vmatpush3.bf16.xpose.msra.mxu0 %v7086_v59  ;;  %5389 = vmatprep.mubr.msk.bf16.mxu1 %vm1316_vm11, %v2832_v11 }
 0xc2f   : > { %5612 = vmatprep.subr.msk.bf16.mxu0 %vm988_vm2, %v7029_v38 }
 0xc35   : > { %5390 = vmatmul.mubr.msk.bf16.vlgmr.msra.gmra.mrb[100].mxu1 %vm1316_vm11, %v2833_v62 }
 0xc36   : > { %5408 = vmatpush3.bf16.xpose.msra.mxu0 %v7102_v31  ;;  %5422 = vmatpush3.bf16.msra.mxu1 %v6986_v0 }
 0xc37   : > { %5613 = vmatprep.subr.msk.bf16.mxu0 %vm988_vm2, %v7059_v23  ;;  %5393 = vmatprep.mubr.msk.bf16.mxu1 %vm1316_vm11, %v2834_v15 }
 0xc38   : > { %5423 = vmatprep.subr.bf16.mxu1 %v6984_v57 }
 0xc3a   : > { %5424 = vmatpush3.bf16.msra.mxu1 %v6984_v57 }
 0xc3b   : > { %5425 = vmatprep.subr.bf16.mxu1 %v7009_v24 }
 0xc3d   : > { %5394 = vmatmul.mubr.msk.bf16.gmra.mrb[104].mxu1 %vm1316_vm11, %v2835_v54 }
 0xc3e   : > { %5410 = vmatpush3.bf16.xpose.msra.mxu0 %v7111_v13  ;;  %5426 = vmatpush3.bf16.msra.mxu1 %v7009_v24 }
 0xc3f   : > { %5614 = vmatprep.subr.msk.bf16.mxu0 %vm988_vm2, %v7054_v47  ;;  %5427 = vmatprep.subr.bf16.mxu1 %v7006_v22 }
 0xc42   : > { %5428 = vmatpush3.bf16.msra.mxu1 %v7006_v22 }
 0xc43   : > { %5429 = vmatprep.subr.bf16.mxu1 %v7032_v53 }
 0xc46   : > { %5412 = vmatpush3.bf16.xpose.msra.mxu0 %v7134_v35  ;;  %5430 = vmatpush3.bf16.msra.mxu1 %v7032_v53 }
 0xc47   : > { %5469 = vmatprep.subr.bf16.mxu0 %v6850_v9  ;;  %5431 = vmatprep.subr.bf16.mxu1 %v7029_v38 }
 0xc4a   : > { %5432 = vmatpush3.bf16.msra.mxu1 %v7029_v38 }
 0xc4b   : > { %5433 = vmatprep.subr.bf16.mxu1 %v7059_v23 }
 0xc4e   : > { %5434 = vmatpush3.bf16.msra.mxu1 %v7059_v23 }
 0xc4f   : > { %5435 = vmatprep.subr.bf16.mxu1 %v7054_v47 }
 0xc52   : > { %5436 = vmatpush3.bf16.msra.mxu1 %v7054_v47 }
 0xc53   : > { %5445 = vmatprep.subr.bf16.mxu1 %v6782_v6 }
 0xce0   : > { %v5355_v18 = vpop.f32.mrb[84].mxu1  ;;  %v5379_v21 = vpop.f32.mrb[76].mxu0 }
 0xce1   : > { %v2891_v26 = vadd.f32 %v7309_v5, %v5355_v18  ;;  %v2882_v42 = vpop.f32.mrb[85].mxu1  ;;  %v3012_v32 = vpop.f32.mrb[77].mxu0  ;;  %v3021_v20 = vadd.f32 %v7318_v39, %v5379_v21 }
 0xce2   : > { %v2883_v52 = vadd.f32 %v7309_v5, %v2882_v42  ;;  %v5356_v2 = vpop.f32.mrb[86].mxu1  ;;  %v5380_v14 = vpop.f32.mrb[78].mxu0 }
 0xce3   : > { %v4671_v49 = vmul.f32 -1.442695, %v2891_v26  ;;  %v2894_v48 = vadd.f32 %v7309_v5, %v5356_v2  ;;  %v2885_v36 = vpop.f32.mrb[87].mxu1  ;;  %v3015_v1 = vpop.f32.mrb[79].mxu0  ;;  %v3013_v5 = vadd.f32 %v7318_v39, %v3012_v32  ;;  %v3024_v34 = vadd.f32 %v7318_v39, %v5380_v14 }
 0xce4   : > { %v4669_v40 = vmul.f32 -1.442695, %v2883_v52  ;;  %v2886_v4 = vadd.f32 %v7534_v46, %v2885_v36  ;;  %v3016_v7 = vadd.f32 %v7543_v51, %v3015_v1 }
 0xce5   : > { %6114 = vpow2.f32 %v4671_v49  ;;  %v4672_v50 = vmul.f32 -1.442695, %v2894_v48 }
 0xce6   : > { %6116 = vpow2.f32 %v4669_v40  ;;  %v4670_v61 = vmul.f32 -1.442695, %v2886_v4 }
 0xce7   : > { %6118 = vpow2.f32 %v4672_v50 }
 0xce8   : > { %6120 = vpow2.f32 %v4670_v61 }
 0xce9   : > { %6122 = vtanh.f32 %v3021_v20 }
 0xcea   : > { %6124 = vtanh.f32 %v3013_v5 }
 0xceb   : > { %6126 = vtanh.f32 %v3024_v34 }
 0xcef   : > { %v6115_v19 = vpop.eup %6114 }
 0xcf0   : > { %v6117_v11 = vpop.eup %6116  ;;  %v3134_v62 = vadd.f32 1.0, %v6115_v19  ;;  %v5359_v28 = vpop.f32.mrb[88].mxu1 }
 0xcf1   : > { %v6119_v37 = vpop.eup %6118  ;;  %v3132_v43 = vadd.f32 1.0, %v6117_v11  ;;  %v5383_v33 = vpop.f32.mrb[80].mxu0  ;;  %v2907_v17 = vadd.f32 %v7534_v46, %v5359_v28  ;;  %v7558_v11 = vld [vmem:[%s7974_s3 + $0x88] ss:$0 sm:$0xff] }
 0xcf2   : > { %6128 = vrcp.f32 %v3134_v62  ;;  %v3135_v56 = vadd.f32 1.0, %v6119_v37  ;;  %v6121_v15 = vpop.eup %6120  ;;  %v2898_v55 = vpop.f32.mrb[89].mxu1  ;;  %v3037_v1 = vadd.f32 %v7543_v51, %v5383_v33 }
 0xcf3   : > { %6130 = vrcp.f32 %v3132_v43  ;;  %v3133_v39 = vadd.f32 1.0, %v6121_v15  ;;  %v3028_v63 = vpop.f32.mrb[81].mxu0  ;;  %v2899_v54 = vadd.f32 %v7534_v46, %v2898_v55  ;;  %v5360_v18 = vpop.f32.mrb[90].mxu1  ;;  %v4675_v26 = vmul.f32 -1.442695, %v2907_v17 }
 0xcf4   : > { %6132 = vrcp.f32 %v3135_v56  ;;  %v5384_v21 = vpop.f32.mrb[82].mxu0  ;;  %v2910_v42 = vadd.f32 %v7534_v46, %v5360_v18  ;;  %v2901_v32 = vpop.f32.mrb[91].mxu1  ;;  %v3029_v50 = vadd.f32 %v7543_v51, %v3028_v63 }
 0xcf5   : > { %6134 = vtanh.f32 %v3016_v7  ;;  %v3031_v52 = vpop.f32.mrb[83].mxu0  ;;  %v4673_v2 = vmul.f32 -1.442695, %v2899_v54  ;;  %v2902_v14 = vadd.f32 %v7534_v46, %v2901_v32  ;;  %v6123_v49 = vpop.eup %6122  ;;  %v3040_v20 = vadd.f32 %v7543_v51, %v5384_v21 }
 0xcf6   : > { %6136 = vrcp.f32 %v3133_v39  ;;  %v4676_v48 = vmul.f32 -1.442695, %v2910_v42  ;;  %v6125_v36 = vpop.eup %6124 }
 0xcf7   : > { %6138 = vpow2.f32 %v4675_v26  ;;  %v4674_v40 = vmul.f32 -1.442695, %v2902_v14  ;;  %v6127_v4 = vpop.eup %6126  ;;  %v3032_v26 = vadd.f32 %v7543_v51, %v3031_v52 }
 0xcf8   : > { %6140 = vpow2.f32 %v4673_v2  ;;  %v5367_v5 = vpop.f32.mrb[92].mxu1 }
 0xcf9   : > { %6142 = vpow2.f32 %v4676_v48  ;;  %v2956_v62 = vadd.f32 %v7558_v11, %v5367_v5  ;;  %v2947_v37 = vpop.f32.mrb[93].mxu1 }
 0xcfa   : > { %6144 = vpow2.f32 %v4674_v40  ;;  %v2948_v56 = vadd.f32 %v7558_v11, %v2947_v37  ;;  %v5368_v15 = vpop.f32.mrb[94].mxu1 }
 0xcfb   : > { %6146 = vtanh.f32 %v3037_v1  ;;  %v4679_v33 = vmul.f32 -1.442695, %v2956_v62  ;;  %v2959_v17 = vadd.f32 %v7558_v11, %v5368_v15  ;;  %v2950_v55 = vpop.f32.mrb[95].mxu1 }
 0xcfc   : > { %v6129_v61 = vpop.eup %6128  ;;  %6148 = vtanh.f32 %v3029_v50  ;;  %v4677_v54 = vmul.f32 -1.442695, %v2948_v56  ;;  %v2951_v18 = vadd.f32 %v7558_v11, %v2950_v55 }
 0xcfd   : > { %v6131_v34 = vpop.eup %6130  ;;  %v7553_v19 = vmul.f32 %v6129_v61, %v6123_v49  ;;  %6150 = vtanh.f32 %v3040_v20  ;;  %v4680_v42 = vmul.f32 -1.442695, %v2959_v17 }
 0xcfe   : > { %v6133_v43 = vpop.eup %6132  ;;  %v7561_v7 = vmul.f32 %v6131_v34, %v6125_v36  ;;  %6152 = vpow2.f32 %v4679_v33  ;;  %v4678_v32 = vmul.f32 -1.442695, %v2951_v18 }
 0xcff   : > { %v6135_v39 = vpop.eup %6134  ;;  %v7564_v28 = vmul.f32 %v6133_v43, %v6127_v4  ;;  %6154 = vpow2.f32 %v4677_v54 }
 0xd00   : > { %v6137_v63 = vpop.eup %6136  ;;  %6156 = vpow2.f32 %v4680_v42  ;;  %v5371_v48 = vpop.f32.mrb[96].mxu1 }
 0xd01   : > { %v7568_v21 = vmul.f32 %v6137_v63, %v6135_v39  ;;  %v6139_v2 = vpop.eup %6138  ;;  %6158 = vpow2.f32 %v4678_v32  ;;  %v2972_v40 = vadd.f32 %v7558_v11, %v5371_v48  ;;  %v2963_v4 = vpop.f32.mrb[97].mxu1 }
 0xd02   : > { %v6141_v14 = vpop.eup %6140  ;;  %v3138_v49 = vadd.f32 1.0, %v6139_v2  ;;  %6160 = vtanh.f32 %v3032_v26  ;;  %v2964_v52 = vadd.f32 %v7558_v11, %v2963_v4  ;;  %v5372_v61 = vpop.f32.mrb[98].mxu1 }
 0xd03   : > { %v6143_v36 = vpop.eup %6142  ;;  %v3136_v1 = vadd.f32 1.0, %v6141_v14  ;;  %v4683_v5 = vmul.f32 -1.442695, %v2972_v40  ;;  %v2975_v34 = vadd.f32 %v7558_v11, %v5372_v61  ;;  %v2966_v62 = vpop.f32.mrb[99].mxu1 }
 0xd04   : > { %6162 = vrcp.f32 %v3138_v49  ;;  %v3139_v50 = vadd.f32 1.0, %v6143_v36  ;;  %v6145_v20 = vpop.eup %6144  ;;  %v4681_v56 = vmul.f32 -1.442695, %v2964_v52  ;;  %v2967_v15 = vadd.f32 %v7558_v11, %v2966_v62  ;;  %v7579_v36 = vld [vmem:[%s7974_s3 + $0xd8] ss:$0 sm:$0xff] }
 0xd05   : > { %6164 = vrcp.f32 %v3136_v1  ;;  %v6147_v37 = vpop.eup %6146  ;;  %v3137_v43 = vadd.f32 1.0, %v6145_v20  ;;  %v4684_v33 = vmul.f32 -1.442695, %v2975_v34 }
 0xd06   : > { %6166 = vrcp.f32 %v3139_v50  ;;  %v6149_v39 = vpop.eup %6148  ;;  %v4682_v55 = vmul.f32 -1.442695, %v2967_v15 }
 0xd07   : > { %6168 = vpow2.f32 %v4683_v5  ;;  %v6151_v17 = vpop.eup %6150 }
 0xd08   : > { %6170 = vrcp.f32 %v3137_v43  ;;  %v6153_v63 = vpop.eup %6152  ;;  %v5391_v26 = vpop.f32.mrb[100].mxu1 }
 0xd09   : > { %6172 = vpow2.f32 %v4681_v56  ;;  %v6155_v54 = vpop.eup %6154  ;;  %v3182_v18 = vadd.f32 1.0, %v6153_v63  ;;  %v3086_v2 = vadd.f32 %v7346_v12, %v5391_v26  ;;  %v3077_v14 = vpop.f32.mrb[101].mxu1 }
 0xd0a   : > { %6174 = vpow2.f32 %v4684_v33  ;;  %v6157_v42 = vpop.eup %6156  ;;  %v3180_v32 = vadd.f32 1.0, %v6155_v54  ;;  %v3078_v1 = vadd.f32 %v7579_v36, %v3077_v14  ;;  %v5392_v40 = vpop.f32.mrb[102].mxu1 }
 0xd0b   : > { %6176 = vpow2.f32 %v4682_v55  ;;  %v6159_v49 = vpop.eup %6158  ;;  %v3183_v48 = vadd.f32 1.0, %v6157_v42  ;;  %v4687_v52 = vmul.f32 -1.442695, %v3086_v2  ;;  %v3089_v61 = vadd.f32 %v7579_v36, %v5392_v40  ;;  %v3080_v20 = vpop.f32.mrb[103].mxu1 }
 0xd0c   : > { %6178 = vrcp.f32 %v3182_v18  ;;  %v6161_v4 = vpop.eup %6160  ;;  %v3181_v50 = vadd.f32 1.0, %v6159_v49  ;;  %v4685_v5 = vmul.f32 -1.442695, %v3078_v1  ;;  %v3081_v34 = vadd.f32 %v7579_v36, %v3080_v20 }
 0xd0d   : > { %6180 = vrcp.f32 %v3180_v32  ;;  %v4688_v56 = vmul.f32 -1.442695, %v3089_v61 }
 0xd0e   : > { %v6163_v12 = vpop.eup %6162  ;;  %6182 = vrcp.f32 %v3183_v48  ;;  %v4686_v55 = vmul.f32 -1.442695, %v3081_v34 }
 0xd0f   : > { %v6165_v62 = vpop.eup %6164  ;;  %v7584_v43 = vmul.f32 %v6163_v12, %v6147_v37  ;;  %6184 = vrcp.f32 %v3181_v50 }
 0xd10   : > { %v6167_v15 = vpop.eup %6166  ;;  %v7586_v33 = vmul.f32 %v6165_v62, %v6149_v39  ;;  %6186 = vpow2.f32 %v4687_v52  ;;  %v5395_v42 = vpop.f32.mrb[104].mxu1 }
 0xd11   : > { %v6169_v63 = vpop.eup %6168  ;;  %v7588_v54 = vmul.f32 %v6167_v15, %v6151_v17  ;;  %6188 = vpow2.f32 %v4685_v5  ;;  %v3093_v37 = vpop.f32.mrb[105].mxu1 }
 0xd12   : > { %v6171_v18 = vpop.eup %6170  ;;  %v3186_v26 = vadd.f32 1.0, %v6169_v63  ;;  %6190 = vpow2.f32 %v4688_v56  ;;  %v5396_v39 = vpop.f32.mrb[106].mxu1  ;;  %v3094_v63 = vadd.f32 %v7579_v36, %v3093_v37  ;;  %v8031_v37 = vld [vmem:[#allocation15_spill] sm:$0xff] }
 0xd13   : > { %v6173_v32 = vpop.eup %6172  ;;  %v7590_v2 = vmul.f32 %v6171_v18, %v6161_v4  ;;  %6192 = vpow2.f32 %v4686_v55  ;;  %v3096_v40 = vpop.f32.mrb[107].mxu1 }
 0xd14   : > { %v6175_v14 = vpop.eup %6174  ;;  %6194 = vrcp.f32 %v3186_v26  ;;  %v3184_v49 = vadd.f32 1.0, %v6173_v32  ;;  %v3102_v32 = vadd.f32 %v7579_v36, %v5395_v42 }
 0xd15   : > { %v6177_v48 = vpop.eup %6176  ;;  %v3187_v1 = vadd.f32 1.0, %v6175_v14 }
 0xd16   : > { %v6179_v50 = vpop.eup %6178  ;;  %6196 = vrcp.f32 %v3184_v49  ;;  %v3185_v17 = vadd.f32 1.0, %v6177_v48  ;;  %v4689_v48 = vmul.f32 -1.442695, %v3094_v63 }
 0xd17   : > { %v6181_v52 = vpop.eup %6180  ;;  %v3262_v61 = vmul.f32 %v6179_v50, %v7357_v60  ;;  %6198 = vrcp.f32 %v3187_v1 }
 0xd18   : > { %v6183_v20 = vpop.eup %6182  ;;  %v3260_v4 = vmul.f32 %v6181_v52, %v7361_v45  ;;  %6200 = vrcp.f32 %v3185_v17  ;;  %v8033_v17 = vld [vmem:[#allocation16_spill] sm:$0xff] }
 0xd19   : > { %v6185_v12 = vpop.eup %6184  ;;  %v7595_v5 = vadd.f32 %v7553_v19, %v3262_v61  ;;  %v3263_v34 = vmul.f32 %v6183_v20, %v7365_v30  ;;  %v4691_v61 = vmul.f32 -1.442695, %v3102_v32  ;;  %v8034_v20 = vld [vmem:[#allocation17_spill] sm:$0xff] }
 0xd1a   : > { %v6187_v62 = vpop.eup %6186  ;;  %v7599_v56 = vadd.f32 %v7561_v7, %v3260_v4  ;;  %v3261_v15 = vmul.f32 %v6185_v12, %v7368_v25  ;;  %v3105_v7 = vadd.f32 %v7579_v36, %v5396_v39  ;;  %v3097_v12 = vadd.f32 %v7579_v36, %v3096_v40 }
 0xd1b   : > { %v6189_v55 = vpop.eup %6188  ;;  %6202 = vtanh.f32 %v7595_v5  ;;  %v7604_v60 = vadd.f32 %v7564_v28, %v3263_v34  ;;  %v3238_v45 = vadd.f32 1.0, %v6187_v62  ;;  %v8036_v62 = vld [vmem:[#allocation6_spill] sm:$0xff] }
 0xd1c   : > { %v6191_v18 = vpop.eup %6190  ;;  %6204 = vtanh.f32 %v7599_v56  ;;  %v7609_v30 = vadd.f32 %v7568_v21, %v3261_v15  ;;  %v3236_v19 = vadd.f32 1.0, %v6189_v55  ;;  %v4692_v21 = vmul.f32 -1.442695, %v3105_v7 }
 0xd1d   : > { %v6193_v26 = vpop.eup %6192  ;;  %6206 = vtanh.f32 %v7604_v60  ;;  %v3239_v25 = vadd.f32 1.0, %v6191_v18  ;;  %v4690_v18 = vmul.f32 -1.442695, %v3097_v12 }
 0xd1e   : > { %v6195_v28 = vpop.eup %6194  ;;  %6208 = vtanh.f32 %v7609_v30  ;;  %v3237_v14 = vadd.f32 1.0, %v6193_v26 }
 0xd1f   : > { %v3266_v49 = vmul.f32 %v6195_v28, %v8031_v37  ;;  %6210 = vrcp.f32 %v3238_v45 }
 0xd20   : > { %v6197_v1 = vpop.eup %6196  ;;  %6212 = vrcp.f32 %v3236_v19 }
 0xd21   : > { %v6199_v50 = vpop.eup %6198  ;;  %v7617_v39 = vadd.f32 %v7584_v43, %v3266_v49  ;;  %v3264_v52 = vmul.f32 %v6197_v1, %v8033_v17  ;;  %6214 = vrcp.f32 %v3239_v25 }
 0xd22   : > { %v6201_v42 = vpop.eup %6200  ;;  %v3267_v4 = vmul.f32 %v6199_v50, %v8034_v20  ;;  %6216 = vrcp.f32 %v3237_v14 }
 0xd23   : > { %8032 = vst [vmem:[#allocation15_spill] sm:$0xff] %v7617_v39  ;;  %v7623_v34 = vadd.f32 %v7586_v33, %v3264_v52  ;;  %v3265_v15 = vmul.f32 %v6201_v42, %v8036_v62  ;;  %6218 = vpow2.f32 %v4689_v48 }
 0xd24   : > { %v7627_v55 = vadd.f32 %v7588_v54, %v3267_v4  ;;  %6220 = vpow2.f32 %v4692_v21 }
 0xd25   : > { %8035 = vst [vmem:[#allocation16_spill] sm:$0xff] %v7623_v34  ;;  %v6203_v43 = vpop.eup %6202  ;;  %v7630_v45 = vadd.f32 %v7590_v2, %v3265_v15  ;;  %6222 = vpow2.f32 %v4691_v61  ;;  %v8039_v61 = vld [vmem:[#allocation5_spill] sm:$0xff] }
 0xd26   : > { %8037 = vst [vmem:[#allocation17_spill] sm:$0xff] %v7627_v55  ;;  %v6205_v63 = vpop.eup %6204  ;;  %6224 = vpow2.f32 %v4690_v18 }
 0xd27   : > { %8038 = vst [vmem:[#allocation6_spill] sm:$0xff] %v7630_v45  ;;  %v6207_v19 = vpop.eup %6206  ;;  %6226 = vtanh.f32 %v7617_v39 }
 0xd28   : > { %v6209_v7 = vpop.eup %6208  ;;  %6228 = vtanh.f32 %v7623_v34 }
 0xd29   : > { %v6211_v40 = vpop.eup %6210  ;;  %6230 = vtanh.f32 %v7627_v55 }
 0xd2a   : > { %v6213_v26 = vpop.eup %6212  ;;  %v7638_v2 = vmul.f32 %v6211_v40, %v6203_v43  ;;  %6232 = vtanh.f32 %v7630_v45 }
 0xd2b   : > { %v6215_v33 = vpop.eup %6214  ;;  %v7634_v54 = vmul.f32 %v6213_v26, %v6205_v63 }
 0xd2c   : > { %v6217_v25 = vpop.eup %6216  ;;  %v7632_v32 = vmul.f32 %v6215_v33, %v6207_v19 }
 0xd2d   : > { %v6219_v28 = vpop.eup %6218  ;;  %v7636_v14 = vmul.f32 %v6217_v25, %v6209_v7 }
 0xd2e   : > { %v6221_v37 = vpop.eup %6220  ;;  %v3301_v21 = vpack.c.bf16 %v7632_v32, %v7638_v2  ;;  %v3240_v50 = vadd.f32 1.0, %v6219_v28 }
 0xd2f   : > { %v6223_v49 = vpop.eup %6222  ;;  %v3300_v48 = vpack.c.bf16 %v7636_v14, %v7634_v54  ;;  %v3243_v1 = vadd.f32 1.0, %v6221_v37 }
 0xd30   : > { %v3242_v17 = vadd.f32 1.0, %v6223_v49  ;;  %v6225_v52 = vpop.eup %6224 }
 0xd31   : > { %5413 = vmatprep.mubr.msk.bf16.mxu0 %vm988_vm2, %v3300_v48  ;;  %6234 = vrcp.f32 %v3243_v1  ;;  %v3241_v42 = vadd.f32 1.0, %v6225_v52  ;;  %v6227_v20 = vpop.eup %6226 }
 0xd32   : > { %5414 = vmatmul.mubr.msk.bf16.vlgmr.msra.gmra.mrb[84].mxu0 %vm988_vm2, %v3301_v21  ;;  %6236 = vrcp.f32 %v3240_v50  ;;  %v6229_v4 = vpop.eup %6228 }
 0xd33   : > { %5470 = vmatpush3.bf16.msra.mxu0 %v6850_v9  ;;  %6238 = vrcp.f32 %v3242_v17  ;;  %v6231_v12 = vpop.eup %6230 }
 0xd34   : > { %5471 = vmatprep.subr.bf16.mxu0 %v8039_v61  ;;  %6240 = vrcp.f32 %v3241_v42  ;;  %v6233_v62 = vpop.eup %6232 }
 0xd37   : > { %5472 = vmatpush3.bf16.msra.mxu0 %v8039_v61 }
 0xd38   : > { %5615 = vmatprep.subr.msk.bf16.mxu0 %vm988_vm2, %v6986_v0 }
 0xd3b   : > { %v6235_v15 = vpop.eup %6234 }
 0xd3c   : > { %v6237_v43 = vpop.eup %6236  ;;  %v7655_v18 = vmul.f32 %v6235_v15, %v6231_v12 }
 0xd3d   : > { %v6239_v9 = vpop.eup %6238  ;;  %v7657_v19 = vmul.f32 %v6237_v43, %v6229_v4 }
 0xd3e   : > { %v6241_v63 = vpop.eup %6240  ;;  %v7661_v40 = vmul.f32 %v6239_v9, %v6227_v20 }
 0xd3f   : > { %v7659_v7 = vmul.f32 %v6241_v63, %v6233_v62 }
 0xd40   : > { %v3303_v33 = vpack.c.bf16 %v7655_v18, %v7661_v40 }
 0xd41   : > { %v3302_v26 = vpack.c.bf16 %v7659_v7, %v7657_v19 }
 0xd43   : > { %5417 = vmatprep.mubr.msk.bf16.mxu0 %vm988_vm2, %v3302_v26 }
 0xd44   : > { %5418 = vmatmul.mubr.msk.bf16.gmra.mrb[88].mxu0 %vm988_vm2, %v3303_v33 }
 0xe05   : > { %v5415_v25 = vpop.f32.mrb[84].mxu0 }
 0xe06   : > { %v3350_v28 = vpop.f32.mrb[85].mxu0  ;;  %v3383_v52 = vsel %vm1305_vm5, %v5415_v25, -1e+30 }
 0xe07   : > { %v5416_v37 = vpop.f32.mrb[86].mxu0  ;;  %v3381_v48 = vsel %vm1303_vm3, %v3350_v28, -1e+30 }
 0xe08   : > { %3389 = vmax.xlane.f32.xlu0 %v3381_v48  ;;  %v3353_v1 = vpop.f32.mrb[87].mxu0  ;;  %v3384_v42 = vsel %vm1306_vm6, %v5416_v37, -1e+30 }
 0xe09   : > { %v3382_v50 = vsel %vm1304_vm4, %v3353_v1, -1e+30 }
 0xe0a   : > { %3391 = vmax.xlane.f32.xlu1 %v3382_v50 }
 0xe0c   : > { %3393 = vmax.xlane.f32.xlu0 %v3383_v52 }
 0xe10   : > { %3395 = vmax.xlane.f32.xlu0 %v3384_v42 }
 0xe17   : > { %v5419_v20 = vpop.f32.mrb[88].mxu0 }
 0xe18   : > { %v3366_v4 = vpop.f32.mrb[89].mxu0  ;;  %v3387_v33 = vsel %vm1309_vm9, %v5419_v20, -1e+30 }
 0xe19   : > { %v5420_v12 = vpop.f32.mrb[90].mxu0  ;;  %v3385_v15 = vsel %vm1307_vm7, %v3366_v4, -1e+30 }
 0xe1a   : > { %v3369_v43 = vpop.f32.mrb[91].mxu0  ;;  %3397 = vmax.xlane.f32.xlu0 %v3385_v15  ;;  %v3388_v28 = vsel %vm1310_vm10, %v5420_v12, -1e+30 }
 0xe1b   : > { %v3386_v63 = vsel %vm1308_vm8, %v3369_v43, -1e+30 }
 0xe1c   : > { %3399 = vmax.xlane.f32.xlu1 %v3386_v63 }
 0xe1e   : > { %3401 = vmax.xlane.f32.xlu0 %v3387_v33 }
 0xe20   : > { %3403 = vmax.xlane.f32.xlu1 %v3388_v28 }
 0xe95   : > { %v3390_v37 = vpop.xlane.xlu0 %3389 }
 0xe96   : > { %v3405_v1 = vsub.f32 %v3381_v48, %v3390_v37 }
 0xe97   : > { %v3392_v61 = vpop.xlane.xlu1 %3391 }
 0xe98   : > { %v3413_v17 = vmul.f32 1.442695, %v3405_v1  ;;  %v3406_v62 = vsub.f32 %v3382_v50, %v3392_v61 }
 0xe99   : > { %v3394_v4 = vpop.xlane.xlu0 %3393 }
 0xe9a   : > { %6242 = vpow2.f32 %v3413_v17  ;;  %v3415_v21 = vmul.f32 1.442695, %v3406_v62  ;;  %v3407_v49 = vsub.f32 %v3383_v52, %v3394_v4 }
 0xe9c   : > { %6244 = vpow2.f32 %v3415_v21  ;;  %v3417_v43 = vmul.f32 1.442695, %v3407_v49 }
 0xe9d   : > { %v3396_v9 = vpop.xlane.xlu0 %3395 }
 0xe9e   : > { %6246 = vpow2.f32 %v3417_v43  ;;  %v3408_v26 = vsub.f32 %v3384_v42, %v3396_v9 }
 0xea0   : > { %v3419_v20 = vmul.f32 1.442695, %v3408_v26 }
 0xea2   : > { %6248 = vpow2.f32 %v3419_v20 }
 0xea4   : > { %v6243_v45 = vpop.eup %6242 }
 0xea5   : > { %3429 = vadd.xlane.f32.xlu0 %v6243_v45 }
 0xea6   : > { %v6245_v12 = vpop.eup %6244 }
 0xea7   : > { %3431 = vadd.xlane.f32.xlu1 %v6245_v12  ;;  %v3398_v48 = vpop.xlane.xlu0 %3397 }
 0xea8   : > { %v6247_v25 = vpop.eup %6246  ;;  %v3409_v37 = vsub.f32 %v3385_v15, %v3398_v48 }
 0xea9   : > { %3433 = vadd.xlane.f32.xlu0 %v6247_v25  ;;  %v3400_v61 = vpop.xlane.xlu1 %3399 }
 0xeaa   : > { %v3410_v17 = vsub.f32 %v3386_v63, %v3400_v61  ;;  %v3421_v62 = vmul.f32 1.442695, %v3409_v37 }
 0xeab   : > { %v3402_v21 = vpop.xlane.xlu0 %3401 }
 0xeac   : > { %v6249_v50 = vpop.eup %6248  ;;  %v3423_v49 = vmul.f32 1.442695, %v3410_v17  ;;  %6250 = vpow2.f32 %v3421_v62  ;;  %v3411_v52 = vsub.f32 %v3387_v33, %v3402_v21 }
 0xead   : > { %3435 = vadd.xlane.f32.xlu1 %v6249_v50  ;;  %v3404_v42 = vpop.xlane.xlu1 %3403 }
 0xeae   : > { %6252 = vpow2.f32 %v3423_v49  ;;  %v3412_v9 = vsub.f32 %v3388_v28, %v3404_v42  ;;  %v3425_v26 = vmul.f32 1.442695, %v3411_v52 }
 0xeb0   : > { %v3427_v1 = vmul.f32 1.442695, %v3412_v9  ;;  %6254 = vpow2.f32 %v3425_v26 }
 0xeb2   : > { %6256 = vpow2.f32 %v3427_v1 }
 0xeb6   : > { %v6251_v4 = vpop.eup %6250 }
 0xeb7   : > { %3437 = vadd.xlane.f32.xlu0 %v6251_v4 }
 0xeb8   : > { %v6253_v43 = vpop.eup %6252 }
 0xeb9   : > { %3439 = vadd.xlane.f32.xlu1 %v6253_v43 }
 0xeba   : > { %v6255_v15 = vpop.eup %6254 }
 0xebb   : > { %3441 = vadd.xlane.f32.xlu0 %v6255_v15 }
 0xebc   : > { %v6257_v63 = vpop.eup %6256 }
 0xebd   : > { %3443 = vadd.xlane.f32.xlu1 %v6257_v63 }
 0xf32   : > { %v3430_v20 = vpop.xlane.xlu0 %3429 }
 0xf33   : > { %v3445_v48 = vmax.f32 %v3430_v20, 1e-30 }
 0xf34   : > { %v3432_v37 = vpop.xlane.xlu1 %3431 }
 0xf35   : > { %6258 = vrcp.f32 %v3445_v48  ;;  %v3446_v33 = vmax.f32 %v3432_v37, 1e-30 }
 0xf36   : > { %v3434_v61 = vpop.xlane.xlu0 %3433 }
 0xf37   : > { %6260 = vrcp.f32 %v3446_v33  ;;  %v3447_v28 = vmax.f32 %v3434_v61, 1e-30 }
 0xf39   : > { %6262 = vrcp.f32 %v3447_v28 }
 0xf3a   : > { %v3436_v17 = vpop.xlane.xlu1 %3435 }
 0xf3b   : > { %v3448_v62 = vmax.f32 %v3436_v17, 1e-30 }
 0xf3d   : > { %6264 = vrcp.f32 %v3448_v62 }
 0xf3f   : > { %v6259_v21 = vpop.eup %6258 }
 0xf40   : > { %v3461_v52 = vmul.f32 %v6259_v21, %v6243_v45 }
 0xf41   : > { %v6261_v49 = vpop.eup %6260 }
 0xf42   : > { %v3462_v42 = vmul.f32 %v6261_v49, %v6245_v12 }
 0xf43   : > { %v6263_v26 = vpop.eup %6262 }
 0xf44   : > { %v3469_v9 = vpack.c.bf16 %v3462_v42, %v3461_v52  ;;  %v3438_v55 = vpop.xlane.xlu0 %3437  ;;  %v3463_v20 = vmul.f32 %v6263_v26, %v6247_v25 }
 0xf45   : > { %v3449_v48 = vmax.f32 %v3438_v55, 1e-30 }
 0xf46   : > { %5437 = vmatprep.mubr.bf16.mxu1 %v3469_v9  ;;  %v3440_v37 = vpop.xlane.xlu1 %3439 }
 0xf47   : > { %v6265_v1 = vpop.eup %6264  ;;  %6266 = vrcp.f32 %v3449_v48  ;;  %v3450_v33 = vmax.f32 %v3440_v37, 1e-30 }
 0xf48   : > { %v3464_v34 = vmul.f32 %v6265_v1, %v6249_v50  ;;  %v3442_v39 = vpop.xlane.xlu0 %3441 }
 0xf49   : > { %6268 = vrcp.f32 %v3450_v33  ;;  %v3451_v28 = vmax.f32 %v3442_v39, 1e-30 }
 0xf4a   : > { %v3470_v61 = vpack.c.bf16 %v3464_v34, %v3463_v20  ;;  %v3444_v17 = vpop.xlane.xlu1 %3443 }
 0xf4b   : > { %6270 = vrcp.f32 %v3451_v28  ;;  %v3452_v45 = vmax.f32 %v3444_v17, 1e-30 }
 0xf4c   : > { %5438 = vmatmul.mubr.bf16.vlgmr.msra.gmra.mrb[108].mxu1 %v3470_v61 }
 0xf4d   : > { %5446 = vmatpush3.bf16.msra.mxu1 %v6782_v6  ;;  %6272 = vrcp.f32 %v3452_v45 }
 0xf4e   : > { %5447 = vmatprep.subr.bf16.mxu1 %v6815_v27 }
 0xf51   : > { %5448 = vmatpush3.bf16.msra.mxu1 %v6815_v27  ;;  %v6267_v55 = vpop.eup %6266 }
 0xf52   : > { %5457 = vmatprep.subr.bf16.mxu1 %v6825_v44  ;;  %v3465_v25 = vmul.f32 %v6267_v55, %v6251_v4 }
 0xf53   : > { %v6269_v12 = vpop.eup %6268 }
 0xf54   : > { %v3466_v34 = vmul.f32 %v6269_v12, %v6253_v43 }
 0xf55   : > { %v6271_v50 = vpop.eup %6270 }
 0xf56   : > { %v3471_v62 = vpack.c.bf16 %v3466_v34, %v3465_v25  ;;  %v3467_v39 = vmul.f32 %v6271_v50, %v6255_v15 }
 0xf57   : > { %v6273_v21 = vpop.eup %6272 }
 0xf58   : > { %5441 = vmatprep.mubr.bf16.mxu1 %v3471_v62  ;;  %v3468_v49 = vmul.f32 %v6273_v21, %v6257_v63 }
 0xf5a   : > { %v3472_v6 = vpack.c.bf16 %v3468_v49, %v3467_v39 }
 0xf5c   : > { %5442 = vmatmul.mubr.bf16.gmra.mrb[112].mxu1 %v3472_v6 }
0x101f   : > { %v5439_v52 = vpop.f32.mrb[108].mxu1 }
0x1020   : > { %v3507_v42 = vpop.f32.mrb[109].mxu1 }
0x1021   : > { %v5440_v9 = vpop.f32.mrb[110].mxu1 }
0x1022   : > { %v5711_v26 = vpack.i.bf16 %v5440_v9, %v5439_v52  ;;  %v3510_v1 = vpop.f32.mrb[111].mxu1 }
0x1023   : > { %v5706_v27 = vpack.i.bf16 %v3510_v1, %v3507_v42 }
0x1024   : > { %5712 = vrot.lane.b32.xlu1 %v5711_v26, %s6511_s9 }
0x1025   : > { %5707 = vrot.lane.b32.xlu0 %v5706_v27, %s6511_s9 }
0x102f   : > { %v5443_v4 = vpop.f32.mrb[112].mxu1 }
0x1030   : > { %v3523_v43 = vpop.f32.mrb[113].mxu1 }
0x1031   : > { %v5444_v20 = vpop.f32.mrb[114].mxu1 }
0x1032   : > { %v5721_v48 = vpack.i.bf16 %v5444_v20, %v5443_v4  ;;  %v3526_v15 = vpop.f32.mrb[115].mxu1 }
0x1033   : > { %v5716_v37 = vpack.i.bf16 %v3526_v15, %v3523_v43 }
0x1035   : > { %5717 = vrot.lane.b32.xlu1 %v5716_v37, %s6511_s9 }
0x1039   : > { %5722 = vrot.lane.b32.xlu1 %v5721_v48, %s6511_s9  ;;  %v6442_v48 = vld [vmem:[%s7974_s3 + $0x60] ss:$0 sm:$0xff] }
0x1096   : > { %v5713_v63 = vpop.permute.xlu1 %5712 }
0x1097   : > { %v5715_v33 = vunpack.i.h.bf16 %v5713_v63  ;;  %v5714_v61 = vunpack.i.l.bf16 %v5713_v63  ;;  %v5708_v28 = vpop.permute.xlu0 %5707 }
0x1098   : > { %v5710_v17 = vunpack.i.h.bf16 %v5708_v28  ;;  %v5709_v45 = vunpack.i.l.bf16 %v5708_v28 }
0x1099   : > { %v3573_v55 = vsel %vm988_vm2, %v7632_v32, %v5715_v33  ;;  %v3572_v25 = vsel %vm988_vm2, %v7638_v2, %v5714_v61 }
0x109a   : > { %v3571_v12 = vsel %vm988_vm2, %v7636_v14, %v5710_v17  ;;  %v3570_v34 = vsel %vm988_vm2, %v7634_v54, %v5709_v45  ;;  %v3579_v62 = vpack.c.bf16 %v3573_v55, %v3572_v25 }
0x109b   : > { %v3578_v50 = vpack.c.bf16 %v3571_v12, %v3570_v34 }
0x109d   : > { %5449 = vmatprep.mubr.msk.bf16.mxu1 %vm1316_vm11, %v3578_v50  ;;  %5473 = vmatprep.mubr.msk.bf16.mxu0 %vm1316_vm11, %v3578_v50 }
0x109e   : > { %5450 = vmatmul.mubr.msk.bf16.vlgmr.msra.gmra.mrb[116].mxu1 %vm1316_vm11, %v3579_v62  ;;  %5474 = vmatmul.mubr.msk.bf16.vlgmr.msra.gmra.mrb[92].mxu0 %vm1316_vm11, %v3579_v62 }
0x109f   : > { %5494 = vmatpush3.bf16.xpose.msra.mxu0 %v6995_v16  ;;  %5458 = vmatpush3.bf16.msra.mxu1 %v6825_v44 }
0x10a0   : > { %5616 = vmatprep.subr.msk.bf16.mxu0 %vm988_vm2, %v6984_v57  ;;  %5459 = vmatprep.subr.bf16.mxu1 %v6838_v3 }
0x10a3   : > { %5460 = vmatpush3.bf16.msra.mxu1 %v6838_v3 }
0x10a4   : > { %5481 = vmatprep.subr.bf16.mxu1 %v6885_v41 }
0x10a7   : > { %5496 = vmatpush3.bf16.xpose.msra.mxu0 %v7020_v10  ;;  %v5718_v32 = vpop.permute.xlu1 %5717 }
0x10a8   : > { %5617 = vmatprep.subr.msk.bf16.mxu0 %vm988_vm2, %v7009_v24  ;;  %v5720_v54 = vunpack.i.h.bf16 %v5718_v32  ;;  %v5719_v14 = vunpack.i.l.bf16 %v5718_v32 }
0x10aa   : > { %v3575_v44 = vsel %vm988_vm2, %v7659_v7, %v5720_v54  ;;  %v3574_v16 = vsel %vm988_vm2, %v7657_v19, %v5719_v14  ;;  %v6443_v14 = vld [vmem:[%s7974_s3 + $0xb0] ss:$0 sm:$0xff] }
0x10ab   : > { %v3580_v2 = vpack.c.bf16 %v3575_v44, %v3574_v16  ;;  %v5723_v39 = vpop.permute.xlu1 %5722 }
0x10ac   : > { %v5725_v21 = vunpack.i.h.bf16 %v5723_v39  ;;  %v5724_v3 = vunpack.i.l.bf16 %v5723_v39 }
0x10ad   : > { %5453 = vmatprep.mubr.msk.bf16.mxu1 %vm1316_vm11, %v3580_v2  ;;  %5477 = vmatprep.mubr.msk.bf16.mxu0 %vm1316_vm11, %v3580_v2 }
0x10ae   : > { %v3577_v10 = vsel %vm988_vm2, %v7655_v18, %v5725_v21  ;;  %v3576_v49 = vsel %vm988_vm2, %v7661_v40, %v5724_v3 }
0x10af   : > { %5498 = vmatpush3.bf16.xpose.msra.mxu0 %v7039_v58  ;;  %v3581_v19 = vpack.c.bf16 %v3577_v10, %v3576_v49 }
0x10b0   : > { %5618 = vmatprep.subr.msk.bf16.mxu0 %vm988_vm2, %v7006_v22 }
0x10b1   : > { %5454 = vmatmul.mubr.msk.bf16.gmra.mrb[120].mxu1 %vm1316_vm11, %v3581_v19  ;;  %5478 = vmatmul.mubr.msk.bf16.gmra.mrb[96].mxu0 %vm1316_vm11, %v3581_v19 }
0x10b2   : > { %5461 = vmatprep.mubr.msk.bf16.mxu1 %vm1316_vm11, %v3578_v50 }
0x10b7   : > { %5500 = vmatpush3.bf16.xpose.msra.mxu0 %v7066_v29 }
0x10b8   : > { %5619 = vmatprep.subr.msk.bf16.mxu0 %vm988_vm2, %v7032_v53 }
0x10b9   : > { %5462 = vmatmul.mubr.msk.bf16.vlgmr.msra.gmra.mrb[124].mxu1 %vm1316_vm11, %v3579_v62 }
0x10ba   : > { %5482 = vmatpush3.bf16.msra.mxu1 %v6885_v41  ;;  %5465 = vmatprep.mubr.msk.bf16.mxu1 %vm1316_vm11, %v3580_v2 }
0x10bb   : > { %5483 = vmatprep.subr.bf16.mxu1 %v6912_v8 }
0x10be   : > { %5484 = vmatpush3.bf16.msra.mxu1 %v6912_v8 }
0x10bf   : > { %5502 = vmatpush3.bf16.xpose.msra.mxu0 %v7086_v59  ;;  %5517 = vmatprep.subr.bf16.mxu1 %v6986_v0 }
0x10c0   : > { %5620 = vmatprep.subr.msk.bf16.mxu0 %vm988_vm2, %v7029_v38 }
0x10c1   : > { %5466 = vmatmul.mubr.msk.bf16.gmra.mrb[128].mxu1 %vm1316_vm11, %v3581_v19 }
0x10c2   : > { %5485 = vmatprep.mubr.msk.bf16.mxu1 %vm1316_vm11, %v3578_v50 }
0x10c7   : > { %5504 = vmatpush3.bf16.xpose.msra.mxu0 %v7102_v31 }
0x10c8   : > { %5621 = vmatprep.subr.msk.bf16.mxu0 %vm988_vm2, %v7059_v23 }
0x10c9   : > { %5486 = vmatmul.mubr.msk.bf16.vlgmr.msra.gmra.mrb[132].mxu1 %vm1316_vm11, %v3579_v62 }
0x10ca   : > { %5518 = vmatpush3.bf16.msra.mxu1 %v6986_v0  ;;  %5489 = vmatprep.mubr.msk.bf16.mxu1 %vm1316_vm11, %v3580_v2 }
0x10cb   : > { %5519 = vmatprep.subr.bf16.mxu1 %v6984_v57 }
0x10ce   : > { %5520 = vmatpush3.bf16.msra.mxu1 %v6984_v57 }
0x10cf   : > { %5506 = vmatpush3.bf16.xpose.msra.mxu0 %v7111_v13  ;;  %5521 = vmatprep.subr.bf16.mxu1 %v7009_v24 }
0x10d0   : > { %5622 = vmatprep.subr.msk.bf16.mxu0 %vm988_vm2, %v7054_v47 }
0x10d1   : > { %5490 = vmatmul.mubr.msk.bf16.gmra.mrb[136].mxu1 %vm1316_vm11, %v3581_v19 }
0x10d2   : > { %5522 = vmatpush3.bf16.msra.mxu1 %v7009_v24 }
0x10d3   : > { %5523 = vmatprep.subr.bf16.mxu1 %v7006_v22 }
0x10d6   : > { %5524 = vmatpush3.bf16.msra.mxu1 %v7006_v22 }
0x10d7   : > { %5508 = vmatpush3.bf16.xpose.msra.mxu0 %v7134_v35  ;;  %5525 = vmatprep.subr.bf16.mxu1 %v7032_v53 }
0x10da   : > { %5526 = vmatpush3.bf16.msra.mxu1 %v7032_v53 }
0x10db   : > { %5527 = vmatprep.subr.bf16.mxu1 %v7029_v38 }
0x10de   : > { %5528 = vmatpush3.bf16.msra.mxu1 %v7029_v38 }
0x10df   : > { %5529 = vmatprep.subr.bf16.mxu1 %v7059_v23 }
0x10e2   : > { %5530 = vmatpush3.bf16.msra.mxu1 %v7059_v23 }
0x10e3   : > { %5531 = vmatprep.subr.bf16.mxu1 %v7054_v47 }
0x10e6   : > { %5532 = vmatpush3.bf16.msra.mxu1 %v7054_v47 }
0x1171   : > { %v5451_v41 = vpop.f32.mrb[116].mxu1  ;;  %v5475_v8 = vpop.f32.mrb[92].mxu0 }
0x1172   : > { %v3637_v57 = vadd.f32 %v7534_v46, %v5451_v41  ;;  %v3628_v0 = vpop.f32.mrb[117].mxu1  ;;  %v3758_v22 = vpop.f32.mrb[93].mxu0  ;;  %v3767_v18 = vadd.f32 %v7543_v51, %v5475_v8 }
0x1173   : > { %v3629_v24 = vadd.f32 %v7534_v46, %v3628_v0  ;;  %v5452_v53 = vpop.f32.mrb[118].mxu1  ;;  %v5476_v58 = vpop.f32.mrb[94].mxu0  ;;  %v3759_v7 = vadd.f32 %v7543_v51, %v3758_v22 }
0x1174   : > { %v4715_v29 = vmul.f32 -1.442695, %v3637_v57  ;;  %v3640_v38 = vadd.f32 %v7534_v46, %v5452_v53  ;;  %v3631_v59 = vpop.f32.mrb[119].mxu1  ;;  %v3761_v31 = vpop.f32.mrb[95].mxu0  ;;  %v3770_v40 = vadd.f32 %v7543_v51, %v5476_v58 }
0x1175   : > { %v4713_v23 = vmul.f32 -1.442695, %v3629_v24  ;;  %v3632_v13 = vadd.f32 %v7534_v46, %v3631_v59  ;;  %v3762_v46 = vadd.f32 %v7543_v51, %v3761_v31 }
0x1176   : > { %6274 = vpow2.f32 %v4715_v29  ;;  %v4716_v47 = vmul.f32 -1.442695, %v3640_v38  ;;  %v6444_v38 = vld [vmem:[%s7974_s3 + $0x88] ss:$0 sm:$0xff] }
0x1177   : > { %6276 = vpow2.f32 %v4713_v23  ;;  %v4714_v35 = vmul.f32 -1.442695, %v3632_v13 }
0x1178   : > { %6278 = vpow2.f32 %v4716_v47 }
0x1179   : > { %6280 = vpow2.f32 %v4714_v35 }
0x117a   : > { %6282 = vtanh.f32 %v3767_v18 }
0x117b   : > { %6284 = vtanh.f32 %v3759_v7 }
0x117c   : > { %6286 = vtanh.f32 %v3770_v40 }
0x1180   : > { %v6275_v6 = vpop.eup %6274 }
0x1181   : > { %v6277_v52 = vpop.eup %6276  ;;  %v3880_v42 = vadd.f32 1.0, %v6275_v6 }
0x1182   : > { %v6279_v9 = vpop.eup %6278  ;;  %v3878_v26 = vadd.f32 1.0, %v6277_v52 }
0x1183   : > { %6288 = vrcp.f32 %v3880_v42  ;;  %v3881_v1 = vadd.f32 1.0, %v6279_v9  ;;  %v6281_v27 = vpop.eup %6280 }
0x1184   : > { %6290 = vrcp.f32 %v3878_v26  ;;  %v3879_v4 = vadd.f32 1.0, %v6281_v27  ;;  %v5455_v43 = vpop.f32.mrb[120].mxu1  ;;  %v5479_v20 = vpop.f32.mrb[96].mxu0 }
0x1185   : > { %6292 = vrcp.f32 %v3881_v1  ;;  %v3653_v15 = vadd.f32 %v6442_v48, %v5455_v43  ;;  %v3644_v37 = vpop.f32.mrb[121].mxu1  ;;  %v3774_v63 = vpop.f32.mrb[97].mxu0  ;;  %v3783_v44 = vadd.f32 %v6443_v14, %v5479_v20 }
0x1186   : > { %6294 = vtanh.f32 %v3762_v46  ;;  %v3645_v33 = vadd.f32 %v6442_v48, %v3644_v37  ;;  %v5456_v61 = vpop.f32.mrb[122].mxu1  ;;  %v5480_v51 = vpop.f32.mrb[98].mxu0  ;;  %v3775_v21 = vadd.f32 %v6443_v14, %v3774_v63 }
0x1187   : > { %6296 = vrcp.f32 %v3879_v4  ;;  %v6283_v28 = vpop.eup %6282  ;;  %v4719_v17 = vmul.f32 -1.442695, %v3653_v15  ;;  %v3656_v45 = vadd.f32 %v6442_v48, %v5456_v61  ;;  %v3647_v55 = vpop.f32.mrb[123].mxu1  ;;  %v3786_v49 = vadd.f32 %v6443_v14, %v5480_v51 }
0x1188   : > { %v3777_v25 = vpop.f32.mrb[99].mxu0  ;;  %v6285_v12 = vpop.eup %6284  ;;  %v4717_v34 = vmul.f32 -1.442695, %v3645_v33  ;;  %v3648_v50 = vadd.f32 %v6442_v48, %v3647_v55 }
0x1189   : > { %v6287_v62 = vpop.eup %6286  ;;  %6298 = vpow2.f32 %v4719_v17  ;;  %v4720_v32 = vmul.f32 -1.442695, %v3656_v45  ;;  %v3778_v47 = vadd.f32 %v6443_v14, %v3777_v25 }
0x118a   : > { %6300 = vpow2.f32 %v4717_v34  ;;  %v4718_v16 = vmul.f32 -1.442695, %v3648_v50 }
0x118b   : > { %6302 = vpow2.f32 %v4720_v32 }
0x118c   : > { %v5463_v19 = vpop.f32.mrb[124].mxu1  ;;  %6304 = vpow2.f32 %v4718_v16 }
0x118d   : > { %v6289_v54 = vpop.eup %6288  ;;  %v3702_v57 = vadd.f32 %v7558_v11, %v5463_v19  ;;  %v3693_v0 = vpop.f32.mrb[125].mxu1  ;;  %6306 = vtanh.f32 %v3783_v44 }
0x118e   : > { %v6291_v2 = vpop.eup %6290  ;;  %v7784_v39 = vmul.f32 %v6289_v54, %v6283_v28  ;;  %v3694_v24 = vadd.f32 %v7558_v11, %v3693_v0  ;;  %v5464_v53 = vpop.f32.mrb[126].mxu1  ;;  %6308 = vtanh.f32 %v3775_v21  ;;  %v7803_v0 = vld [vmem:[%s7974_s3 + $0xd8] ss:$0 sm:$0xff] }
0x118f   : > { %v6293_v3 = vpop.eup %6292  ;;  %v7786_v10 = vmul.f32 %v6291_v2, %v6285_v12  ;;  %v4723_v29 = vmul.f32 -1.442695, %v3702_v57  ;;  %v3705_v59 = vadd.f32 %v6444_v38, %v5464_v53  ;;  %v3696_v31 = vpop.f32.mrb[127].mxu1  ;;  %6310 = vtanh.f32 %v3786_v49 }
0x1190   : > { %v6295_v41 = vpop.eup %6294  ;;  %v7788_v8 = vmul.f32 %v6293_v3, %v6287_v62  ;;  %v4721_v23 = vmul.f32 -1.442695, %v3694_v24  ;;  %v3697_v13 = vadd.f32 %v6444_v38, %v3696_v31 }
0x1191   : > { %v6297_v22 = vpop.eup %6296  ;;  %6312 = vpow2.f32 %v4723_v29  ;;  %v4724_v35 = vmul.f32 -1.442695, %v3705_v59 }
0x1192   : > { %v7792_v58 = vmul.f32 %v6297_v22, %v6295_v41  ;;  %6314 = vpow2.f32 %v4721_v23  ;;  %v4722_v18 = vmul.f32 -1.442695, %v3697_v13 }
0x1193   : > { %v6299_v11 = vpop.eup %6298  ;;  %6316 = vpow2.f32 %v4724_v35 }
0x1194   : > { %v6301_v7 = vpop.eup %6300  ;;  %v3884_v40 = vadd.f32 1.0, %v6299_v11  ;;  %6318 = vpow2.f32 %v4722_v18  ;;  %v5467_v6 = vpop.f32.mrb[128].mxu1 }
0x1195   : > { %v6303_v52 = vpop.eup %6302  ;;  %v3882_v42 = vadd.f32 1.0, %v6301_v7  ;;  %6320 = vtanh.f32 %v3778_v47  ;;  %v3718_v9 = vadd.f32 %v6444_v38, %v5467_v6  ;;  %v3709_v26 = vpop.f32.mrb[129].mxu1 }
0x1196   : > { %6322 = vrcp.f32 %v3884_v40  ;;  %v3885_v46 = vadd.f32 1.0, %v6303_v52  ;;  %v3710_v1 = vadd.f32 %v6444_v38, %v3709_v26  ;;  %v5468_v27 = vpop.f32.mrb[130].mxu1  ;;  %v6305_v4 = vpop.eup %6304 }
0x1197   : > { %6324 = vrcp.f32 %v3882_v42  ;;  %v4727_v43 = vmul.f32 -1.442695, %v3718_v9  ;;  %v3721_v20 = vadd.f32 %v6444_v38, %v5468_v27  ;;  %v3712_v48 = vpop.f32.mrb[131].mxu1  ;;  %v6307_v15 = vpop.eup %6306  ;;  %v3883_v37 = vadd.f32 1.0, %v6305_v4 }
0x1198   : > { %6326 = vrcp.f32 %v3885_v46  ;;  %v4725_v63 = vmul.f32 -1.442695, %v3710_v1  ;;  %v3713_v33 = vadd.f32 %v6444_v38, %v3712_v48  ;;  %v6309_v61 = vpop.eup %6308 }
0x1199   : > { %6328 = vpow2.f32 %v4727_v43  ;;  %v4728_v51 = vmul.f32 -1.442695, %v3721_v20  ;;  %v6311_v28 = vpop.eup %6310 }
0x119a   : > { %6330 = vrcp.f32 %v3883_v37  ;;  %v4726_v17 = vmul.f32 -1.442695, %v3713_v33 }
0x119b   : > { %v6313_v45 = vpop.eup %6312  ;;  %6332 = vpow2.f32 %v4725_v63 }
0x119c   : > { %v6315_v55 = vpop.eup %6314  ;;  %v3928_v25 = vadd.f32 1.0, %v6313_v45  ;;  %6334 = vpow2.f32 %v4728_v51  ;;  %v5487_v12 = vpop.f32.mrb[132].mxu1 }
0x119d   : > { %v6317_v34 = vpop.eup %6316  ;;  %v3926_v50 = vadd.f32 1.0, %v6315_v55  ;;  %6336 = vpow2.f32 %v4726_v17  ;;  %v3832_v62 = vadd.f32 %v7579_v36, %v5487_v12  ;;  %v3823_v32 = vpop.f32.mrb[133].mxu1 }
0x119e   : > { %v6319_v54 = vpop.eup %6318  ;;  %6338 = vrcp.f32 %v3928_v25  ;;  %v3929_v14 = vadd.f32 1.0, %v6317_v34  ;;  %v3824_v44 = vadd.f32 %v7579_v36, %v3823_v32  ;;  %v5488_v16 = vpop.f32.mrb[134].mxu1 }
0x119f   : > { %v6321_v2 = vpop.eup %6320  ;;  %6340 = vrcp.f32 %v3926_v50  ;;  %v3927_v21 = vadd.f32 1.0, %v6319_v54  ;;  %v4731_v3 = vmul.f32 -1.442695, %v3832_v62  ;;  %v3835_v49 = vadd.f32 %v7579_v36, %v5488_v16  ;;  %v3826_v19 = vpop.f32.mrb[135].mxu1  ;;  %v8049_v16 = vld [vmem:[#allocation16_spill] sm:$0xff] }
0x11a0   : > { %v6323_v41 = vpop.eup %6322  ;;  %6342 = vrcp.f32 %v3929_v14  ;;  %v4729_v57 = vmul.f32 -1.442695, %v3824_v44  ;;  %v3827_v22 = vadd.f32 %v7803_v0, %v3826_v19 }
0x11a1   : > { %v6325_v24 = vpop.eup %6324  ;;  %v7806_v53 = vmul.f32 %v6323_v41, %v6307_v15  ;;  %6344 = vrcp.f32 %v3927_v21  ;;  %v4732_v29 = vmul.f32 -1.442695, %v3835_v49  ;;  %v8050_v21 = vld [vmem:[#allocation17_spill] sm:$0xff] }
0x11a2   : > { %v6327_v38 = vpop.eup %6326  ;;  %v7808_v59 = vmul.f32 %v6325_v24, %v6309_v61  ;;  %6346 = vpow2.f32 %v4731_v3  ;;  %v4730_v36 = vmul.f32 -1.442695, %v3827_v22 }
0x11a3   : > { %v6329_v31 = vpop.eup %6328  ;;  %v7810_v23 = vmul.f32 %v6327_v38, %v6311_v28  ;;  %6348 = vpow2.f32 %v4729_v57  ;;  %v8051_v57 = vld [vmem:[#allocation6_spill] sm:$0xff] }
0x11a4   : > { %v6331_v13 = vpop.eup %6330  ;;  %v3932_v47 = vadd.f32 1.0, %v6329_v31  ;;  %6350 = vpow2.f32 %v4732_v29  ;;  %v5491_v35 = vpop.f32.mrb[136].mxu1 }
0x11a5   : > { %v6333_v18 = vpop.eup %6332  ;;  %v7812_v11 = vmul.f32 %v6331_v13, %v6321_v2  ;;  %6352 = vpow2.f32 %v4730_v36  ;;  %v3848_v7 = vadd.f32 %v7803_v0, %v5491_v35  ;;  %v3839_v40 = vpop.f32.mrb[137].mxu1 }
0x11a6   : > { %v6335_v6 = vpop.eup %6334  ;;  %6354 = vrcp.f32 %v3932_v47  ;;  %v3930_v52 = vadd.f32 1.0, %v6333_v18  ;;  %v3840_v42 = vadd.f32 %v7803_v0, %v3839_v40  ;;  %v5492_v9 = vpop.f32.mrb[138].mxu1 }
0x11a7   : > { %v6337_v26 = vpop.eup %6336  ;;  %v3933_v46 = vadd.f32 1.0, %v6335_v6  ;;  %v4735_v1 = vmul.f32 -1.442695, %v3848_v7  ;;  %v3842_v27 = vpop.f32.mrb[139].mxu1 }
0x11a8   : > { %v6339_v4 = vpop.eup %6338  ;;  %6356 = vrcp.f32 %v3930_v52  ;;  %v3931_v43 = vadd.f32 1.0, %v6337_v26  ;;  %v4733_v20 = vmul.f32 -1.442695, %v3840_v42  ;;  %v3843_v49 = vadd.f32 %v7803_v0, %v3842_v27 }
0x11a9   : > { %v6341_v48 = vpop.eup %6340  ;;  %v4008_v15 = vmul.f32 %v6339_v4, %v7595_v5  ;;  %6358 = vrcp.f32 %v3933_v46 }
0x11aa   : > { %v6343_v37 = vpop.eup %6342  ;;  %v4006_v63 = vmul.f32 %v6341_v48, %v7599_v56  ;;  %6360 = vrcp.f32 %v3931_v43  ;;  %v4734_v47 = vmul.f32 -1.442695, %v3843_v49 }
0x11ab   : > { %v6345_v33 = vpop.eup %6344  ;;  %v4024_v61 = vadd.f32 %v7784_v39, %v4008_v15  ;;  %v4009_v51 = vmul.f32 %v6343_v37, %v7604_v60  ;;  %6362 = vpow2.f32 %v4735_v1  ;;  %v3851_v39 = vadd.f32 %v7803_v0, %v5492_v9 }
0x11ac   : > { %v6347_v28 = vpop.eup %6346  ;;  %v4022_v17 = vadd.f32 %v7786_v10, %v4006_v63  ;;  %v4007_v45 = vmul.f32 %v6345_v33, %v7609_v30  ;;  %6364 = vpow2.f32 %v4733_v20  ;;  %v8048_v30 = vld [vmem:[#allocation15_spill] sm:$0xff] }
0x11ad   : > { %v6349_v55 = vpop.eup %6348  ;;  %6366 = vtanh.f32 %v4024_v61  ;;  %v4025_v5 = vadd.f32 %v7788_v8, %v4009_v51  ;;  %v3984_v25 = vadd.f32 1.0, %v6347_v28  ;;  %v4736_v8 = vmul.f32 -1.442695, %v3851_v39 }
0x11ae   : > { %v6351_v12 = vpop.eup %6350  ;;  %6368 = vtanh.f32 %v4022_v17  ;;  %v4023_v56 = vadd.f32 %v7792_v58, %v4007_v45  ;;  %v3982_v34 = vadd.f32 1.0, %v6349_v55 }
0x11af   : > { %v6353_v60 = vpop.eup %6352  ;;  %6370 = vtanh.f32 %v4025_v5  ;;  %v3985_v50 = vadd.f32 1.0, %v6351_v12 }
0x11b0   : > { %v6355_v62 = vpop.eup %6354  ;;  %6372 = vtanh.f32 %v4023_v56  ;;  %v3983_v10 = vadd.f32 1.0, %v6353_v60 }
0x11b1   : > { %v4012_v32 = vmul.f32 %v6355_v62, %v8048_v30  ;;  %6374 = vrcp.f32 %v3984_v25 }
0x11b2   : > { %v6357_v54 = vpop.eup %6356  ;;  %6376 = vrcp.f32 %v3982_v34 }
0x11b3   : > { %v6359_v14 = vpop.eup %6358  ;;  %v4028_v44 = vadd.f32 %v7806_v53, %v4012_v32  ;;  %v4010_v58 = vmul.f32 %v6357_v54, %v8049_v16  ;;  %6378 = vrcp.f32 %v3985_v50 }
0x11b4   : > { %v6361_v2 = vpop.eup %6360  ;;  %v4013_v3 = vmul.f32 %v6359_v14, %v8050_v21  ;;  %6380 = vrcp.f32 %v3983_v10 }
0x11b5   : > { %v6363_v19 = vpop.eup %6362  ;;  %v4026_v41 = vadd.f32 %v7808_v59, %v4010_v58  ;;  %v4011_v22 = vmul.f32 %v6361_v2, %v8051_v57  ;;  %6382 = vpow2.f32 %v4736_v8 }
0x11b6   : > { %v6365_v24 = vpop.eup %6364  ;;  %v4029_v29 = vadd.f32 %v7810_v23, %v4013_v3  ;;  %v3988_v38 = vadd.f32 1.0, %v6363_v19  ;;  %6384 = vtanh.f32 %v4028_v44 }
0x11b7   : > { %v6367_v53 = vpop.eup %6366  ;;  %v4027_v36 = vadd.f32 %v7812_v11, %v4011_v22  ;;  %v3986_v31 = vadd.f32 1.0, %v6365_v24  ;;  %6386 = vtanh.f32 %v4026_v41 }
0x11b8   : > { %v6369_v13 = vpop.eup %6368  ;;  %6388 = vrcp.f32 %v3988_v38 }
0x11b9   : > { %v6371_v35 = vpop.eup %6370  ;;  %6390 = vrcp.f32 %v3986_v31 }
0x11ba   : > { %v6373_v0 = vpop.eup %6372  ;;  %6392 = vpow2.f32 %v4734_v47 }
0x11bb   : > { %v6375_v18 = vpop.eup %6374  ;;  %6394 = vtanh.f32 %v4029_v29 }
0x11bc   : > { %v6377_v59 = vpop.eup %6376  ;;  %v7834_v7 = vmul.f32 %v6375_v18, %v6367_v53 }
0x11bd   : > { %v6379_v23 = vpop.eup %6378  ;;  %v7836_v40 = vmul.f32 %v6377_v59, %v6369_v13 }
0x11be   : > { %v6381_v6 = vpop.eup %6380  ;;  %v7838_v52 = vmul.f32 %v6379_v23, %v6371_v35 }
0x11bf   : > { %v7840_v11 = vmul.f32 %v6381_v6, %v6373_v0  ;;  %v6383_v42 = vpop.eup %6382 }
0x11c0   : > { %v3989_v9 = vadd.f32 1.0, %v6383_v42  ;;  %v6385_v46 = vpop.eup %6384  ;;  %v4047_v1 = vpack.c.bf16 %v7838_v52, %v7834_v7 }
0x11c1   : > { %v4046_v26 = vpack.c.bf16 %v7840_v11, %v7836_v40  ;;  %v6387_v27 = vpop.eup %6386 }
0x11c2   : > { %6396 = vrcp.f32 %v3989_v9  ;;  %v6389_v4 = vpop.eup %6388 }
0x11c3   : > { %5509 = vmatprep.mubr.msk.bf16.mxu0 %vm988_vm2, %v4046_v26  ;;  %v6391_v43 = vpop.eup %6390  ;;  %v7848_v20 = vmul.f32 %v6389_v4, %v6385_v46  ;;  %6398 = vtanh.f32 %v4027_v36 }
0x11c4   : > { %5510 = vmatmul.mubr.msk.bf16.vlgmr.msra.gmra.mrb[100].mxu0 %vm988_vm2, %v4047_v1  ;;  %v6393_v48 = vpop.eup %6392  ;;  %v7850_v15 = vmul.f32 %v6391_v43, %v6387_v27 }
0x11c5   : > { %v3987_v37 = vadd.f32 1.0, %v6393_v48  ;;  %v6395_v63 = vpop.eup %6394 }
0x11c7   : > { %6400 = vrcp.f32 %v3987_v37 }
0x11cc   : > { %v6397_v33 = vpop.eup %6396 }
0x11cd   : > { %v7852_v61 = vmul.f32 %v6397_v33, %v6395_v63  ;;  %v6399_v51 = vpop.eup %6398 }
0x11cf   : > { %v4049_v55 = vpack.c.bf16 %v7852_v61, %v7848_v20 }
0x11d1   : > { %v6401_v28 = vpop.eup %6400 }
0x11d2   : > { %v7854_v17 = vmul.f32 %v6401_v28, %v6399_v51 }
0x11d4   : > { %v4048_v45 = vpack.c.bf16 %v7854_v17, %v7850_v15 }
0x11d6   : > { %5513 = vmatprep.mubr.msk.bf16.mxu0 %vm988_vm2, %v4048_v45 }
0x11d7   : > { %5514 = vmatmul.mubr.msk.bf16.gmra.mrb[104].mxu0 %vm988_vm2, %v4049_v55 }
0x1297   : > { %v5511_v5 = vpop.f32.mrb[100].mxu0 }
0x1298   : > { %v4096_v25 = vpop.f32.mrb[101].mxu0  ;;  %v4129_v10 = vsel %vm1305_vm5, %v5511_v5, -1e+30 }
0x1299   : > { %v5512_v12 = vpop.f32.mrb[102].mxu0  ;;  %v4127_v34 = vsel %vm1303_vm3, %v4096_v25, -1e+30 }
0x129a   : > { %4135 = vmax.xlane.f32.xlu0 %v4127_v34  ;;  %v4099_v39 = vpop.f32.mrb[103].mxu0  ;;  %v4130_v32 = vsel %vm1306_vm6, %v5512_v12, -1e+30 }
0x129b   : > { %v4128_v50 = vsel %vm1304_vm4, %v4099_v39, -1e+30 }
0x129c   : > { %4137 = vmax.xlane.f32.xlu1 %v4128_v50 }
0x129e   : > { %4139 = vmax.xlane.f32.xlu0 %v4129_v10 }
0x12a2   : > { %4141 = vmax.xlane.f32.xlu0 %v4130_v32 }
0x12aa   : > { %v5515_v54 = vpop.f32.mrb[104].mxu0 }
0x12ab   : > { %v4112_v8 = vpop.f32.mrb[105].mxu0  ;;  %v4133_v49 = vsel %vm1309_vm9, %v5515_v54, -1e+30 }
0x12ac   : > { %v5516_v14 = vpop.f32.mrb[106].mxu0  ;;  %v4131_v16 = vsel %vm1307_vm7, %v4112_v8, -1e+30 }
0x12ad   : > { %v4115_v58 = vpop.f32.mrb[107].mxu0  ;;  %4143 = vmax.xlane.f32.xlu0 %v4131_v16  ;;  %v4134_v41 = vsel %vm1310_vm10, %v5516_v14, -1e+30 }
0x12ae   : > { %v4132_v21 = vsel %vm1308_vm8, %v4115_v58, -1e+30 }
0x12af   : > { %4145 = vmax.xlane.f32.xlu1 %v4132_v21 }
0x12b1   : > { %4147 = vmax.xlane.f32.xlu0 %v4133_v49 }
0x12b3   : > { %4149 = vmax.xlane.f32.xlu1 %v4134_v41 }
0x1327   : > { %v4136_v57 = vpop.xlane.xlu0 %4135 }
0x1328   : > { %v4151_v22 = vsub.f32 %v4127_v34, %v4136_v57 }
0x1329   : > { %v4138_v24 = vpop.xlane.xlu1 %4137 }
0x132a   : > { %v4159_v29 = vmul.f32 1.442695, %v4151_v22  ;;  %v4152_v38 = vsub.f32 %v4128_v50, %v4138_v24 }
0x132b   : > { %v4140_v53 = vpop.xlane.xlu0 %4139 }
0x132c   : > { %6402 = vpow2.f32 %v4159_v29  ;;  %v4161_v36 = vmul.f32 1.442695, %v4152_v38  ;;  %v4153_v31 = vsub.f32 %v4129_v10, %v4140_v53 }
0x132e   : > { %6404 = vpow2.f32 %v4161_v36  ;;  %v4163_v13 = vmul.f32 1.442695, %v4153_v31 }
0x132f   : > { %v4142_v47 = vpop.xlane.xlu0 %4141 }
0x1330   : > { %6406 = vpow2.f32 %v4163_v13  ;;  %v4154_v35 = vsub.f32 %v4130_v32, %v4142_v47 }
0x1332   : > { %v4165_v0 = vmul.f32 1.442695, %v4154_v35 }
0x1334   : > { %6408 = vpow2.f32 %v4165_v0 }
0x1336   : > { %v6403_v18 = vpop.eup %6402 }
0x1337   : > { %4175 = vadd.xlane.f32.xlu0 %v6403_v18 }
0x1338   : > { %v6405_v59 = vpop.eup %6404 }
0x1339   : > { %4177 = vadd.xlane.f32.xlu1 %v6405_v59 }
0x133a   : > { %v6407_v23 = vpop.eup %6406  ;;  %v4144_v6 = vpop.xlane.xlu0 %4143 }
0x133b   : > { %4179 = vadd.xlane.f32.xlu0 %v6407_v23  ;;  %v4155_v42 = vsub.f32 %v4131_v16, %v4144_v6  ;;  %v4330_v6 = vld [vmem:[%s7975_s4 + $0x10] sm:$0xff] }
0x133c   : > { %v4146_v26 = vpop.xlane.xlu1 %4145 }
0x133d   : > { %v4156_v46 = vsub.f32 %v4132_v21, %v4146_v26  ;;  %v4167_v1 = vmul.f32 1.442695, %v4155_v42  ;;  %v4331_v42 = vld [vmem:[%s7975_s4 + $0x18] sm:$0xff] }
0x133e   : > { %v6409_v9 = vpop.eup %6408  ;;  %v4148_v27 = vpop.xlane.xlu0 %4147 }
0x133f   : > { %4181 = vadd.xlane.f32.xlu1 %v6409_v9  ;;  %v4169_v4 = vmul.f32 1.442695, %v4156_v46  ;;  %6410 = vpow2.f32 %v4167_v1  ;;  %v4157_v43 = vsub.f32 %v4133_v49, %v4148_v27 }
0x1340   : > { %v4150_v48 = vpop.xlane.xlu1 %4149 }
0x1341   : > { %6412 = vpow2.f32 %v4169_v4  ;;  %v4158_v37 = vsub.f32 %v4134_v41, %v4150_v48  ;;  %v4171_v63 = vmul.f32 1.442695, %v4157_v43 }
0x1343   : > { %v4173_v33 = vmul.f32 1.442695, %v4158_v37  ;;  %6414 = vpow2.f32 %v4171_v63 }
0x1345   : > { %6416 = vpow2.f32 %v4173_v33 }
0x1349   : > { %v6411_v51 = vpop.eup %6410 }
0x134a   : > { %4183 = vadd.xlane.f32.xlu0 %v6411_v51 }
0x134b   : > { %v6413_v28 = vpop.eup %6412 }
0x134c   : > { %4185 = vadd.xlane.f32.xlu1 %v6413_v28 }
0x134d   : > { %v6415_v45 = vpop.eup %6414 }
0x134e   : > { %4187 = vadd.xlane.f32.xlu0 %v6415_v45 }
0x134f   : > { %v6417_v55 = vpop.eup %6416 }
0x1350   : > { %4189 = vadd.xlane.f32.xlu1 %v6417_v55 }
0x13c4   : > { %v4176_v5 = vpop.xlane.xlu0 %4175 }
0x13c5   : > { %v4191_v25 = vmax.f32 %v4176_v5, 1e-30 }
0x13c6   : > { %v4178_v12 = vpop.xlane.xlu1 %4177 }
0x13c7   : > { %6418 = vrcp.f32 %v4191_v25  ;;  %v4192_v56 = vmax.f32 %v4178_v12, 1e-30 }
0x13c8   : > { %v4180_v34 = vpop.xlane.xlu0 %4179 }
0x13c9   : > { %6420 = vrcp.f32 %v4192_v56  ;;  %v4193_v39 = vmax.f32 %v4180_v34, 1e-30 }
0x13cb   : > { %6422 = vrcp.f32 %v4193_v39 }
0x13cc   : > { %v4182_v60 = vpop.xlane.xlu1 %4181 }
0x13cd   : > { %v4194_v50 = vmax.f32 %v4182_v60, 1e-30 }
0x13cf   : > { %6424 = vrcp.f32 %v4194_v50 }
0x13d1   : > { %v6419_v62 = vpop.eup %6418 }
0x13d2   : > { %v4207_v30 = vmul.f32 %v6419_v62, %v6403_v18  ;;  %v4328_v18 = vld [vmem:[%s7975_s4] sm:$0xff] }
0x13d3   : > { %v6421_v10 = vpop.eup %6420 }
0x13d4   : > { %v4208_v32 = vmul.f32 %v6421_v10, %v6405_v59  ;;  %v4329_v59 = vld [vmem:[%s7975_s4 + $0x8] sm:$0xff] }
0x13d5   : > { %v6423_v8 = vpop.eup %6422 }
0x13d6   : > { %v4215_v54 = vpack.c.bf16 %v4208_v32, %v4207_v30  ;;  %v4209_v16 = vmul.f32 %v6423_v8, %v6407_v23  ;;  %v4332_v23 = vpack.c.bf16 %v4329_v59, %v4328_v18 }
0x13d7   : > { %v4184_v44 = vpop.xlane.xlu0 %4183 }
0x13d8   : > { %5533 = vmatprep.mubr.bf16.mxu1 %v4215_v54  ;;  %v4195_v2 = vmax.f32 %v4184_v44, 1e-30  ;;  %5541 = vmatprep.subr.bf16.mxu1 %v4332_v23 }
0x13d9   : > { %v6425_v14 = vpop.eup %6424  ;;  %v4186_v21 = vpop.xlane.xlu1 %4185 }
0x13da   : > { %v4210_v58 = vmul.f32 %v6425_v14, %v6409_v9  ;;  %6426 = vrcp.f32 %v4195_v2  ;;  %v4196_v3 = vmax.f32 %v4186_v21, 1e-30  ;;  %v4333_v9 = vpack.c.bf16 %v4331_v42, %v4330_v6 }
0x13db   : > { %v4188_v19 = vpop.xlane.xlu0 %4187 }
0x13dc   : > { %v4216_v49 = vpack.c.bf16 %v4210_v58, %v4209_v16  ;;  %6428 = vrcp.f32 %v4196_v3  ;;  %v4197_v41 = vmax.f32 %v4188_v19, 1e-30 }
0x13dd   : > { %v4190_v57 = vpop.xlane.xlu1 %4189 }
0x13de   : > { %5534 = vmatmul.mubr.bf16.vlgmr.msra.gmra.mrb[140].mxu1 %v4216_v49  ;;  %6430 = vrcp.f32 %v4197_v41  ;;  %v4198_v22 = vmax.f32 %v4190_v57, 1e-30 }
0x13df   : > { %5542 = vmatpush3.bf16.msra.mxu1 %v4332_v23 }
0x13e0   : > { %6432 = vrcp.f32 %v4198_v22  ;;  %5543 = vmatprep.subr.bf16.mxu1 %v4333_v9 }
0x13e3   : > { %5544 = vmatpush3.bf16.msra.mxu1 %v4333_v9 }
0x13e4   : > { %v6427_v24 = vpop.eup %6426 }
0x13e5   : > { %v4211_v29 = vmul.f32 %v6427_v24, %v6411_v51 }
0x13e6   : > { %v6429_v38 = vpop.eup %6428 }
0x13e7   : > { %v4212_v53 = vmul.f32 %v6429_v38, %v6413_v28 }
0x13e8   : > { %v6431_v36 = vpop.eup %6430 }
0x13e9   : > { %v4217_v31 = vpack.c.bf16 %v4212_v53, %v4211_v29  ;;  %v4213_v13 = vmul.f32 %v6431_v36, %v6415_v45 }
0x13ea   : > { %v6433_v47 = vpop.eup %6432 }
0x13eb   : > { %5537 = vmatprep.mubr.bf16.mxu1 %v4217_v31  ;;  %v4214_v35 = vmul.f32 %v6433_v47, %v6417_v55 }
0x13ed   : > { %v4218_v0 = vpack.c.bf16 %v4214_v35, %v4213_v13 }
0x13ef   : > { %5538 = vmatmul.mubr.bf16.gmra.mrb[144].mxu1 %v4218_v0 }
0x14b1   : > { %v5535_v26 = vpop.f32.mrb[140].mxu1 }
0x14b2   : > { %v4253_v46 = vpop.f32.mrb[141].mxu1 }
0x14b3   : > { %v5536_v1 = vpop.f32.mrb[142].mxu1 }
0x14b4   : > { %v5731_v27 = vpack.i.bf16 %v5536_v1, %v5535_v26  ;;  %v4256_v4 = vpop.f32.mrb[143].mxu1 }
0x14b5   : > { %v5726_v43 = vpack.i.bf16 %v4256_v4, %v4253_v46 }
0x14b6   : > { %5732 = vrot.lane.b32.xlu1 %v5731_v27, %s6511_s9 }
0x14b7   : > { %5727 = vrot.lane.b32.xlu0 %v5726_v43, %s6511_s9 }
0x14c2   : > { %v5539_v48 = vpop.f32.mrb[144].mxu1 }
0x14c3   : > { %v4269_v37 = vpop.f32.mrb[145].mxu1 }
0x14c4   : > { %v5540_v63 = vpop.f32.mrb[146].mxu1 }
0x14c5   : > { %v5741_v33 = vpack.i.bf16 %v5540_v63, %v5539_v48  ;;  %v4272_v51 = vpop.f32.mrb[147].mxu1 }
0x14c6   : > { %v5736_v28 = vpack.i.bf16 %v4272_v51, %v4269_v37 }
0x14c8   : > { %5737 = vrot.lane.b32.xlu1 %v5736_v28, %s6511_s9 }
0x14cc   : > { %5742 = vrot.lane.b32.xlu1 %v5741_v33, %s6511_s9  ;;  %s245_s9 = sand.u32 1, %s6500_s19  }
0x14cd   : > { %s4528_s23 = sshll.u32 %s245_s9, 6  ;;  %s7930_s22 = scalar_lea.sflag [#allocation3], %s245_s9 }
0x14ce   : > { %s247_s30 = scalar_lea.vmem [#allocation2], %s4528_s23 }
0x14cf   : > { %s4438_s7 = sshll.u32 %s247_s30, 4  ;;  %s7926_s7 = int_to_ptr.vmem [resolvable:$true] %s4438_s7 }
0x14d0   : > { %s6446_s12 = scalar_lea.vmem %s7926_s7, 1024  ;;  %p6453_p0 = scmp.lt.s32.totalorder %s7926_s7, %s6451_s15 }
0x14d1   : > { %p6447_p11 = scmp.ne.s32.totalorder %s7926_s7, %s6446_s12  ;;  %p6454_p1 = scmp.lt.s32.totalorder %s6452_s16, %s6446_s12 }
0x14d3   : > { %p6448_p12 = pnand %p6447_p11, %p6583_p5  ;;  %p6455_p2 = por %p6454_p1, %p6453_p0 }
0x14d5   : > { %p6449_p13 = pneg %p6448_p12 }
0x14d7   : > { %p6456_p3 = pnand %p6455_p2, %p6449_p13 }
0x1528   : > { %v5733_v45 = vpop.permute.xlu1 %5732 }
0x1529   : > { %v5735_v55 = vunpack.i.h.bf16 %v5733_v45  ;;  %v5734_v5 = vunpack.i.l.bf16 %v5733_v45  ;;  %v5728_v25 = vpop.permute.xlu0 %5727 }
0x152a   : > { %v5730_v12 = vunpack.i.h.bf16 %v5728_v25  ;;  %v5729_v56 = vunpack.i.l.bf16 %v5728_v25 }
0x152b   : > { %v4319_v34 = vsel %vm988_vm2, %v7838_v52, %v5735_v55  ;;  %v4318_v39 = vsel %vm988_vm2, %v7834_v7, %v5734_v5 }
0x152c   : > { %v4317_v60 = vsel %vm988_vm2, %v7840_v11, %v5730_v12  ;;  %v4316_v50 = vsel %vm988_vm2, %v7836_v40, %v5729_v56  ;;  %v4325_v10 = vpack.c.bf16 %v4319_v34, %v4318_v39 }
0x152d   : > { %v4324_v62 = vpack.c.bf16 %v4317_v60, %v4316_v50 }
0x152f   : > { %5545 = vmatprep.mubr.msk.bf16.mxu1 %vm1316_vm11, %v4324_v62 }
0x1530   : > { %5546 = vmatmul.mubr.msk.bf16.vlgmr.msra.gmra.mrb[148].mxu1 %vm1316_vm11, %v4325_v10 }
0x153a   : > { %v5738_v30 = vpop.permute.xlu1 %5737 }
0x153b   : > { %v5740_v32 = vunpack.i.h.bf16 %v5738_v30  ;;  %v5739_v52 = vunpack.i.l.bf16 %v5738_v30 }
0x153d   : > { %v4321_v7 = vsel %vm988_vm2, %v7854_v17, %v5740_v32  ;;  %v4320_v11 = vsel %vm988_vm2, %v7850_v15, %v5739_v52  ;;  %v4741_v15 = vld [vmem:[%s7975_s4 + $0x20] ss:$0 sm:$0xff] }
0x153e   : > { %v4326_v54 = vpack.c.bf16 %v4321_v7, %v4320_v11  ;;  %v5743_v8 = vpop.permute.xlu1 %5742 }
0x153f   : > { %v5745_v40 = vunpack.i.h.bf16 %v5743_v8  ;;  %v5744_v14 = vunpack.i.l.bf16 %v5743_v8 }
0x1540   : > { %5549 = vmatprep.mubr.msk.bf16.mxu1 %vm1316_vm11, %v4326_v54 }
0x1541   : > { %v4323_v44 = vsel %vm988_vm2, %v7852_v61, %v5745_v40  ;;  %v4322_v16 = vsel %vm988_vm2, %v7848_v20, %v5744_v14 }
0x1542   : > { %v4327_v58 = vpack.c.bf16 %v4323_v44, %v4322_v16 }
0x1544   : > { %5550 = vmatmul.mubr.msk.bf16.gmra.mrb[152].mxu1 %vm1316_vm11, %v4327_v58 }
0x1603   : > { %v5547_v17 = vpop.f32.mrb[148].mxu1 }
0x1604   : > { %v4394_v2 = vadd.f32 %v5547_v17, %v4741_v15  ;;  %v4385_v21 = vpop.f32.mrb[149].mxu1 }
0x1605   : > { %v4386_v3 = vadd.f32 %v4741_v15, %v4385_v21  ;;  %v5548_v49 = vpop.f32.mrb[150].mxu1 }
0x1606   : > { %4418 = vst [vmem:[%s247_s30 + $0x10] sm:$0xff] %v4394_v2  ;;  %v4397_v61 = vadd.f32 %v5548_v49, %v4741_v15  ;;  %v4388_v20 = vpop.f32.mrb[151].mxu1 }
0x1607   : > { %4416 = vst [vmem:[%s247_s30] sm:$0xff] %v4386_v3  ;;  %v4389_v19 = vadd.f32 %v4741_v15, %v4388_v20 }
0x1608   : > { %4419 = vst [vmem:[%s247_s30 + $0x18] sm:$0xff] %v4397_v61 }
0x1609   : > { %4417 = vst [vmem:[%s247_s30 + $0x8] sm:$0xff] %v4389_v19 }
0x1617   : > { %v5551_v41 = vpop.f32.mrb[152].mxu1 }
0x1618   : > { %v4410_v57 = vadd.f32 %v5551_v41, %v4741_v15  ;;  %v4401_v22 = vpop.f32.mrb[153].mxu1 }
0x1619   : > { %v4402_v24 = vadd.f32 %v4741_v15, %v4401_v22  ;;  %v5552_v29 = vpop.f32.mrb[154].mxu1 }
0x161a   : > { %4422 = vst [vmem:[%s247_s30 + $0x30] sm:$0xff] %v4410_v57  ;;  %v4413_v38 = vadd.f32 %v5552_v29, %v4741_v15  ;;  %v4404_v53 = vpop.f32.mrb[155].mxu1 }
0x161b   : > { %4420 = vst [vmem:[%s247_s30 + $0x20] sm:$0xff] %v4402_v24  ;;  %v4405_v36 = vadd.f32 %v4741_v15, %v4404_v53 }
0x161c   : > { %4423 = vst [vmem:[%s247_s30 + $0x38] sm:$0xff] %v4413_v38 }
0x161d   : > { %4421 = vst [vmem:[%s247_s30 + $0x28] sm:$0xff] %v4405_v36 }
0x161e   : > { %6459 = shalt.err (!%p6456_p3)
}
0x161f   : > { %s6460_s14 = scalar_lea.hbm %s7924_s11, 1024  ;;  %s6464_s23 = scalar_lea.hbm %s7976_s5, 2048 }
0x1620   : > { %p6461_p4 = scmp.ne.s32.totalorder %s7924_s11, %s6460_s14  ;;  %p6465_p9 = scmp.lt.u32.totalorder %s7924_s11, %s7976_s5 }
0x1621   : > { %p6466_p10 = scmp.lt.u32.totalorder %s6464_s23, %s6460_s14  ;;  %p6468_p12 = scmp.lt.u32.totalorder %s6460_s14, %s7924_s11 }
0x1622   : > { %p6462_p7 = pnand %p6461_p4, %p6583_p5 }
0x1623   : > { %p6467_p11 = por %p6466_p10, %p6465_p9 }
0x1624   : > { %p6463_p8 = pneg %p6462_p7 }
0x1625   : > { %p6469_p13 = por %p6468_p12, %p6467_p11 }
0x1627   : > { %p6470_p0 = pnand %p6469_p13, %p6463_p8 }
0x1629   : > { %6473 = shalt.err (!%p6470_p0)
}
0x162a   : > { %s6513_s30 = smov 128   ;;  %s6514_s6 = smov 8  }
0x162b   : > { %5623 = dma.vmem_to_hbm [thread:$0]  (%p6583_p5), %s7926_s7, 1024, %s7924_s11, %s7930_s22, %s6513_s30, %s6513_s30, %s6514_s6  }
0x162c PF: > { %p5629_p1 = scmp.ge.s32.totalorder %s6508_s21, 2  ;;  %s4453_s8 = sand.u32 1, %s6496_s18  }
0x162d   : > { %s4454_s10 = scalar_lea.sflag [#allocation3], %s4453_s8 }
0x162e   : > { %p5626_p2 = pnand %p5629_p1, %p6587_p6 }
0x1630   : > { %6491 = dma.done.wait (!%p5626_p2), %s4454_s10, 1024  }
0x1631   : > { %6493 = vsyncadd (!%p5626_p2), %s4454_s10, 4294966272  ;;  %p15_p3 = scmp.ge.s32.totalorder %s6570_s24, 4   ;;  %s8060_s18 = smov %s6500_s19 }
0x1632   : > { %s8061_s19 = smov %s6504_s20  ;;  %s8062_s20 = smov %s6581_s27 }
0x1633   : > { %s8063_s21 = smov %s6570_s24  ;;  %17 = sbr.rel (!%p15_p3) target bundleno = 3 (0x3), region = 81 }
0x163a   :  { %4459 = vsyncpa [#allocation3], 1 }
0x163b   :  { %4461 = vsyncpa [#allocation3 + $0x1], 1 }

</bundles_post_ra>
